<compile_context>
chip_gen: v5e
topology: v5e:2x2
jax: 0.10.0
libtpu: 0.0.40
codegen_flags: <defaults>
</compile_context>

<pallas_src>
import functools

import jax
import jax.numpy as jnp
from jax.experimental import pallas as pl
from jax.experimental.pallas import tpu as pltpu

LANE = 128  # TPU lane width; embedding dim is padded to a multiple of this.


# ----------------------------------------------------------------------------
# Kernel 1: GCN layer  out = relu((A_norm @ E0) @ W)   (the "compute_graph" hot path)
#   A tile (tm, tk) bf16, E0 tile (tk, Dp) bf16, W (Dp, Dp) bf16 resident.
#   f32 accumulator in VMEM; @W + relu ride in the k==last epilogue.
# ----------------------------------------------------------------------------
def _gcn_layer_kernel(a_ref, e_ref, w_ref, out_ref, acc_ref):
    k = pl.program_id(1)

    @pl.when(k == 0)
    def _():
        acc_ref[...] = jnp.zeros_like(acc_ref)

    acc_ref[...] += jnp.dot(a_ref[...], e_ref[...],
                            preferred_element_type=jnp.float32)

    @pl.when(k == pl.num_programs(1) - 1)
    def _():
        agg = acc_ref[...].astype(w_ref.dtype)               # bf16 for the MXU
        out = jnp.dot(agg, w_ref[...], preferred_element_type=jnp.float32)
        out_ref[...] = jnp.maximum(out, 0.0).astype(out_ref.dtype)


def compute_graph(a_norm, e0, w, *, tile_m=256, tile_k=512):
    """relu((A_norm @ E0) @ W) -> f32 [num_entity, padded_dim]."""
    n, n2 = a_norm.shape
    n_e, dp = e0.shape
    assert n == n2 == n_e and w.shape == (dp, dp) and dp % LANE == 0

    tm = min(tile_m, n)
    tk = min(tile_k, n)
    assert n % tm == 0 and n % tk == 0, "num_entity must divide the chosen tiles"

    return pl.pallas_call(
        _gcn_layer_kernel,
        out_shape=jax.ShapeDtypeStruct((n, dp), jnp.float32),
        grid_spec=pltpu.PrefetchScalarGridSpec(
            num_scalar_prefetch=0,
            grid=(n // tm, n // tk),                          # reduction axis last
            in_specs=[
                pl.BlockSpec((tm, tk), lambda i, k: (i, k)),  # A_norm tile (dominant DMA)
                pl.BlockSpec((tk, dp), lambda i, k: (k, 0)),  # E0 tile
                pl.BlockSpec((dp, dp), lambda i, k: (0, 0)),  # W resident
            ],
            out_specs=pl.BlockSpec((tm, dp), lambda i, k: (i, 0)),
            scratch_shapes=[pltpu.VMEM((tm, dp), jnp.float32)],
        ),
        compiler_params=pltpu.CompilerParams(
            dimension_semantics=("parallel", "arbitrary")),   # row tiles shard across TCs
    )(a_norm, e0, w)


# ----------------------------------------------------------------------------
# Kernel 2: fused embedding-gather + TransE loss  softplus(un - up)
#   h/tp/tn indices are scalar-prefetched into SMEM; embedding rows are gathered from
#   HBM with chunked async DMAs; output is lane-dense (1, batch_tile) per grid step.
# ----------------------------------------------------------------------------
def _gather_loss_kernel(h_idx, tp_idx, tn_idx,      # scalar-prefetch SMEM int32 [B_pad]
                        emb_hbm,                    # ANY (HBM) f32 [num_entity, Dp]
                        out_ref,                    # VMEM f32 (1, batch_tile)
                        h_buf, tp_buf, tn_buf,      # VMEM f32 (batch_tile, Dp)
                        sem,                        # DMA semaphores (3,)
                        *, batch_tile, gather_chunk):
    tile = pl.program_id(0)
    base = tile * batch_tile
    num_chunks = batch_tile // gather_chunk

    @pl.loop(0, num_chunks)
    def _(c):
        copies = []
        for g in range(gather_chunk):               # static unroll within the chunk
            j = c * gather_chunk + g
            for idx_ref, buf, s in ((h_idx, h_buf, 0),
                                    (tp_idx, tp_buf, 1),
                                    (tn_idx, tn_buf, 2)):
                row = idx_ref[base + j]
                copies.append(pltpu.make_async_copy(
                    emb_hbm.at[pl.ds(row, 1)], buf.at[pl.ds(j, 1)], sem.at[s]))
        for cp in copies:
            cp.start()
        for cp in copies:                            # all waits precede any compute
            cp.wait()

    d_pos = h_buf[...] - tp_buf[...]
    d_neg = h_buf[...] - tn_buf[...]
    x = jnp.sum(d_neg * d_neg - d_pos * d_pos, axis=1)        # un - up, [batch_tile]
    # numerically-stable softplus: max(x, 0) + log1p(exp(-|x|))
    loss = jnp.maximum(x, 0.0) + jnp.log1p(jnp.exp(-jnp.abs(x)))
    out_ref[...] = loss.reshape(1, batch_tile)


def fused_gather_transe_loss(emb, h, tp, tn, *, batch_tile=128, gather_chunk=8):
    b = h.shape[0]
    _, dp = emb.shape
    assert batch_tile % LANE == 0 and batch_tile % gather_chunk == 0

    num_tiles = pl.cdiv(b, batch_tile)
    padded_b = num_tiles * batch_tile
    pad = padded_b - b                              # pad indices with 0 (valid row); sliced off
    h_p = jnp.pad(h.astype(jnp.int32), (0, pad))
    tp_p = jnp.pad(tp.astype(jnp.int32), (0, pad))
    tn_p = jnp.pad(tn.astype(jnp.int32), (0, pad))

    kernel = functools.partial(_gather_loss_kernel,
                               batch_tile=batch_tile, gather_chunk=gather_chunk)
    out = pl.pallas_call(
        kernel,
        out_shape=jax.ShapeDtypeStruct((num_tiles, batch_tile), jnp.float32),
        grid_spec=pltpu.PrefetchScalarGridSpec(
            num_scalar_prefetch=3,
            grid=(num_tiles,),
            in_specs=[pl.BlockSpec(memory_space=pl.ANY)],     # table stays in HBM
            out_specs=pl.BlockSpec((1, batch_tile), lambda t, hh, tt, nn: (t, 0)),
            scratch_shapes=[pltpu.VMEM((batch_tile, dp), emb.dtype)] * 3
                           + [pltpu.SemaphoreType.DMA((3,))],
        ),
        compiler_params=pltpu.CompilerParams(dimension_semantics=("arbitrary",)),
    )(h_p, tp_p, tn_p, emb)
    return out.reshape(padded_b)[:b]


# ----------------------------------------------------------------------------
# GCNEmb.get_loss(h, r, tp, tn)
# ----------------------------------------------------------------------------
@jax.jit
def gcn_emb_get_loss(params, h, r, tp, tn):
    assert h.shape == r.shape == tp.shape == tn.shape
    del r  # indexed in the original signature but unused in get_loss
    entity_embeddings = compute_graph(params["a_norm"], params["e0"], params["w"])
    return fused_gather_transe_loss(entity_embeddings, h, tp, tn)


# ----------------------------------------------------------------------------
# Deterministic parameter construction (synthetic — no checkpoint load)
# Embedding dim is zero-padded to a multiple of 128 lanes; parameters stored in bf16
# (MXU-native input dtype on v5e/v6e/v7x), accumulation stays f32.
# ----------------------------------------------------------------------------
def make_params(key, num_entity, dim):
    k_e, k_w, k_a = jax.random.split(key, 3)
    dp = ((dim + LANE - 1) // LANE) * LANE
    e0 = jax.random.normal(k_e, (num_entity, dim), dtype=jnp.float32) * 0.1
    w = jax.random.normal(k_w, (dim, dim), dtype=jnp.float32) * 0.1
    e0 = jnp.pad(e0, ((0, 0), (0, dp - dim)))
    w = jnp.pad(w, ((0, dp - dim), (0, dp - dim)))
    # synthetic symmetric adjacency with self loops, D^-1/2 A D^-1/2 normalization (glue)
    a = (jax.random.uniform(k_a, (num_entity, num_entity)) < 0.05).astype(jnp.float32)
    a = jnp.maximum(a, a.T) + jnp.eye(num_entity, dtype=jnp.float32)
    deg_inv_sqrt = 1.0 / jnp.sqrt(jnp.sum(a, axis=1))
    a_norm = a * deg_inv_sqrt[:, None] * deg_inv_sqrt[None, :]
    return {"a_norm": a_norm.astype(jnp.bfloat16),
            "e0": e0.astype(jnp.bfloat16),
            "w": w.astype(jnp.bfloat16)}


def reference_loss(params, h, r, tp, tn):
    del r
    agg = jnp.dot(params["a_norm"], params["e0"], preferred_element_type=jnp.float32)
    emb = jnp.maximum(
        jnp.dot(agg.astype(jnp.bfloat16), params["w"],
                preferred_element_type=jnp.float32), 0.0)
    h_e, tp_e, tn_e = emb[h], emb[tp], emb[tn]
    up = jnp.sum((h_e - tp_e) ** 2, axis=1)
    un = jnp.sum((h_e - tn_e) ** 2, axis=1)
    return jax.nn.softplus(un - up)


if __name__ == "__main__":
    num_entity = 1024
    dim = 32          # model/dim (padded to 128 lanes internally)
    batch = 8

    key = jax.random.PRNGKey(0)
    k_params, k_h, k_r, k_tp, k_tn = jax.random.split(key, 5)

    params = make_params(k_params, num_entity, dim)
    h = jax.random.randint(k_h, (batch,), 0, num_entity, dtype=jnp.int32)
    r = jax.random.randint(k_r, (batch,), 0, 8, dtype=jnp.int32)
    tp = jax.random.randint(k_tp, (batch,), 0, num_entity, dtype=jnp.int32)
    tn = jax.random.randint(k_tn, (batch,), 0, num_entity, dtype=jnp.int32)

    loss = jax.block_until_ready(gcn_emb_get_loss(params, h, r, tp, tn))
    assert loss.shape == (batch,)

    ref = jax.block_until_ready(reference_loss(params, h, r, tp, tn))
    assert jnp.allclose(loss, ref, atol=5e-3, rtol=5e-3), (loss, ref)

    print("KERNEL_OK")
</pallas_src>

<mosaic_0001>
module attributes {stable_mosaic.version = 11 : i64} {
  func.func @_gcn_layer_kernel(%arg0: i32, %arg1: i32, %arg2: memref<256x512xbf16, #tpu.memory_space<vmem>>, %arg3: memref<512x128xbf16, #tpu.memory_space<vmem>>, %arg4: memref<128x128xbf16, #tpu.memory_space<vmem>>, %arg5: memref<256x128xf32, #tpu.memory_space<vmem>>, %arg6: memref<256x128xf32, #tpu.memory_space<vmem>>) attributes {dimension_semantics = [#tpu.dimension_semantics<parallel>, #tpu.dimension_semantics<arbitrary>], iteration_bounds = array<i64: 4, 2>, scalar_prefetch = 0 : i64, scratch_operands = 1 : i64, tpu.core_type = #tpu.core_type<tc>, window_params = [{transform_indices = @transform_0, window_bounds = array<i64: 256, 512>}, {transform_indices = @transform_1, window_bounds = array<i64: 512, 128>}, {pipeline_mode = #tpu.pipeline_mode<synchronous>, transform_indices = @transform_2, window_bounds = array<i64: 128, 128>}, {transform_indices = @transform_3, window_bounds = array<i64: 256, 128>}]} {
    %c0_i32 = arith.constant 0 : i32
    %0 = arith.cmpi eq, %arg1, %c0_i32 : i32
    %1 = arith.extui %0 : i1 to i32
    %c0_i32_0 = arith.constant 0 : i32
    %2 = arith.cmpi ne, %1, %c0_i32_0 : i32
    scf.if %2 {
      %cst_9 = arith.constant 0.000000e+00 : f32
      %12 = vector.broadcast %cst_9 : f32 to vector<256x128xf32>
      %c0_10 = arith.constant 0 : index
      %c0_11 = arith.constant 0 : index
      %13 = vector.load %arg6[%c0_10, %c0_11] : memref<256x128xf32, #tpu.memory_space<vmem>>, vector<256x128xf32>
      tpu.vector_store %arg6[%c0_10, %c0_11], %12 {strides = array<i32>} : memref<256x128xf32, #tpu.memory_space<vmem>>, vector<256x128xf32>,
    } else {
    }
    %c0 = arith.constant 0 : index
    %c0_1 = arith.constant 0 : index
    %3 = vector.load %arg6[%c0, %c0_1] : memref<256x128xf32, #tpu.memory_space<vmem>>, vector<256x128xf32>
    %c0_2 = arith.constant 0 : index
    %c0_3 = arith.constant 0 : index
    %4 = vector.load %arg2[%c0_2, %c0_3] : memref<256x512xbf16, #tpu.memory_space<vmem>>, vector<256x512xbf16>
    %c0_4 = arith.constant 0 : index
    %c0_5 = arith.constant 0 : index
    %5 = vector.load %arg3[%c0_4, %c0_5] : memref<512x128xbf16, #tpu.memory_space<vmem>>, vector<512x128xbf16>
    %cst = arith.constant dense<0.000000e+00> : vector<256x128xf32>
    %6 = tpu.matmul %4, %5, %cst {dimension_numbers = #tpu.dot_dimension_numbers<[1], [0], [0], [1], [0, 0, 1, 1], [], []>} : vector<256x512xbf16>, vector<512x128xbf16>, vector<256x128xf32> -> vector<256x128xf32>
    %7 = arith.addf %3, %6 : vector<256x128xf32>
    %c0_6 = arith.constant 0 : index
    %c0_7 = arith.constant 0 : index
    %8 = vector.load %arg6[%c0_6, %c0_7] : memref<256x128xf32, #tpu.memory_space<vmem>>, vector<256x128xf32>
    tpu.vector_store %arg6[%c0_6, %c0_7], %7 {strides = array<i32>} : memref<256x128xf32, #tpu.memory_space<vmem>>, vector<256x128xf32>,
    %c1_i32 = arith.constant 1 : i32
    %9 = arith.cmpi eq, %arg1, %c1_i32 : i32
    %10 = arith.extui %9 : i1 to i32
    %c0_i32_8 = arith.constant 0 : i32
    %11 = arith.cmpi ne, %10, %c0_i32_8 : i32
    scf.if %11 {
      %c0_9 = arith.constant 0 : index
      %c0_10 = arith.constant 0 : index
      %12 = vector.load %arg6[%c0_9, %c0_10] : memref<256x128xf32, #tpu.memory_space<vmem>>, vector<256x128xf32>
      %13 = arith.truncf %12 : vector<256x128xf32> to vector<256x128xbf16>
      %c0_11 = arith.constant 0 : index
      %c0_12 = arith.constant 0 : index
      %14 = vector.load %arg4[%c0_11, %c0_12] : memref<128x128xbf16, #tpu.memory_space<vmem>>, vector<128x128xbf16>
      %cst_13 = arith.constant dense<0.000000e+00> : vector<256x128xf32>
      %15 = tpu.matmul %13, %14, %cst_13 {dimension_numbers = #tpu.dot_dimension_numbers<[1], [0], [0], [1], [0, 0, 1, 1], [], []>} : vector<256x128xbf16>, vector<128x128xbf16>, vector<256x128xf32> -> vector<256x128xf32>
      %cst_14 = arith.constant 0.000000e+00 : f32
      %16 = vector.broadcast %cst_14 : f32 to vector<256x128xf32>
      %17 = arith.maximumf %15, %16 : vector<256x128xf32>
      %c0_15 = arith.constant 0 : index
      %c0_16 = arith.constant 0 : index
      %18 = vector.load %arg5[%c0_15, %c0_16] : memref<256x128xf32, #tpu.memory_space<vmem>>, vector<256x128xf32>
      tpu.vector_store %arg5[%c0_15, %c0_16], %17 {strides = array<i32>} : memref<256x128xf32, #tpu.memory_space<vmem>>, vector<256x128xf32>,
    } else {
    }
    return
  }
  func.func @transform_0(%arg0: i32, %arg1: i32) -> (i32, i32) {
    %c0_i32 = arith.constant 0 : i32
    return %arg0, %arg1 : i32, i32
  }
  func.func @transform_1(%arg0: i32, %arg1: i32) -> (i32, i32) {
    %c0_i32 = arith.constant 0 : i32
    %c0_i32_0 = arith.constant 0 : i32
    return %arg1, %c0_i32 : i32, i32
  }
  func.func @transform_2(%arg0: i32, %arg1: i32) -> (i32, i32) {
    %c0_i32 = arith.constant 0 : i32
    %c0_i32_0 = arith.constant 0 : i32
    %c0_i32_1 = arith.constant 0 : i32
    return %c0_i32, %c0_i32_0 : i32, i32
  }
  func.func @transform_3(%arg0: i32, %arg1: i32) -> (i32, i32) {
    %c0_i32 = arith.constant 0 : i32
    %c0_i32_0 = arith.constant 0 : i32
    return %arg0, %c0_i32 : i32, i32
  }
}

module attributes {stable_mosaic.version = 11 : i64} {
  func.func @_gather_loss_kernel(%arg0: i32, %arg1: memref<128xi32, #tpu.memory_space<smem>>, %arg2: memref<128xi32, #tpu.memory_space<smem>>, %arg3: memref<128xi32, #tpu.memory_space<smem>>, %arg4: memref<1024x128xf32, #tpu.memory_space<any>>, %arg5: memref<1x128xf32, #tpu.memory_space<vmem>>, %arg6: memref<128x128xf32, #tpu.memory_space<vmem>>, %arg7: memref<128x128xf32, #tpu.memory_space<vmem>>, %arg8: memref<128x128xf32, #tpu.memory_space<vmem>>, %arg9: memref<3x!tpu.dma_semaphore, #tpu.memory_space<semaphore_mem>>) attributes {dimension_semantics = [#tpu.dimension_semantics<arbitrary>], iteration_bounds = array<i64: 1>, scalar_prefetch = 3 : i64, scratch_operands = 4 : i64, tpu.core_type = #tpu.core_type<tc>, window_params = [{}, {transform_indices = @transform_1, window_bounds = array<i64: 1, 128>}]} {
    %c128_i32 = arith.constant 128 : i32
    %0 = arith.muli %arg0, %c128_i32 : i32
    %c0_i32 = arith.constant 0 : i32
    %c16_i32 = arith.constant 16 : i32
    %1 = arith.addi %c0_i32, %c16_i32 : i32
    %c1_i32 = arith.constant 1 : i32
    scf.for %arg10 = %c0_i32 to %1 step %c1_i32  : i32 {
      %c1_i32_12 = arith.constant 1 : i32
      %22 = arith.muli %arg10, %c1_i32_12 : i32
      %c0_i32_13 = arith.constant 0 : i32
      %23 = arith.addi %c0_i32_13, %22 : i32
      %c8_i32 = arith.constant 8 : i32
      %24 = arith.muli %23, %c8_i32 : i32
      %c0_i32_14 = arith.constant 0 : i32
      %25 = arith.addi %24, %c0_i32_14 : i32
      %26 = arith.addi %0, %25 : i32
      %27 = arith.index_cast %26 : i32 to index
      %28 = memref.load %arg1[%27] : memref<128xi32, #tpu.memory_space<smem>>
      %29 = arith.addi %0, %25 : i32
      %30 = arith.index_cast %29 : i32 to index
      %31 = memref.load %arg2[%30] : memref<128xi32, #tpu.memory_space<smem>>
      %32 = arith.addi %0, %25 : i32
      %33 = arith.index_cast %32 : i32 to index
      %34 = memref.load %arg3[%33] : memref<128xi32, #tpu.memory_space<smem>>
      %c8_i32_15 = arith.constant 8 : i32
      %35 = arith.muli %23, %c8_i32_15 : i32
      %c1_i32_16 = arith.constant 1 : i32
      %36 = arith.addi %35, %c1_i32_16 : i32
      %37 = arith.addi %0, %36 : i32
      %38 = arith.index_cast %37 : i32 to index
      %39 = memref.load %arg1[%38] : memref<128xi32, #tpu.memory_space<smem>>
      %40 = arith.addi %0, %36 : i32
      %41 = arith.index_cast %40 : i32 to index
      %42 = memref.load %arg2[%41] : memref<128xi32, #tpu.memory_space<smem>>
      %43 = arith.addi %0, %36 : i32
      %44 = arith.index_cast %43 : i32 to index
      %45 = memref.load %arg3[%44] : memref<128xi32, #tpu.memory_space<smem>>
      %c8_i32_17 = arith.constant 8 : i32
      %46 = arith.muli %23, %c8_i32_17 : i32
      %c2_i32 = arith.constant 2 : i32
      %47 = arith.addi %46, %c2_i32 : i32
      %48 = arith.addi %0, %47 : i32
      %49 = arith.index_cast %48 : i32 to index
      %50 = memref.load %arg1[%49] : memref<128xi32, #tpu.memory_space<smem>>
      %51 = arith.addi %0, %47 : i32
      %52 = arith.index_cast %51 : i32 to index
      %53 = memref.load %arg2[%52] : memref<128xi32, #tpu.memory_space<smem>>
      %54 = arith.addi %0, %47 : i32
      %55 = arith.index_cast %54 : i32 to index
      %56 = memref.load %arg3[%55] : memref<128xi32, #tpu.memory_space<smem>>
      %c8_i32_18 = arith.constant 8 : i32
      %57 = arith.muli %23, %c8_i32_18 : i32
      %c3_i32 = arith.constant 3 : i32
      %58 = arith.addi %57, %c3_i32 : i32
      %59 = arith.addi %0, %58 : i32
      %60 = arith.index_cast %59 : i32 to index
      %61 = memref.load %arg1[%60] : memref<128xi32, #tpu.memory_space<smem>>
      %62 = arith.addi %0, %58 : i32
      %63 = arith.index_cast %62 : i32 to index
      %64 = memref.load %arg2[%63] : memref<128xi32, #tpu.memory_space<smem>>
      %65 = arith.addi %0, %58 : i32
      %66 = arith.index_cast %65 : i32 to index
      %67 = memref.load %arg3[%66] : memref<128xi32, #tpu.memory_space<smem>>
      %c8_i32_19 = arith.constant 8 : i32
      %68 = arith.muli %23, %c8_i32_19 : i32
      %c4_i32 = arith.constant 4 : i32
      %69 = arith.addi %68, %c4_i32 : i32
      %70 = arith.addi %0, %69 : i32
      %71 = arith.index_cast %70 : i32 to index
      %72 = memref.load %arg1[%71] : memref<128xi32, #tpu.memory_space<smem>>
      %73 = arith.addi %0, %69 : i32
      %74 = arith.index_cast %73 : i32 to index
      %75 = memref.load %arg2[%74] : memref<128xi32, #tpu.memory_space<smem>>
      %76 = arith.addi %0, %69 : i32
      %77 = arith.index_cast %76 : i32 to index
      %78 = memref.load %arg3[%77] : memref<128xi32, #tpu.memory_space<smem>>
      %c8_i32_20 = arith.constant 8 : i32
      %79 = arith.muli %23, %c8_i32_20 : i32
      %c5_i32 = arith.constant 5 : i32
      %80 = arith.addi %79, %c5_i32 : i32
      %81 = arith.addi %0, %80 : i32
      %82 = arith.index_cast %81 : i32 to index
      %83 = memref.load %arg1[%82] : memref<128xi32, #tpu.memory_space<smem>>
      %84 = arith.addi %0, %80 : i32
      %85 = arith.index_cast %84 : i32 to index
      %86 = memref.load %arg2[%85] : memref<128xi32, #tpu.memory_space<smem>>
      %87 = arith.addi %0, %80 : i32
      %88 = arith.index_cast %87 : i32 to index
      %89 = memref.load %arg3[%88] : memref<128xi32, #tpu.memory_space<smem>>
      %c8_i32_21 = arith.constant 8 : i32
      %90 = arith.muli %23, %c8_i32_21 : i32
      %c6_i32 = arith.constant 6 : i32
      %91 = arith.addi %90, %c6_i32 : i32
      %92 = arith.addi %0, %91 : i32
      %93 = arith.index_cast %92 : i32 to index
      %94 = memref.load %arg1[%93] : memref<128xi32, #tpu.memory_space<smem>>
      %95 = arith.addi %0, %91 : i32
      %96 = arith.index_cast %95 : i32 to index
      %97 = memref.load %arg2[%96] : memref<128xi32, #tpu.memory_space<smem>>
      %98 = arith.addi %0, %91 : i32
      %99 = arith.index_cast %98 : i32 to index
      %100 = memref.load %arg3[%99] : memref<128xi32, #tpu.memory_space<smem>>
      %c8_i32_22 = arith.constant 8 : i32
      %101 = arith.muli %23, %c8_i32_22 : i32
      %c7_i32 = arith.constant 7 : i32
      %102 = arith.addi %101, %c7_i32 : i32
      %103 = arith.addi %0, %102 : i32
      %104 = arith.index_cast %103 : i32 to index
      %105 = memref.load %arg1[%104] : memref<128xi32, #tpu.memory_space<smem>>
      %106 = arith.addi %0, %102 : i32
      %107 = arith.index_cast %106 : i32 to index
      %108 = memref.load %arg2[%107] : memref<128xi32, #tpu.memory_space<smem>>
      %109 = arith.addi %0, %102 : i32
      %110 = arith.index_cast %109 : i32 to index
      %111 = memref.load %arg3[%110] : memref<128xi32, #tpu.memory_space<smem>>
      %c0_i32_23 = arith.constant 0 : i32
      %c0_i32_24 = arith.constant 0 : i32
      %112 = tpu.memref_slice %arg4[%28, %c0_i32_24] : memref<1024x128xf32, #tpu.memory_space<any>> -> memref<1x128xf32, #tpu.memory_space<any>>
      %c0_i32_25 = arith.constant 0 : i32
      %113 = tpu.memref_slice %arg6[%25, %c0_i32_25] : memref<128x128xf32, #tpu.memory_space<vmem>> -> memref<1x128xf32, #tpu.memory_space<vmem>>
      %114 = tpu.memref_slice %arg9[%c0_i32_23] : memref<3x!tpu.dma_semaphore, #tpu.memory_space<semaphore_mem>> -> memref<1x!tpu.dma_semaphore, #tpu.memory_space<semaphore_mem>>
      %115 = tpu.memref_squeeze %114 : memref<1x!tpu.dma_semaphore, #tpu.memory_space<semaphore_mem>> -> memref<!tpu.dma_semaphore, #tpu.memory_space<semaphore_mem>>
      tpu.enqueue_dma source(%112 : memref<1x128xf32, #tpu.memory_space<any>>) target(%113 : memref<1x128xf32, #tpu.memory_space<vmem>>) target_semaphore(%115 : memref<!tpu.dma_semaphore, #tpu.memory_space<semaphore_mem>>)
      %c1_i32_26 = arith.constant 1 : i32
      %c0_i32_27 = arith.constant 0 : i32
      %116 = tpu.memref_slice %arg4[%31, %c0_i32_27] : memref<1024x128xf32, #tpu.memory_space<any>> -> memref<1x128xf32, #tpu.memory_space<any>>
      %c0_i32_28 = arith.constant 0 : i32
      %117 = tpu.memref_slice %arg7[%25, %c0_i32_28] : memref<128x128xf32, #tpu.memory_space<vmem>> -> memref<1x128xf32, #tpu.memory_space<vmem>>
      %118 = tpu.memref_slice %arg9[%c1_i32_26] : memref<3x!tpu.dma_semaphore, #tpu.memory_space<semaphore_mem>> -> memref<1x!tpu.dma_semaphore, #tpu.memory_space<semaphore_mem>>
      %119 = tpu.memref_squeeze %118 : memref<1x!tpu.dma_semaphore, #tpu.memory_space<semaphore_mem>> -> memref<!tpu.dma_semaphore, #tpu.memory_space<semaphore_mem>>
      tpu.enqueue_dma source(%116 : memref<1x128xf32, #tpu.memory_space<any>>) target(%117 : memref<1x128xf32, #tpu.memory_space<vmem>>) target_semaphore(%119 : memref<!tpu.dma_semaphore, #tpu.memory_space<semaphore_mem>>)
      %c2_i32_29 = arith.constant 2 : i32
      %c0_i32_30 = arith.constant 0 : i32
      %120 = tpu.memref_slice %arg4[%34, %c0_i32_30] : memref<1024x128xf32, #tpu.memory_space<any>> -> memref<1x128xf32, #tpu.memory_space<any>>
      %c0_i32_31 = arith.constant 0 : i32
      %121 = tpu.memref_slice %arg8[%25, %c0_i32_31] : memref<128x128xf32, #tpu.memory_space<vmem>> -> memref<1x128xf32, #tpu.memory_space<vmem>>
      %122 = tpu.memref_slice %arg9[%c2_i32_29] : memref<3x!tpu.dma_semaphore, #tpu.memory_space<semaphore_mem>> -> memref<1x!tpu.dma_semaphore, #tpu.memory_space<semaphore_mem>>
      %123 = tpu.memref_squeeze %122 : memref<1x!tpu.dma_semaphore, #tpu.memory_space<semaphore_mem>> -> memref<!tpu.dma_semaphore, #tpu.memory_space<semaphore_mem>>
      tpu.enqueue_dma source(%120 : memref<1x128xf32, #tpu.memory_space<any>>) target(%121 : memref<1x128xf32, #tpu.memory_space<vmem>>) target_semaphore(%123 : memref<!tpu.dma_semaphore, #tpu.memory_space<semaphore_mem>>)
      %c0_i32_32 = arith.constant 0 : i32
      %c0_i32_33 = arith.constant 0 : i32
      %124 = tpu.memref_slice %arg4[%39, %c0_i32_33] : memref<1024x128xf32, #tpu.memory_space<any>> -> memref<1x128xf32, #tpu.memory_space<any>>
      %c0_i32_34 = arith.constant 0 : i32
      %125 = tpu.memref_slice %arg6[%36, %c0_i32_34] : memref<128x128xf32, #tpu.memory_space<vmem>> -> memref<1x128xf32, #tpu.memory_space<vmem>>
      %126 = tpu.memref_slice %arg9[%c0_i32_32] : memref<3x!tpu.dma_semaphore, #tpu.memory_space<semaphore_mem>> -> memref<1x!tpu.dma_semaphore, #tpu.memory_space<semaphore_mem>>
      %127 = tpu.memref_squeeze %126 : memref<1x!tpu.dma_semaphore, #tpu.memory_space<semaphore_mem>> -> memref<!tpu.dma_semaphore, #tpu.memory_space<semaphore_mem>>
      tpu.enqueue_dma source(%124 : memref<1x128xf32, #tpu.memory_space<any>>) target(%125 : memref<1x128xf32, #tpu.memory_space<vmem>>) target_semaphore(%127 : memref<!tpu.dma_semaphore, #tpu.memory_space<semaphore_mem>>)
      %c1_i32_35 = arith.constant 1 : i32
      %c0_i32_36 = arith.constant 0 : i32
      %128 = tpu.memref_slice %arg4[%42, %c0_i32_36] : memref<1024x128xf32, #tpu.memory_space<any>> -> memref<1x128xf32, #tpu.memory_space<any>>
      %c0_i32_37 = arith.constant 0 : i32
      %129 = tpu.memref_slice %arg7[%36, %c0_i32_37] : memref<128x128xf32, #tpu.memory_space<vmem>> -> memref<1x128xf32, #tpu.memory_space<vmem>>
      %130 = tpu.memref_slice %arg9[%c1_i32_35] : memref<3x!tpu.dma_semaphore, #tpu.memory_space<semaphore_mem>> -> memref<1x!tpu.dma_semaphore, #tpu.memory_space<semaphore_mem>>
      %131 = tpu.memref_squeeze %130 : memref<1x!tpu.dma_semaphore, #tpu.memory_space<semaphore_mem>> -> memref<!tpu.dma_semaphore, #tpu.memory_space<semaphore_mem>>
      tpu.enqueue_dma source(%128 : memref<1x128xf32, #tpu.memory_space<any>>) target(%129 : memref<1x128xf32, #tpu.memory_space<vmem>>) target_semaphore(%131 : memref<!tpu.dma_semaphore, #tpu.memory_space<semaphore_mem>>)
      %c2_i32_38 = arith.constant 2 : i32
      %c0_i32_39 = arith.constant 0 : i32
      %132 = tpu.memref_slice %arg4[%45, %c0_i32_39] : memref<1024x128xf32, #tpu.memory_space<any>> -> memref<1x128xf32, #tpu.memory_space<any>>
      %c0_i32_40 = arith.constant 0 : i32
      %133 = tpu.memref_slice %arg8[%36, %c0_i32_40] : memref<128x128xf32, #tpu.memory_space<vmem>> -> memref<1x128xf32, #tpu.memory_space<vmem>>
      %134 = tpu.memref_slice %arg9[%c2_i32_38] : memref<3x!tpu.dma_semaphore, #tpu.memory_space<semaphore_mem>> -> memref<1x!tpu.dma_semaphore, #tpu.memory_space<semaphore_mem>>
      %135 = tpu.memref_squeeze %134 : memref<1x!tpu.dma_semaphore, #tpu.memory_space<semaphore_mem>> -> memref<!tpu.dma_semaphore, #tpu.memory_space<semaphore_mem>>
      tpu.enqueue_dma source(%132 : memref<1x128xf32, #tpu.memory_space<any>>) target(%133 : memref<1x128xf32, #tpu.memory_space<vmem>>) target_semaphore(%135 : memref<!tpu.dma_semaphore, #tpu.memory_space<semaphore_mem>>)
      %c0_i32_41 = arith.constant 0 : i32
      %c0_i32_42 = arith.constant 0 : i32
      %136 = tpu.memref_slice %arg4[%50, %c0_i32_42] : memref<1024x128xf32, #tpu.memory_space<any>> -> memref<1x128xf32, #tpu.memory_space<any>>
      %c0_i32_43 = arith.constant 0 : i32
      %137 = tpu.memref_slice %arg6[%47, %c0_i32_43] : memref<128x128xf32, #tpu.memory_space<vmem>> -> memref<1x128xf32, #tpu.memory_space<vmem>>
      %138 = tpu.memref_slice %arg9[%c0_i32_41] : memref<3x!tpu.dma_semaphore, #tpu.memory_space<semaphore_mem>> -> memref<1x!tpu.dma_semaphore, #tpu.memory_space<semaphore_mem>>
      %139 = tpu.memref_squeeze %138 : memref<1x!tpu.dma_semaphore, #tpu.memory_space<semaphore_mem>> -> memref<!tpu.dma_semaphore, #tpu.memory_space<semaphore_mem>>
      tpu.enqueue_dma source(%136 : memref<1x128xf32, #tpu.memory_space<any>>) target(%137 : memref<1x128xf32, #tpu.memory_space<vmem>>) target_semaphore(%139 : memref<!tpu.dma_semaphore, #tpu.memory_space<semaphore_mem>>)
      %c1_i32_44 = arith.constant 1 : i32
      %c0_i32_45 = arith.constant 0 : i32
      %140 = tpu.memref_slice %arg4[%53, %c0_i32_45] : memref<1024x128xf32, #tpu.memory_space<any>> -> memref<1x128xf32, #tpu.memory_space<any>>
      %c0_i32_46 = arith.constant 0 : i32
      %141 = tpu.memref_slice %arg7[%47, %c0_i32_46] : memref<128x128xf32, #tpu.memory_space<vmem>> -> memref<1x128xf32, #tpu.memory_space<vmem>>
      %142 = tpu.memref_slice %arg9[%c1_i32_44] : memref<3x!tpu.dma_semaphore, #tpu.memory_space<semaphore_mem>> -> memref<1x!tpu.dma_semaphore, #tpu.memory_space<semaphore_mem>>
      %143 = tpu.memref_squeeze %142 : memref<1x!tpu.dma_semaphore, #tpu.memory_space<semaphore_mem>> -> memref<!tpu.dma_semaphore, #tpu.memory_space<semaphore_mem>>
      tpu.enqueue_dma source(%140 : memref<1x128xf32, #tpu.memory_space<any>>) target(%141 : memref<1x128xf32, #tpu.memory_space<vmem>>) target_semaphore(%143 : memref<!tpu.dma_semaphore, #tpu.memory_space<semaphore_mem>>)
      %c2_i32_47 = arith.constant 2 : i32
      %c0_i32_48 = arith.constant 0 : i32
      %144 = tpu.memref_slice %arg4[%56, %c0_i32_48] : memref<1024x128xf32, #tpu.memory_space<any>> -> memref<1x128xf32, #tpu.memory_space<any>>
      %c0_i32_49 = arith.constant 0 : i32
      %145 = tpu.memref_slice %arg8[%47, %c0_i32_49] : memref<128x128xf32, #tpu.memory_space<vmem>> -> memref<1x128xf32, #tpu.memory_space<vmem>>
      %146 = tpu.memref_slice %arg9[%c2_i32_47] : memref<3x!tpu.dma_semaphore, #tpu.memory_space<semaphore_mem>> -> memref<1x!tpu.dma_semaphore, #tpu.memory_space<semaphore_mem>>
      %147 = tpu.memref_squeeze %146 : memref<1x!tpu.dma_semaphore, #tpu.memory_space<semaphore_mem>> -> memref<!tpu.dma_semaphore, #tpu.memory_space<semaphore_mem>>
      tpu.enqueue_dma source(%144 : memref<1x128xf32, #tpu.memory_space<any>>) target(%145 : memref<1x128xf32, #tpu.memory_space<vmem>>) target_semaphore(%147 : memref<!tpu.dma_semaphore, #tpu.memory_space<semaphore_mem>>)
      %c0_i32_50 = arith.constant 0 : i32
      %c0_i32_51 = arith.constant 0 : i32
      %148 = tpu.memref_slice %arg4[%61, %c0_i32_51] : memref<1024x128xf32, #tpu.memory_space<any>> -> memref<1x128xf32, #tpu.memory_space<any>>
      %c0_i32_52 = arith.constant 0 : i32
      %149 = tpu.memref_slice %arg6[%58, %c0_i32_52] : memref<128x128xf32, #tpu.memory_space<vmem>> -> memref<1x128xf32, #tpu.memory_space<vmem>>
      %150 = tpu.memref_slice %arg9[%c0_i32_50] : memref<3x!tpu.dma_semaphore, #tpu.memory_space<semaphore_mem>> -> memref<1x!tpu.dma_semaphore, #tpu.memory_space<semaphore_mem>>
      %151 = tpu.memref_squeeze %150 : memref<1x!tpu.dma_semaphore, #tpu.memory_space<semaphore_mem>> -> memref<!tpu.dma_semaphore, #tpu.memory_space<semaphore_mem>>
      tpu.enqueue_dma source(%148 : memref<1x128xf32, #tpu.memory_space<any>>) target(%149 : memref<1x128xf32, #tpu.memory_space<vmem>>) target_semaphore(%151 : memref<!tpu.dma_semaphore, #tpu.memory_space<semaphore_mem>>)
      %c1_i32_53 = arith.constant 1 : i32
      %c0_i32_54 = arith.constant 0 : i32
      %152 = tpu.memref_slice %arg4[%64, %c0_i32_54] : memref<1024x128xf32, #tpu.memory_space<any>> -> memref<1x128xf32, #tpu.memory_space<any>>
      %c0_i32_55 = arith.constant 0 : i32
      %153 = tpu.memref_slice %arg7[%58, %c0_i32_55] : memref<128x128xf32, #tpu.memory_space<vmem>> -> memref<1x128xf32, #tpu.memory_space<vmem>>
      %154 = tpu.memref_slice %arg9[%c1_i32_53] : memref<3x!tpu.dma_semaphore, #tpu.memory_space<semaphore_mem>> -> memref<1x!tpu.dma_semaphore, #tpu.memory_space<semaphore_mem>>
      %155 = tpu.memref_squeeze %154 : memref<1x!tpu.dma_semaphore, #tpu.memory_space<semaphore_mem>> -> memref<!tpu.dma_semaphore, #tpu.memory_space<semaphore_mem>>
      tpu.enqueue_dma source(%152 : memref<1x128xf32, #tpu.memory_space<any>>) target(%153 : memref<1x128xf32, #tpu.memory_space<vmem>>) target_semaphore(%155 : memref<!tpu.dma_semaphore, #tpu.memory_space<semaphore_mem>>)
      %c2_i32_56 = arith.constant 2 : i32
      %c0_i32_57 = arith.constant 0 : i32
      %156 = tpu.memref_slice %arg4[%67, %c0_i32_57] : memref<1024x128xf32, #tpu.memory_space<any>> -> memref<1x128xf32, #tpu.memory_space<any>>
      %c0_i32_58 = arith.constant 0 : i32
      %157 = tpu.memref_slice %arg8[%58, %c0_i32_58] : memref<128x128xf32, #tpu.memory_space<vmem>> -> memref<1x128xf32, #tpu.memory_space<vmem>>
      %158 = tpu.memref_slice %arg9[%c2_i32_56] : memref<3x!tpu.dma_semaphore, #tpu.memory_space<semaphore_mem>> -> memref<1x!tpu.dma_semaphore, #tpu.memory_space<semaphore_mem>>
      %159 = tpu.memref_squeeze %158 : memref<1x!tpu.dma_semaphore, #tpu.memory_space<semaphore_mem>> -> memref<!tpu.dma_semaphore, #tpu.memory_space<semaphore_mem>>
      tpu.enqueue_dma source(%156 : memref<1x128xf32, #tpu.memory_space<any>>) target(%157 : memref<1x128xf32, #tpu.memory_space<vmem>>) target_semaphore(%159 : memref<!tpu.dma_semaphore, #tpu.memory_space<semaphore_mem>>)
      %c0_i32_59 = arith.constant 0 : i32
      %c0_i32_60 = arith.constant 0 : i32
      %160 = tpu.memref_slice %arg4[%72, %c0_i32_60] : memref<1024x128xf32, #tpu.memory_space<any>> -> memref<1x128xf32, #tpu.memory_space<any>>
      %c0_i32_61 = arith.constant 0 : i32
      %161 = tpu.memref_slice %arg6[%69, %c0_i32_61] : memref<128x128xf32, #tpu.memory_space<vmem>> -> memref<1x128xf32, #tpu.memory_space<vmem>>
      %162 = tpu.memref_slice %arg9[%c0_i32_59] : memref<3x!tpu.dma_semaphore, #tpu.memory_space<semaphore_mem>> -> memref<1x!tpu.dma_semaphore, #tpu.memory_space<semaphore_mem>>
      %163 = tpu.memref_squeeze %162 : memref<1x!tpu.dma_semaphore, #tpu.memory_space<semaphore_mem>> -> memref<!tpu.dma_semaphore, #tpu.memory_space<semaphore_mem>>
      tpu.enqueue_dma source(%160 : memref<1x128xf32, #tpu.memory_space<any>>) target(%161 : memref<1x128xf32, #tpu.memory_space<vmem>>) target_semaphore(%163 : memref<!tpu.dma_semaphore, #tpu.memory_space<semaphore_mem>>)
      %c1_i32_62 = arith.constant 1 : i32
      %c0_i32_63 = arith.constant 0 : i32
      %164 = tpu.memref_slice %arg4[%75, %c0_i32_63] : memref<1024x128xf32, #tpu.memory_space<any>> -> memref<1x128xf32, #tpu.memory_space<any>>
      %c0_i32_64 = arith.constant 0 : i32
      %165 = tpu.memref_slice %arg7[%69, %c0_i32_64] : memref<128x128xf32, #tpu.memory_space<vmem>> -> memref<1x128xf32, #tpu.memory_space<vmem>>
      %166 = tpu.memref_slice %arg9[%c1_i32_62] : memref<3x!tpu.dma_semaphore, #tpu.memory_space<semaphore_mem>> -> memref<1x!tpu.dma_semaphore, #tpu.memory_space<semaphore_mem>>
      %167 = tpu.memref_squeeze %166 : memref<1x!tpu.dma_semaphore, #tpu.memory_space<semaphore_mem>> -> memref<!tpu.dma_semaphore, #tpu.memory_space<semaphore_mem>>
      tpu.enqueue_dma source(%164 : memref<1x128xf32, #tpu.memory_space<any>>) target(%165 : memref<1x128xf32, #tpu.memory_space<vmem>>) target_semaphore(%167 : memref<!tpu.dma_semaphore, #tpu.memory_space<semaphore_mem>>)
      %c2_i32_65 = arith.constant 2 : i32
      %c0_i32_66 = arith.constant 0 : i32
      %168 = tpu.memref_slice %arg4[%78, %c0_i32_66] : memref<1024x128xf32, #tpu.memory_space<any>> -> memref<1x128xf32, #tpu.memory_space<any>>
      %c0_i32_67 = arith.constant 0 : i32
      %169 = tpu.memref_slice %arg8[%69, %c0_i32_67] : memref<128x128xf32, #tpu.memory_space<vmem>> -> memref<1x128xf32, #tpu.memory_space<vmem>>
      %170 = tpu.memref_slice %arg9[%c2_i32_65] : memref<3x!tpu.dma_semaphore, #tpu.memory_space<semaphore_mem>> -> memref<1x!tpu.dma_semaphore, #tpu.memory_space<semaphore_mem>>
      %171 = tpu.memref_squeeze %170 : memref<1x!tpu.dma_semaphore, #tpu.memory_space<semaphore_mem>> -> memref<!tpu.dma_semaphore, #tpu.memory_space<semaphore_mem>>
      tpu.enqueue_dma source(%168 : memref<1x128xf32, #tpu.memory_space<any>>) target(%169 : memref<1x128xf32, #tpu.memory_space<vmem>>) target_semaphore(%171 : memref<!tpu.dma_semaphore, #tpu.memory_space<semaphore_mem>>)
      %c0_i32_68 = arith.constant 0 : i32
      %c0_i32_69 = arith.constant 0 : i32
      %172 = tpu.memref_slice %arg4[%83, %c0_i32_69] : memref<1024x128xf32, #tpu.memory_space<any>> -> memref<1x128xf32, #tpu.memory_space<any>>
      %c0_i32_70 = arith.constant 0 : i32
      %173 = tpu.memref_slice %arg6[%80, %c0_i32_70] : memref<128x128xf32, #tpu.memory_space<vmem>> -> memref<1x128xf32, #tpu.memory_space<vmem>>
      %174 = tpu.memref_slice %arg9[%c0_i32_68] : memref<3x!tpu.dma_semaphore, #tpu.memory_space<semaphore_mem>> -> memref<1x!tpu.dma_semaphore, #tpu.memory_space<semaphore_mem>>
      %175 = tpu.memref_squeeze %174 : memref<1x!tpu.dma_semaphore, #tpu.memory_space<semaphore_mem>> -> memref<!tpu.dma_semaphore, #tpu.memory_space<semaphore_mem>>
      tpu.enqueue_dma source(%172 : memref<1x128xf32, #tpu.memory_space<any>>) target(%173 : memref<1x128xf32, #tpu.memory_space<vmem>>) target_semaphore(%175 : memref<!tpu.dma_semaphore, #tpu.memory_space<semaphore_mem>>)
      %c1_i32_71 = arith.constant 1 : i32
      %c0_i32_72 = arith.constant 0 : i32
      %176 = tpu.memref_slice %arg4[%86, %c0_i32_72] : memref<1024x128xf32, #tpu.memory_space<any>> -> memref<1x128xf32, #tpu.memory_space<any>>
      %c0_i32_73 = arith.constant 0 : i32
      %177 = tpu.memref_slice %arg7[%80, %c0_i32_73] : memref<128x128xf32, #tpu.memory_space<vmem>> -> memref<1x128xf32, #tpu.memory_space<vmem>>
      %178 = tpu.memref_slice %arg9[%c1_i32_71] : memref<3x!tpu.dma_semaphore, #tpu.memory_space<semaphore_mem>> -> memref<1x!tpu.dma_semaphore, #tpu.memory_space<semaphore_mem>>
      %179 = tpu.memref_squeeze %178 : memref<1x!tpu.dma_semaphore, #tpu.memory_space<semaphore_mem>> -> memref<!tpu.dma_semaphore, #tpu.memory_space<semaphore_mem>>
      tpu.enqueue_dma source(%176 : memref<1x128xf32, #tpu.memory_space<any>>) target(%177 : memref<1x128xf32, #tpu.memory_space<vmem>>) target_semaphore(%179 : memref<!tpu.dma_semaphore, #tpu.memory_space<semaphore_mem>>)
      %c2_i32_74 = arith.constant 2 : i32
      %c0_i32_75 = arith.constant 0 : i32
      %180 = tpu.memref_slice %arg4[%89, %c0_i32_75] : memref<1024x128xf32, #tpu.memory_space<any>> -> memref<1x128xf32, #tpu.memory_space<any>>
      %c0_i32_76 = arith.constant 0 : i32
      %181 = tpu.memref_slice %arg8[%80, %c0_i32_76] : memref<128x128xf32, #tpu.memory_space<vmem>> -> memref<1x128xf32, #tpu.memory_space<vmem>>
      %182 = tpu.memref_slice %arg9[%c2_i32_74] : memref<3x!tpu.dma_semaphore, #tpu.memory_space<semaphore_mem>> -> memref<1x!tpu.dma_semaphore, #tpu.memory_space<semaphore_mem>>
      %183 = tpu.memref_squeeze %182 : memref<1x!tpu.dma_semaphore, #tpu.memory_space<semaphore_mem>> -> memref<!tpu.dma_semaphore, #tpu.memory_space<semaphore_mem>>
      tpu.enqueue_dma source(%180 : memref<1x128xf32, #tpu.memory_space<any>>) target(%181 : memref<1x128xf32, #tpu.memory_space<vmem>>) target_semaphore(%183 : memref<!tpu.dma_semaphore, #tpu.memory_space<semaphore_mem>>)
      %c0_i32_77 = arith.constant 0 : i32
      %c0_i32_78 = arith.constant 0 : i32
      %184 = tpu.memref_slice %arg4[%94, %c0_i32_78] : memref<1024x128xf32, #tpu.memory_space<any>> -> memref<1x128xf32, #tpu.memory_space<any>>
      %c0_i32_79 = arith.constant 0 : i32
      %185 = tpu.memref_slice %arg6[%91, %c0_i32_79] : memref<128x128xf32, #tpu.memory_space<vmem>> -> memref<1x128xf32, #tpu.memory_space<vmem>>
      %186 = tpu.memref_slice %arg9[%c0_i32_77] : memref<3x!tpu.dma_semaphore, #tpu.memory_space<semaphore_mem>> -> memref<1x!tpu.dma_semaphore, #tpu.memory_space<semaphore_mem>>
      %187 = tpu.memref_squeeze %186 : memref<1x!tpu.dma_semaphore, #tpu.memory_space<semaphore_mem>> -> memref<!tpu.dma_semaphore, #tpu.memory_space<semaphore_mem>>
      tpu.enqueue_dma source(%184 : memref<1x128xf32, #tpu.memory_space<any>>) target(%185 : memref<1x128xf32, #tpu.memory_space<vmem>>) target_semaphore(%187 : memref<!tpu.dma_semaphore, #tpu.memory_space<semaphore_mem>>)
      %c1_i32_80 = arith.constant 1 : i32
      %c0_i32_81 = arith.constant 0 : i32
      %188 = tpu.memref_slice %arg4[%97, %c0_i32_81] : memref<1024x128xf32, #tpu.memory_space<any>> -> memref<1x128xf32, #tpu.memory_space<any>>
      %c0_i32_82 = arith.constant 0 : i32
      %189 = tpu.memref_slice %arg7[%91, %c0_i32_82] : memref<128x128xf32, #tpu.memory_space<vmem>> -> memref<1x128xf32, #tpu.memory_space<vmem>>
      %190 = tpu.memref_slice %arg9[%c1_i32_80] : memref<3x!tpu.dma_semaphore, #tpu.memory_space<semaphore_mem>> -> memref<1x!tpu.dma_semaphore, #tpu.memory_space<semaphore_mem>>
      %191 = tpu.memref_squeeze %190 : memref<1x!tpu.dma_semaphore, #tpu.memory_space<semaphore_mem>> -> memref<!tpu.dma_semaphore, #tpu.memory_space<semaphore_mem>>
      tpu.enqueue_dma source(%188 : memref<1x128xf32, #tpu.memory_space<any>>) target(%189 : memref<1x128xf32, #tpu.memory_space<vmem>>) target_semaphore(%191 : memref<!tpu.dma_semaphore, #tpu.memory_space<semaphore_mem>>)
      %c2_i32_83 = arith.constant 2 : i32
      %c0_i32_84 = arith.constant 0 : i32
      %192 = tpu.memref_slice %arg4[%100, %c0_i32_84] : memref<1024x128xf32, #tpu.memory_space<any>> -> memref<1x128xf32, #tpu.memory_space<any>>
      %c0_i32_85 = arith.constant 0 : i32
      %193 = tpu.memref_slice %arg8[%91, %c0_i32_85] : memref<128x128xf32, #tpu.memory_space<vmem>> -> memref<1x128xf32, #tpu.memory_space<vmem>>
      %194 = tpu.memref_slice %arg9[%c2_i32_83] : memref<3x!tpu.dma_semaphore, #tpu.memory_space<semaphore_mem>> -> memref<1x!tpu.dma_semaphore, #tpu.memory_space<semaphore_mem>>
      %195 = tpu.memref_squeeze %194 : memref<1x!tpu.dma_semaphore, #tpu.memory_space<semaphore_mem>> -> memref<!tpu.dma_semaphore, #tpu.memory_space<semaphore_mem>>
      tpu.enqueue_dma source(%192 : memref<1x128xf32, #tpu.memory_space<any>>) target(%193 : memref<1x128xf32, #tpu.memory_space<vmem>>) target_semaphore(%195 : memref<!tpu.dma_semaphore, #tpu.memory_space<semaphore_mem>>)
      %c0_i32_86 = arith.constant 0 : i32
      %c0_i32_87 = arith.constant 0 : i32
      %196 = tpu.memref_slice %arg4[%105, %c0_i32_87] : memref<1024x128xf32, #tpu.memory_space<any>> -> memref<1x128xf32, #tpu.memory_space<any>>
      %c0_i32_88 = arith.constant 0 : i32
      %197 = tpu.memref_slice %arg6[%102, %c0_i32_88] : memref<128x128xf32, #tpu.memory_space<vmem>> -> memref<1x128xf32, #tpu.memory_space<vmem>>
      %198 = tpu.memref_slice %arg9[%c0_i32_86] : memref<3x!tpu.dma_semaphore, #tpu.memory_space<semaphore_mem>> -> memref<1x!tpu.dma_semaphore, #tpu.memory_space<semaphore_mem>>
      %199 = tpu.memref_squeeze %198 : memref<1x!tpu.dma_semaphore, #tpu.memory_space<semaphore_mem>> -> memref<!tpu.dma_semaphore, #tpu.memory_space<semaphore_mem>>
      tpu.enqueue_dma source(%196 : memref<1x128xf32, #tpu.memory_space<any>>) target(%197 : memref<1x128xf32, #tpu.memory_space<vmem>>) target_semaphore(%199 : memref<!tpu.dma_semaphore, #tpu.memory_space<semaphore_mem>>)
      %c1_i32_89 = arith.constant 1 : i32
      %c0_i32_90 = arith.constant 0 : i32
      %200 = tpu.memref_slice %arg4[%108, %c0_i32_90] : memref<1024x128xf32, #tpu.memory_space<any>> -> memref<1x128xf32, #tpu.memory_space<any>>
      %c0_i32_91 = arith.constant 0 : i32
      %201 = tpu.memref_slice %arg7[%102, %c0_i32_91] : memref<128x128xf32, #tpu.memory_space<vmem>> -> memref<1x128xf32, #tpu.memory_space<vmem>>
      %202 = tpu.memref_slice %arg9[%c1_i32_89] : memref<3x!tpu.dma_semaphore, #tpu.memory_space<semaphore_mem>> -> memref<1x!tpu.dma_semaphore, #tpu.memory_space<semaphore_mem>>
      %203 = tpu.memref_squeeze %202 : memref<1x!tpu.dma_semaphore, #tpu.memory_space<semaphore_mem>> -> memref<!tpu.dma_semaphore, #tpu.memory_space<semaphore_mem>>
      tpu.enqueue_dma source(%200 : memref<1x128xf32, #tpu.memory_space<any>>) target(%201 : memref<1x128xf32, #tpu.memory_space<vmem>>) target_semaphore(%203 : memref<!tpu.dma_semaphore, #tpu.memory_space<semaphore_mem>>)
      %c2_i32_92 = arith.constant 2 : i32
      %c0_i32_93 = arith.constant 0 : i32
      %204 = tpu.memref_slice %arg4[%111, %c0_i32_93] : memref<1024x128xf32, #tpu.memory_space<any>> -> memref<1x128xf32, #tpu.memory_space<any>>
      %c0_i32_94 = arith.constant 0 : i32
      %205 = tpu.memref_slice %arg8[%102, %c0_i32_94] : memref<128x128xf32, #tpu.memory_space<vmem>> -> memref<1x128xf32, #tpu.memory_space<vmem>>
      %206 = tpu.memref_slice %arg9[%c2_i32_92] : memref<3x!tpu.dma_semaphore, #tpu.memory_space<semaphore_mem>> -> memref<1x!tpu.dma_semaphore, #tpu.memory_space<semaphore_mem>>
      %207 = tpu.memref_squeeze %206 : memref<1x!tpu.dma_semaphore, #tpu.memory_space<semaphore_mem>> -> memref<!tpu.dma_semaphore, #tpu.memory_space<semaphore_mem>>
      tpu.enqueue_dma source(%204 : memref<1x128xf32, #tpu.memory_space<any>>) target(%205 : memref<1x128xf32, #tpu.memory_space<vmem>>) target_semaphore(%207 : memref<!tpu.dma_semaphore, #tpu.memory_space<semaphore_mem>>)
      %c0_i32_95 = arith.constant 0 : i32
      %c0_i32_96 = arith.constant 0 : i32
      %208 = tpu.memref_slice %arg4[%28, %c0_i32_96] : memref<1024x128xf32, #tpu.memory_space<any>> -> memref<1x128xf32, #tpu.memory_space<any>>
      %c0_i32_97 = arith.constant 0 : i32
      %209 = tpu.memref_slice %arg6[%25, %c0_i32_97] : memref<128x128xf32, #tpu.memory_space<vmem>> -> memref<1x128xf32, #tpu.memory_space<vmem>>
      %210 = tpu.memref_slice %arg9[%c0_i32_95] : memref<3x!tpu.dma_semaphore, #tpu.memory_space<semaphore_mem>> -> memref<1x!tpu.dma_semaphore, #tpu.memory_space<semaphore_mem>>
      %211 = tpu.memref_squeeze %210 : memref<1x!tpu.dma_semaphore, #tpu.memory_space<semaphore_mem>> -> memref<!tpu.dma_semaphore, #tpu.memory_space<semaphore_mem>>
      tpu.wait_dma2 semaphore(%211 : memref<!tpu.dma_semaphore, #tpu.memory_space<semaphore_mem>>) src(%208 : memref<1x128xf32, #tpu.memory_space<any>>) dst(%209 : memref<1x128xf32, #tpu.memory_space<vmem>>)
      %c1_i32_98 = arith.constant 1 : i32
      %c0_i32_99 = arith.constant 0 : i32
      %212 = tpu.memref_slice %arg4[%31, %c0_i32_99] : memref<1024x128xf32, #tpu.memory_space<any>> -> memref<1x128xf32, #tpu.memory_space<any>>
      %c0_i32_100 = arith.constant 0 : i32
      %213 = tpu.memref_slice %arg7[%25, %c0_i32_100] : memref<128x128xf32, #tpu.memory_space<vmem>> -> memref<1x128xf32, #tpu.memory_space<vmem>>
      %214 = tpu.memref_slice %arg9[%c1_i32_98] : memref<3x!tpu.dma_semaphore, #tpu.memory_space<semaphore_mem>> -> memref<1x!tpu.dma_semaphore, #tpu.memory_space<semaphore_mem>>
      %215 = tpu.memref_squeeze %214 : memref<1x!tpu.dma_semaphore, #tpu.memory_space<semaphore_mem>> -> memref<!tpu.dma_semaphore, #tpu.memory_space<semaphore_mem>>
      tpu.wait_dma2 semaphore(%215 : memref<!tpu.dma_semaphore, #tpu.memory_space<semaphore_mem>>) src(%212 : memref<1x128xf32, #tpu.memory_space<any>>) dst(%213 : memref<1x128xf32, #tpu.memory_space<vmem>>)
      %c2_i32_101 = arith.constant 2 : i32
      %c0_i32_102 = arith.constant 0 : i32
      %216 = tpu.memref_slice %arg4[%34, %c0_i32_102] : memref<1024x128xf32, #tpu.memory_space<any>> -> memref<1x128xf32, #tpu.memory_space<any>>
      %c0_i32_103 = arith.constant 0 : i32
      %217 = tpu.memref_slice %arg8[%25, %c0_i32_103] : memref<128x128xf32, #tpu.memory_space<vmem>> -> memref<1x128xf32, #tpu.memory_space<vmem>>
      %218 = tpu.memref_slice %arg9[%c2_i32_101] : memref<3x!tpu.dma_semaphore, #tpu.memory_space<semaphore_mem>> -> memref<1x!tpu.dma_semaphore, #tpu.memory_space<semaphore_mem>>
      %219 = tpu.memref_squeeze %218 : memref<1x!tpu.dma_semaphore, #tpu.memory_space<semaphore_mem>> -> memref<!tpu.dma_semaphore, #tpu.memory_space<semaphore_mem>>
      tpu.wait_dma2 semaphore(%219 : memref<!tpu.dma_semaphore, #tpu.memory_space<semaphore_mem>>) src(%216 : memref<1x128xf32, #tpu.memory_space<any>>) dst(%217 : memref<1x128xf32, #tpu.memory_space<vmem>>)
      %c0_i32_104 = arith.constant 0 : i32
      %c0_i32_105 = arith.constant 0 : i32
      %220 = tpu.memref_slice %arg4[%39, %c0_i32_105] : memref<1024x128xf32, #tpu.memory_space<any>> -> memref<1x128xf32, #tpu.memory_space<any>>
      %c0_i32_106 = arith.constant 0 : i32
      %221 = tpu.memref_slice %arg6[%36, %c0_i32_106] : memref<128x128xf32, #tpu.memory_space<vmem>> -> memref<1x128xf32, #tpu.memory_space<vmem>>
      %222 = tpu.memref_slice %arg9[%c0_i32_104] : memref<3x!tpu.dma_semaphore, #tpu.memory_space<semaphore_mem>> -> memref<1x!tpu.dma_semaphore, #tpu.memory_space<semaphore_mem>>
      %223 = tpu.memref_squeeze %222 : memref<1x!tpu.dma_semaphore, #tpu.memory_space<semaphore_mem>> -> memref<!tpu.dma_semaphore, #tpu.memory_space<semaphore_mem>>
      tpu.wait_dma2 semaphore(%223 : memref<!tpu.dma_semaphore, #tpu.memory_space<semaphore_mem>>) src(%220 : memref<1x128xf32, #tpu.memory_space<any>>) dst(%221 : memref<1x128xf32, #tpu.memory_space<vmem>>)
      %c1_i32_107 = arith.constant 1 : i32
      %c0_i32_108 = arith.constant 0 : i32
      %224 = tpu.memref_slice %arg4[%42, %c0_i32_108] : memref<1024x128xf32, #tpu.memory_space<any>> -> memref<1x128xf32, #tpu.memory_space<any>>
      %c0_i32_109 = arith.constant 0 : i32
      %225 = tpu.memref_slice %arg7[%36, %c0_i32_109] : memref<128x128xf32, #tpu.memory_space<vmem>> -> memref<1x128xf32, #tpu.memory_space<vmem>>
      %226 = tpu.memref_slice %arg9[%c1_i32_107] : memref<3x!tpu.dma_semaphore, #tpu.memory_space<semaphore_mem>> -> memref<1x!tpu.dma_semaphore, #tpu.memory_space<semaphore_mem>>
      %227 = tpu.memref_squeeze %226 : memref<1x!tpu.dma_semaphore, #tpu.memory_space<semaphore_mem>> -> memref<!tpu.dma_semaphore, #tpu.memory_space<semaphore_mem>>
      tpu.wait_dma2 semaphore(%227 : memref<!tpu.dma_semaphore, #tpu.memory_space<semaphore_mem>>) src(%224 : memref<1x128xf32, #tpu.memory_space<any>>) dst(%225 : memref<1x128xf32, #tpu.memory_space<vmem>>)
      %c2_i32_110 = arith.constant 2 : i32
      %c0_i32_111 = arith.constant 0 : i32
      %228 = tpu.memref_slice %arg4[%45, %c0_i32_111] : memref<1024x128xf32, #tpu.memory_space<any>> -> memref<1x128xf32, #tpu.memory_space<any>>
      %c0_i32_112 = arith.constant 0 : i32
      %229 = tpu.memref_slice %arg8[%36, %c0_i32_112] : memref<128x128xf32, #tpu.memory_space<vmem>> -> memref<1x128xf32, #tpu.memory_space<vmem>>
      %230 = tpu.memref_slice %arg9[%c2_i32_110] : memref<3x!tpu.dma_semaphore, #tpu.memory_space<semaphore_mem>> -> memref<1x!tpu.dma_semaphore, #tpu.memory_space<semaphore_mem>>
      %231 = tpu.memref_squeeze %230 : memref<1x!tpu.dma_semaphore, #tpu.memory_space<semaphore_mem>> -> memref<!tpu.dma_semaphore, #tpu.memory_space<semaphore_mem>>
      tpu.wait_dma2 semaphore(%231 : memref<!tpu.dma_semaphore, #tpu.memory_space<semaphore_mem>>) src(%228 : memref<1x128xf32, #tpu.memory_space<any>>) dst(%229 : memref<1x128xf32, #tpu.memory_space<vmem>>)
      %c0_i32_113 = arith.constant 0 : i32
      %c0_i32_114 = arith.constant 0 : i32
      %232 = tpu.memref_slice %arg4[%50, %c0_i32_114] : memref<1024x128xf32, #tpu.memory_space<any>> -> memref<1x128xf32, #tpu.memory_space<any>>
      %c0_i32_115 = arith.constant 0 : i32
      %233 = tpu.memref_slice %arg6[%47, %c0_i32_115] : memref<128x128xf32, #tpu.memory_space<vmem>> -> memref<1x128xf32, #tpu.memory_space<vmem>>
      %234 = tpu.memref_slice %arg9[%c0_i32_113] : memref<3x!tpu.dma_semaphore, #tpu.memory_space<semaphore_mem>> -> memref<1x!tpu.dma_semaphore, #tpu.memory_space<semaphore_mem>>
      %235 = tpu.memref_squeeze %234 : memref<1x!tpu.dma_semaphore, #tpu.memory_space<semaphore_mem>> -> memref<!tpu.dma_semaphore, #tpu.memory_space<semaphore_mem>>
      tpu.wait_dma2 semaphore(%235 : memref<!tpu.dma_semaphore, #tpu.memory_space<semaphore_mem>>) src(%232 : memref<1x128xf32, #tpu.memory_space<any>>) dst(%233 : memref<1x128xf32, #tpu.memory_space<vmem>>)
      %c1_i32_116 = arith.constant 1 : i32
      %c0_i32_117 = arith.constant 0 : i32
      %236 = tpu.memref_slice %arg4[%53, %c0_i32_117] : memref<1024x128xf32, #tpu.memory_space<any>> -> memref<1x128xf32, #tpu.memory_space<any>>
      %c0_i32_118 = arith.constant 0 : i32
      %237 = tpu.memref_slice %arg7[%47, %c0_i32_118] : memref<128x128xf32, #tpu.memory_space<vmem>> -> memref<1x128xf32, #tpu.memory_space<vmem>>
      %238 = tpu.memref_slice %arg9[%c1_i32_116] : memref<3x!tpu.dma_semaphore, #tpu.memory_space<semaphore_mem>> -> memref<1x!tpu.dma_semaphore, #tpu.memory_space<semaphore_mem>>
      %239 = tpu.memref_squeeze %238 : memref<1x!tpu.dma_semaphore, #tpu.memory_space<semaphore_mem>> -> memref<!tpu.dma_semaphore, #tpu.memory_space<semaphore_mem>>
      tpu.wait_dma2 semaphore(%239 : memref<!tpu.dma_semaphore, #tpu.memory_space<semaphore_mem>>) src(%236 : memref<1x128xf32, #tpu.memory_space<any>>) dst(%237 : memref<1x128xf32, #tpu.memory_space<vmem>>)
      %c2_i32_119 = arith.constant 2 : i32
      %c0_i32_120 = arith.constant 0 : i32
      %240 = tpu.memref_slice %arg4[%56, %c0_i32_120] : memref<1024x128xf32, #tpu.memory_space<any>> -> memref<1x128xf32, #tpu.memory_space<any>>
      %c0_i32_121 = arith.constant 0 : i32
      %241 = tpu.memref_slice %arg8[%47, %c0_i32_121] : memref<128x128xf32, #tpu.memory_space<vmem>> -> memref<1x128xf32, #tpu.memory_space<vmem>>
      %242 = tpu.memref_slice %arg9[%c2_i32_119] : memref<3x!tpu.dma_semaphore, #tpu.memory_space<semaphore_mem>> -> memref<1x!tpu.dma_semaphore, #tpu.memory_space<semaphore_mem>>
      %243 = tpu.memref_squeeze %242 : memref<1x!tpu.dma_semaphore, #tpu.memory_space<semaphore_mem>> -> memref<!tpu.dma_semaphore, #tpu.memory_space<semaphore_mem>>
      tpu.wait_dma2 semaphore(%243 : memref<!tpu.dma_semaphore, #tpu.memory_space<semaphore_mem>>) src(%240 : memref<1x128xf32, #tpu.memory_space<any>>) dst(%241 : memref<1x128xf32, #tpu.memory_space<vmem>>)
      %c0_i32_122 = arith.constant 0 : i32
      %c0_i32_123 = arith.constant 0 : i32
      %244 = tpu.memref_slice %arg4[%61, %c0_i32_123] : memref<1024x128xf32, #tpu.memory_space<any>> -> memref<1x128xf32, #tpu.memory_space<any>>
      %c0_i32_124 = arith.constant 0 : i32
      %245 = tpu.memref_slice %arg6[%58, %c0_i32_124] : memref<128x128xf32, #tpu.memory_space<vmem>> -> memref<1x128xf32, #tpu.memory_space<vmem>>
      %246 = tpu.memref_slice %arg9[%c0_i32_122] : memref<3x!tpu.dma_semaphore, #tpu.memory_space<semaphore_mem>> -> memref<1x!tpu.dma_semaphore, #tpu.memory_space<semaphore_mem>>
      %247 = tpu.memref_squeeze %246 : memref<1x!tpu.dma_semaphore, #tpu.memory_space<semaphore_mem>> -> memref<!tpu.dma_semaphore, #tpu.memory_space<semaphore_mem>>
      tpu.wait_dma2 semaphore(%247 : memref<!tpu.dma_semaphore, #tpu.memory_space<semaphore_mem>>) src(%244 : memref<1x128xf32, #tpu.memory_space<any>>) dst(%245 : memref<1x128xf32, #tpu.memory_space<vmem>>)
      %c1_i32_125 = arith.constant 1 : i32
      %c0_i32_126 = arith.constant 0 : i32
      %248 = tpu.memref_slice %arg4[%64, %c0_i32_126] : memref<1024x128xf32, #tpu.memory_space<any>> -> memref<1x128xf32, #tpu.memory_space<any>>
      %c0_i32_127 = arith.constant 0 : i32
      %249 = tpu.memref_slice %arg7[%58, %c0_i32_127] : memref<128x128xf32, #tpu.memory_space<vmem>> -> memref<1x128xf32, #tpu.memory_space<vmem>>
      %250 = tpu.memref_slice %arg9[%c1_i32_125] : memref<3x!tpu.dma_semaphore, #tpu.memory_space<semaphore_mem>> -> memref<1x!tpu.dma_semaphore, #tpu.memory_space<semaphore_mem>>
      %251 = tpu.memref_squeeze %250 : memref<1x!tpu.dma_semaphore, #tpu.memory_space<semaphore_mem>> -> memref<!tpu.dma_semaphore, #tpu.memory_space<semaphore_mem>>
      tpu.wait_dma2 semaphore(%251 : memref<!tpu.dma_semaphore, #tpu.memory_space<semaphore_mem>>) src(%248 : memref<1x128xf32, #tpu.memory_space<any>>) dst(%249 : memref<1x128xf32, #tpu.memory_space<vmem>>)
      %c2_i32_128 = arith.constant 2 : i32
      %c0_i32_129 = arith.constant 0 : i32
      %252 = tpu.memref_slice %arg4[%67, %c0_i32_129] : memref<1024x128xf32, #tpu.memory_space<any>> -> memref<1x128xf32, #tpu.memory_space<any>>
      %c0_i32_130 = arith.constant 0 : i32
      %253 = tpu.memref_slice %arg8[%58, %c0_i32_130] : memref<128x128xf32, #tpu.memory_space<vmem>> -> memref<1x128xf32, #tpu.memory_space<vmem>>
      %254 = tpu.memref_slice %arg9[%c2_i32_128] : memref<3x!tpu.dma_semaphore, #tpu.memory_space<semaphore_mem>> -> memref<1x!tpu.dma_semaphore, #tpu.memory_space<semaphore_mem>>
      %255 = tpu.memref_squeeze %254 : memref<1x!tpu.dma_semaphore, #tpu.memory_space<semaphore_mem>> -> memref<!tpu.dma_semaphore, #tpu.memory_space<semaphore_mem>>
      tpu.wait_dma2 semaphore(%255 : memref<!tpu.dma_semaphore, #tpu.memory_space<semaphore_mem>>) src(%252 : memref<1x128xf32, #tpu.memory_space<any>>) dst(%253 : memref<1x128xf32, #tpu.memory_space<vmem>>)
      %c0_i32_131 = arith.constant 0 : i32
      %c0_i32_132 = arith.constant 0 : i32
      %256 = tpu.memref_slice %arg4[%72, %c0_i32_132] : memref<1024x128xf32, #tpu.memory_space<any>> -> memref<1x128xf32, #tpu.memory_space<any>>
      %c0_i32_133 = arith.constant 0 : i32
      %257 = tpu.memref_slice %arg6[%69, %c0_i32_133] : memref<128x128xf32, #tpu.memory_space<vmem>> -> memref<1x128xf32, #tpu.memory_space<vmem>>
      %258 = tpu.memref_slice %arg9[%c0_i32_131] : memref<3x!tpu.dma_semaphore, #tpu.memory_space<semaphore_mem>> -> memref<1x!tpu.dma_semaphore, #tpu.memory_space<semaphore_mem>>
      %259 = tpu.memref_squeeze %258 : memref<1x!tpu.dma_semaphore, #tpu.memory_space<semaphore_mem>> -> memref<!tpu.dma_semaphore, #tpu.memory_space<semaphore_mem>>
      tpu.wait_dma2 semaphore(%259 : memref<!tpu.dma_semaphore, #tpu.memory_space<semaphore_mem>>) src(%256 : memref<1x128xf32, #tpu.memory_space<any>>) dst(%257 : memref<1x128xf32, #tpu.memory_space<vmem>>)
      %c1_i32_134 = arith.constant 1 : i32
      %c0_i32_135 = arith.constant 0 : i32
      %260 = tpu.memref_slice %arg4[%75, %c0_i32_135] : memref<1024x128xf32, #tpu.memory_space<any>> -> memref<1x128xf32, #tpu.memory_space<any>>
      %c0_i32_136 = arith.constant 0 : i32
      %261 = tpu.memref_slice %arg7[%69, %c0_i32_136] : memref<128x128xf32, #tpu.memory_space<vmem>> -> memref<1x128xf32, #tpu.memory_space<vmem>>
      %262 = tpu.memref_slice %arg9[%c1_i32_134] : memref<3x!tpu.dma_semaphore, #tpu.memory_space<semaphore_mem>> -> memref<1x!tpu.dma_semaphore, #tpu.memory_space<semaphore_mem>>
      %263 = tpu.memref_squeeze %262 : memref<1x!tpu.dma_semaphore, #tpu.memory_space<semaphore_mem>> -> memref<!tpu.dma_semaphore, #tpu.memory_space<semaphore_mem>>
      tpu.wait_dma2 semaphore(%263 : memref<!tpu.dma_semaphore, #tpu.memory_space<semaphore_mem>>) src(%260 : memref<1x128xf32, #tpu.memory_space<any>>) dst(%261 : memref<1x128xf32, #tpu.memory_space<vmem>>)
      %c2_i32_137 = arith.constant 2 : i32
      %c0_i32_138 = arith.constant 0 : i32
      %264 = tpu.memref_slice %arg4[%78, %c0_i32_138] : memref<1024x128xf32, #tpu.memory_space<any>> -> memref<1x128xf32, #tpu.memory_space<any>>
      %c0_i32_139 = arith.constant 0 : i32
      %265 = tpu.memref_slice %arg8[%69, %c0_i32_139] : memref<128x128xf32, #tpu.memory_space<vmem>> -> memref<1x128xf32, #tpu.memory_space<vmem>>
      %266 = tpu.memref_slice %arg9[%c2_i32_137] : memref<3x!tpu.dma_semaphore, #tpu.memory_space<semaphore_mem>> -> memref<1x!tpu.dma_semaphore, #tpu.memory_space<semaphore_mem>>
      %267 = tpu.memref_squeeze %266 : memref<1x!tpu.dma_semaphore, #tpu.memory_space<semaphore_mem>> -> memref<!tpu.dma_semaphore, #tpu.memory_space<semaphore_mem>>
      tpu.wait_dma2 semaphore(%267 : memref<!tpu.dma_semaphore, #tpu.memory_space<semaphore_mem>>) src(%264 : memref<1x128xf32, #tpu.memory_space<any>>) dst(%265 : memref<1x128xf32, #tpu.memory_space<vmem>>)
      %c0_i32_140 = arith.constant 0 : i32
      %c0_i32_141 = arith.constant 0 : i32
      %268 = tpu.memref_slice %arg4[%83, %c0_i32_141] : memref<1024x128xf32, #tpu.memory_space<any>> -> memref<1x128xf32, #tpu.memory_space<any>>
      %c0_i32_142 = arith.constant 0 : i32
      %269 = tpu.memref_slice %arg6[%80, %c0_i32_142] : memref<128x128xf32, #tpu.memory_space<vmem>> -> memref<1x128xf32, #tpu.memory_space<vmem>>
      %270 = tpu.memref_slice %arg9[%c0_i32_140] : memref<3x!tpu.dma_semaphore, #tpu.memory_space<semaphore_mem>> -> memref<1x!tpu.dma_semaphore, #tpu.memory_space<semaphore_mem>>
      %271 = tpu.memref_squeeze %270 : memref<1x!tpu.dma_semaphore, #tpu.memory_space<semaphore_mem>> -> memref<!tpu.dma_semaphore, #tpu.memory_space<semaphore_mem>>
      tpu.wait_dma2 semaphore(%271 : memref<!tpu.dma_semaphore, #tpu.memory_space<semaphore_mem>>) src(%268 : memref<1x128xf32, #tpu.memory_space<any>>) dst(%269 : memref<1x128xf32, #tpu.memory_space<vmem>>)
      %c1_i32_143 = arith.constant 1 : i32
      %c0_i32_144 = arith.constant 0 : i32
      %272 = tpu.memref_slice %arg4[%86, %c0_i32_144] : memref<1024x128xf32, #tpu.memory_space<any>> -> memref<1x128xf32, #tpu.memory_space<any>>
      %c0_i32_145 = arith.constant 0 : i32
      %273 = tpu.memref_slice %arg7[%80, %c0_i32_145] : memref<128x128xf32, #tpu.memory_space<vmem>> -> memref<1x128xf32, #tpu.memory_space<vmem>>
      %274 = tpu.memref_slice %arg9[%c1_i32_143] : memref<3x!tpu.dma_semaphore, #tpu.memory_space<semaphore_mem>> -> memref<1x!tpu.dma_semaphore, #tpu.memory_space<semaphore_mem>>
      %275 = tpu.memref_squeeze %274 : memref<1x!tpu.dma_semaphore, #tpu.memory_space<semaphore_mem>> -> memref<!tpu.dma_semaphore, #tpu.memory_space<semaphore_mem>>
      tpu.wait_dma2 semaphore(%275 : memref<!tpu.dma_semaphore, #tpu.memory_space<semaphore_mem>>) src(%272 : memref<1x128xf32, #tpu.memory_space<any>>) dst(%273 : memref<1x128xf32, #tpu.memory_space<vmem>>)
      %c2_i32_146 = arith.constant 2 : i32
      %c0_i32_147 = arith.constant 0 : i32
      %276 = tpu.memref_slice %arg4[%89, %c0_i32_147] : memref<1024x128xf32, #tpu.memory_space<any>> -> memref<1x128xf32, #tpu.memory_space<any>>
      %c0_i32_148 = arith.constant 0 : i32
      %277 = tpu.memref_slice %arg8[%80, %c0_i32_148] : memref<128x128xf32, #tpu.memory_space<vmem>> -> memref<1x128xf32, #tpu.memory_space<vmem>>
      %278 = tpu.memref_slice %arg9[%c2_i32_146] : memref<3x!tpu.dma_semaphore, #tpu.memory_space<semaphore_mem>> -> memref<1x!tpu.dma_semaphore, #tpu.memory_space<semaphore_mem>>
      %279 = tpu.memref_squeeze %278 : memref<1x!tpu.dma_semaphore, #tpu.memory_space<semaphore_mem>> -> memref<!tpu.dma_semaphore, #tpu.memory_space<semaphore_mem>>
      tpu.wait_dma2 semaphore(%279 : memref<!tpu.dma_semaphore, #tpu.memory_space<semaphore_mem>>) src(%276 : memref<1x128xf32, #tpu.memory_space<any>>) dst(%277 : memref<1x128xf32, #tpu.memory_space<vmem>>)
      %c0_i32_149 = arith.constant 0 : i32
      %c0_i32_150 = arith.constant 0 : i32
      %280 = tpu.memref_slice %arg4[%94, %c0_i32_150] : memref<1024x128xf32, #tpu.memory_space<any>> -> memref<1x128xf32, #tpu.memory_space<any>>
      %c0_i32_151 = arith.constant 0 : i32
      %281 = tpu.memref_slice %arg6[%91, %c0_i32_151] : memref<128x128xf32, #tpu.memory_space<vmem>> -> memref<1x128xf32, #tpu.memory_space<vmem>>
      %282 = tpu.memref_slice %arg9[%c0_i32_149] : memref<3x!tpu.dma_semaphore, #tpu.memory_space<semaphore_mem>> -> memref<1x!tpu.dma_semaphore, #tpu.memory_space<semaphore_mem>>
      %283 = tpu.memref_squeeze %282 : memref<1x!tpu.dma_semaphore, #tpu.memory_space<semaphore_mem>> -> memref<!tpu.dma_semaphore, #tpu.memory_space<semaphore_mem>>
      tpu.wait_dma2 semaphore(%283 : memref<!tpu.dma_semaphore, #tpu.memory_space<semaphore_mem>>) src(%280 : memref<1x128xf32, #tpu.memory_space<any>>) dst(%281 : memref<1x128xf32, #tpu.memory_space<vmem>>)
      %c1_i32_152 = arith.constant 1 : i32
      %c0_i32_153 = arith.constant 0 : i32
      %284 = tpu.memref_slice %arg4[%97, %c0_i32_153] : memref<1024x128xf32, #tpu.memory_space<any>> -> memref<1x128xf32, #tpu.memory_space<any>>
      %c0_i32_154 = arith.constant 0 : i32
      %285 = tpu.memref_slice %arg7[%91, %c0_i32_154] : memref<128x128xf32, #tpu.memory_space<vmem>> -> memref<1x128xf32, #tpu.memory_space<vmem>>
      %286 = tpu.memref_slice %arg9[%c1_i32_152] : memref<3x!tpu.dma_semaphore, #tpu.memory_space<semaphore_mem>> -> memref<1x!tpu.dma_semaphore, #tpu.memory_space<semaphore_mem>>
      %287 = tpu.memref_squeeze %286 : memref<1x!tpu.dma_semaphore, #tpu.memory_space<semaphore_mem>> -> memref<!tpu.dma_semaphore, #tpu.memory_space<semaphore_mem>>
      tpu.wait_dma2 semaphore(%287 : memref<!tpu.dma_semaphore, #tpu.memory_space<semaphore_mem>>) src(%284 : memref<1x128xf32, #tpu.memory_space<any>>) dst(%285 : memref<1x128xf32, #tpu.memory_space<vmem>>)
      %c2_i32_155 = arith.constant 2 : i32
      %c0_i32_156 = arith.constant 0 : i32
      %288 = tpu.memref_slice %arg4[%100, %c0_i32_156] : memref<1024x128xf32, #tpu.memory_space<any>> -> memref<1x128xf32, #tpu.memory_space<any>>
      %c0_i32_157 = arith.constant 0 : i32
      %289 = tpu.memref_slice %arg8[%91, %c0_i32_157] : memref<128x128xf32, #tpu.memory_space<vmem>> -> memref<1x128xf32, #tpu.memory_space<vmem>>
      %290 = tpu.memref_slice %arg9[%c2_i32_155] : memref<3x!tpu.dma_semaphore, #tpu.memory_space<semaphore_mem>> -> memref<1x!tpu.dma_semaphore, #tpu.memory_space<semaphore_mem>>
      %291 = tpu.memref_squeeze %290 : memref<1x!tpu.dma_semaphore, #tpu.memory_space<semaphore_mem>> -> memref<!tpu.dma_semaphore, #tpu.memory_space<semaphore_mem>>
      tpu.wait_dma2 semaphore(%291 : memref<!tpu.dma_semaphore, #tpu.memory_space<semaphore_mem>>) src(%288 : memref<1x128xf32, #tpu.memory_space<any>>) dst(%289 : memref<1x128xf32, #tpu.memory_space<vmem>>)
      %c0_i32_158 = arith.constant 0 : i32
      %c0_i32_159 = arith.constant 0 : i32
      %292 = tpu.memref_slice %arg4[%105, %c0_i32_159] : memref<1024x128xf32, #tpu.memory_space<any>> -> memref<1x128xf32, #tpu.memory_space<any>>
      %c0_i32_160 = arith.constant 0 : i32
      %293 = tpu.memref_slice %arg6[%102, %c0_i32_160] : memref<128x128xf32, #tpu.memory_space<vmem>> -> memref<1x128xf32, #tpu.memory_space<vmem>>
      %294 = tpu.memref_slice %arg9[%c0_i32_158] : memref<3x!tpu.dma_semaphore, #tpu.memory_space<semaphore_mem>> -> memref<1x!tpu.dma_semaphore, #tpu.memory_space<semaphore_mem>>
      %295 = tpu.memref_squeeze %294 : memref<1x!tpu.dma_semaphore, #tpu.memory_space<semaphore_mem>> -> memref<!tpu.dma_semaphore, #tpu.memory_space<semaphore_mem>>
      tpu.wait_dma2 semaphore(%295 : memref<!tpu.dma_semaphore, #tpu.memory_space<semaphore_mem>>) src(%292 : memref<1x128xf32, #tpu.memory_space<any>>) dst(%293 : memref<1x128xf32, #tpu.memory_space<vmem>>)
      %c1_i32_161 = arith.constant 1 : i32
      %c0_i32_162 = arith.constant 0 : i32
      %296 = tpu.memref_slice %arg4[%108, %c0_i32_162] : memref<1024x128xf32, #tpu.memory_space<any>> -> memref<1x128xf32, #tpu.memory_space<any>>
      %c0_i32_163 = arith.constant 0 : i32
      %297 = tpu.memref_slice %arg7[%102, %c0_i32_163] : memref<128x128xf32, #tpu.memory_space<vmem>> -> memref<1x128xf32, #tpu.memory_space<vmem>>
      %298 = tpu.memref_slice %arg9[%c1_i32_161] : memref<3x!tpu.dma_semaphore, #tpu.memory_space<semaphore_mem>> -> memref<1x!tpu.dma_semaphore, #tpu.memory_space<semaphore_mem>>
      %299 = tpu.memref_squeeze %298 : memref<1x!tpu.dma_semaphore, #tpu.memory_space<semaphore_mem>> -> memref<!tpu.dma_semaphore, #tpu.memory_space<semaphore_mem>>
      tpu.wait_dma2 semaphore(%299 : memref<!tpu.dma_semaphore, #tpu.memory_space<semaphore_mem>>) src(%296 : memref<1x128xf32, #tpu.memory_space<any>>) dst(%297 : memref<1x128xf32, #tpu.memory_space<vmem>>)
      %c2_i32_164 = arith.constant 2 : i32
      %c0_i32_165 = arith.constant 0 : i32
      %300 = tpu.memref_slice %arg4[%111, %c0_i32_165] : memref<1024x128xf32, #tpu.memory_space<any>> -> memref<1x128xf32, #tpu.memory_space<any>>
      %c0_i32_166 = arith.constant 0 : i32
      %301 = tpu.memref_slice %arg8[%102, %c0_i32_166] : memref<128x128xf32, #tpu.memory_space<vmem>> -> memref<1x128xf32, #tpu.memory_space<vmem>>
      %302 = tpu.memref_slice %arg9[%c2_i32_164] : memref<3x!tpu.dma_semaphore, #tpu.memory_space<semaphore_mem>> -> memref<1x!tpu.dma_semaphore, #tpu.memory_space<semaphore_mem>>
      %303 = tpu.memref_squeeze %302 : memref<1x!tpu.dma_semaphore, #tpu.memory_space<semaphore_mem>> -> memref<!tpu.dma_semaphore, #tpu.memory_space<semaphore_mem>>
      tpu.wait_dma2 semaphore(%303 : memref<!tpu.dma_semaphore, #tpu.memory_space<semaphore_mem>>) src(%300 : memref<1x128xf32, #tpu.memory_space<any>>) dst(%301 : memref<1x128xf32, #tpu.memory_space<vmem>>)
    }
    %c16_i32_0 = arith.constant 16 : i32
    %c0 = arith.constant 0 : index
    %c0_1 = arith.constant 0 : index
    %2 = vector.load %arg6[%c0, %c0_1] : memref<128x128xf32, #tpu.memory_space<vmem>>, vector<128x128xf32>
    %c0_2 = arith.constant 0 : index
    %c0_3 = arith.constant 0 : index
    %3 = vector.load %arg7[%c0_2, %c0_3] : memref<128x128xf32, #tpu.memory_space<vmem>>, vector<128x128xf32>
    %4 = arith.subf %2, %3 : vector<128x128xf32>
    %c0_4 = arith.constant 0 : index
    %c0_5 = arith.constant 0 : index
    %5 = vector.load %arg6[%c0_4, %c0_5] : memref<128x128xf32, #tpu.memory_space<vmem>>, vector<128x128xf32>
    %c0_6 = arith.constant 0 : index
    %c0_7 = arith.constant 0 : index
    %6 = vector.load %arg8[%c0_6, %c0_7] : memref<128x128xf32, #tpu.memory_space<vmem>>, vector<128x128xf32>
    %7 = arith.subf %5, %6 : vector<128x128xf32>
    %8 = arith.mulf %7, %7 : vector<128x128xf32>
    %9 = arith.mulf %4, %4 : vector<128x128xf32>
    %10 = arith.subf %8, %9 : vector<128x128xf32>
    %cst = arith.constant dense<0.000000e+00> : vector<128xf32>
    %11 = vector.multi_reduction <add>, %10, %cst [1] : vector<128x128xf32> to vector<128xf32>
    %cst_8 = arith.constant 0.000000e+00 : f32
    %12 = vector.broadcast %cst_8 : f32 to vector<128xf32>
    %13 = arith.maximumf %11, %12 : vector<128xf32>
    %14 = math.absf %11 : vector<128xf32>
    %cst_9 = arith.constant 0.000000e+00 : f32
    %15 = vector.broadcast %cst_9 : f32 to vector<128xf32>
    %16 = arith.subf %15, %14 : vector<128xf32>
    %17 = math.exp %16 : vector<128xf32>
    %18 = math.log1p %17 : vector<128xf32>
    %19 = arith.addf %13, %18 : vector<128xf32>
    %20 = vector.shape_cast %19 : vector<128xf32> to vector<1x128xf32>
    %c0_10 = arith.constant 0 : index
    %c0_11 = arith.constant 0 : index
    %21 = vector.load %arg5[%c0_10, %c0_11] : memref<1x128xf32, #tpu.memory_space<vmem>>, vector<1x128xf32>
    tpu.vector_store %arg5[%c0_10, %c0_11], %20 {strides = array<i32>} : memref<1x128xf32, #tpu.memory_space<vmem>>, vector<1x128xf32>,
    return
  }
  func.func @transform_1(%arg0: i32, %arg1: memref<128xi32, #tpu.memory_space<smem>>, %arg2: memref<128xi32, #tpu.memory_space<smem>>, %arg3: memref<128xi32, #tpu.memory_space<smem>>) -> (i32, i32) {
    %c0_i32 = arith.constant 0 : i32
    %c0_i32_0 = arith.constant 0 : i32
    return %arg0, %c0_i32 : i32, i32
  }
}

</mosaic_0001>

<bundles_post_ra>
// kernel: gcn_emb_get_loss.3
= control target key start
LH: loop header
LB: loop body
LE: loop exit
PB: predicated region body
PF: predicated region fallthrough
CT: control target
= control target key end

     0   :  { %s1903_s21 = smov [#allocation7]   ;;  %s1904_s22 = smov [#allocation8]   ;;  %s2456_s0 = inlined_call_operand.vmem [shape: s32[128], index: 0, kind: input, shape index: {}]   ;;  %s2457_s3 = inlined_call_operand.vmem [shape: f32[1024,128], index: 3, kind: input, shape index: {}]   ;;  %s2458_s4 = inlined_call_operand.vmem [shape: f32[1,128], index: 4, kind: output, shape index: {}]   ;;  %s2459_s1 = inlined_call_operand.vmem [shape: s32[128], index: 1, kind: input, shape index: {}]   ;;  %s2460_s2 = inlined_call_operand.vmem [shape: s32[128], index: 2, kind: input, shape index: {}]  }
   0x1   :  { %2462 = sst [smem:[#allocation63_spill]] %s2458_s4  ;;  %s10_s17 = sshll.u32 %s2456_s0, 4  ;;  %s11_s17 = int_to_ptr.vmem [resolvable:$true] %s10_s17 }
   0x2   :  { %s15_s20 = sshll.u32 %s2459_s1, 4  ;;  %s20_s25 = sshll.u32 %s2460_s2, 4  ;;  %s16_s20 = int_to_ptr.vmem [resolvable:$true] %s15_s20  ;;  %s21_s25 = int_to_ptr.vmem [resolvable:$true] %s20_s25 }
   0x3   :  { %13 = dma.vmem_to_smem %s11_s17, 16, %s1903_s21, [#allocation6] }
   0x4   :  { %18 = dma.vmem_to_smem %s16_s20, 16, %s1904_s22, [#allocation6] }
   0x5   :  { %s1905_s26 = smov [#allocation9]  }
   0x6   :  { %23 = dma.vmem_to_smem %s21_s25, 16, %s1905_s26, [#allocation6] }
   0x7   :  { %1849 = dma.done.wait [#allocation6], 48 }
   0x8   :  { %1850 = vsyncadd [#allocation6], 4294967248 }
   0x9   :  { %26 = sfence }
   0xa   :  { %s1940_s0 = smov 0  }
   0xb LB: > { %2463 = sst [smem:[#allocation59_spill]] %s1901_s0  ;;  %s1946_s1 = sshll.u32 %s1901_s0, 3  ;;  %s1901_s0 = sphi %s1940_s0, %s33_s0  }
   0xc   : > { %s36_s2 = sld [smem:[#allocation7 + %s1946_s1]]  ;;  %s39_s27 = sadd.s32 1, %s1946_s1 }
   0xd   : > { %s1951_s28 = sld [smem:[#allocation8 + %s1946_s1]]  ;;  %s44_s5 = sadd.s32 2, %s1946_s1 }
   0xe   : > { %s1954_s29 = sld [smem:[#allocation9 + %s1946_s1]]  ;;  %s49_s9 = sadd.s32 3, %s1946_s1 }
   0xf   : > { %s1956_s30 = sld [smem:[#allocation7 + %s39_s27]]  ;;  %s54_s16 = sadd.s32 4, %s1946_s1 }
  0x10   : > { %s1959_s6 = sld [smem:[#allocation8 + %s39_s27]]  ;;  %s1977_s17 = scalar_lea.vmem [#allocation2], %s1946_s1 }
  0x11   : > { %s1961_s7 = sld [smem:[#allocation9 + %s39_s27]]  ;;  %s59_s21 = sadd.s32 5, %s1946_s1 }
  0x12   : > { %s1963_s8 = sld [smem:[#allocation7 + %s44_s5]]  ;;  %s74_s13 = scalar_lea.vmem %s2457_s3, %s36_s2 }
  0x13   : > { %s1966_s10 = sld [smem:[#allocation8 + %s44_s5]]  ;;  %v90_v0 = vld [vmem:[%s74_s13] sm:$0x1]  ;;  %s64_s25 = sadd.s32 6, %s1946_s1 }
  0x14   : > { %s1971_s14 = sld [smem:[#allocation9 + %s44_s5]]  ;;  %91 = vst [vmem:[%s1977_s17] sm:$0x1] %v90_v0  ;;  %s69_s5 = sadd.s32 7, %s1946_s1 }
  0x15   : > { %s1973_s15 = sld [smem:[#allocation7 + %s49_s9]] }
  0x16   : > { %s1980_s18 = sld [smem:[#allocation8 + %s49_s9]] }
  0x17   : > { %s1982_s19 = sld [smem:[#allocation9 + %s49_s9]] }
  0x18   : > { %s1984_s20 = sld [smem:[#allocation7 + %s54_s16]] }
  0x19   : > { %s1987_s22 = sld [smem:[#allocation8 + %s54_s16]] }
  0x1a   : > { %s1989_s23 = sld [smem:[#allocation9 + %s54_s16]] }
  0x1b   : > { %s1991_s24 = sld [smem:[#allocation7 + %s59_s21]] }
  0x1c   : > { %s1994_s26 = sld [smem:[#allocation8 + %s59_s21]] }
  0x1d   : > { %s1996_s2 = sld [smem:[#allocation9 + %s59_s21]] }
  0x1e   : > { %s1998_s27 = sld [smem:[#allocation7 + %s64_s25]] }
  0x1f   : > { %s2001_s11 = sld [smem:[#allocation8 + %s64_s25]] }
  0x20   : > { %s2003_s9 = sld [smem:[#allocation9 + %s64_s25]] }
  0x21   : > { %s2005_s12 = sld [smem:[#allocation7 + %s69_s5]] }
  0x22   : > { %s2007_s13 = sld [smem:[#allocation8 + %s69_s5]] }
  0x23   : > { %s2009_s16 = sld [smem:[#allocation9 + %s69_s5]] }
  0x24   : > { %2464 = sst [smem:[#allocation60_spill]] %s1998_s27 }
  0x27   : > { %2465 = sst [smem:[#allocation61_spill]] %s2005_s12 }
  0x29   : > { %2466 = sst [smem:[#allocation62_spill]] %s2009_s16 }
  0x2a   : > { %109 = vsyncadd [#allocation5], 16  ;;  %s110_s21 = scalar_lea.vmem %s2457_s3, %s1951_s28  ;;  %s2016_s27 = scalar_lea.vmem [#allocation3], %s1946_s1 }
  0x2b   : > { %v127_v1 = vld [vmem:[%s110_s21] sm:$0x1] }
  0x2c   : > { %128 = vst [vmem:[%s2016_s27] sm:$0x1] %v127_v1 }
  0x2d   : > { %146 = vsyncadd [#allocation5 + $0x1], 16  ;;  %s147_s5 = scalar_lea.vmem %s2457_s3, %s1954_s29  ;;  %s2024_s16 = scalar_lea.vmem [#allocation4], %s1946_s1 }
  0x2e   : > { %v164_v2 = vld [vmem:[%s147_s5] sm:$0x1] }
  0x2f   : > { %165 = vst [vmem:[%s2024_s16] sm:$0x1] %v164_v2 }
  0x30   : > { %183 = vsyncadd [#allocation5 + $0x2], 16  ;;  %s184_s28 = scalar_lea.vmem %s2457_s3, %s1956_s30 }
  0x31   : > { %v200_v3 = vld [vmem:[%s184_s28] sm:$0x1] }
  0x32   : > { %1690 = vst [vmem:[%s1977_s17 + $0x1] sm:$0x1] %v200_v3 }
  0x33   : > { %219 = vsyncadd [#allocation5], 16  ;;  %s220_s29 = scalar_lea.vmem %s2457_s3, %s1959_s6 }
  0x34   : > { %v236_v4 = vld [vmem:[%s220_s29] sm:$0x1] }
  0x35   : > { %1692 = vst [vmem:[%s2016_s27 + $0x1] sm:$0x1] %v236_v4 }
  0x36   : > { %255 = vsyncadd [#allocation5 + $0x1], 16  ;;  %s256_s5 = scalar_lea.vmem %s2457_s3, %s1961_s7 }
  0x37   : > { %v272_v5 = vld [vmem:[%s256_s5] sm:$0x1] }
  0x38   : > { %1694 = vst [vmem:[%s2024_s16 + $0x1] sm:$0x1] %v272_v5 }
  0x39   : > { %291 = vsyncadd [#allocation5 + $0x2], 16  ;;  %s292_s0 = scalar_lea.vmem %s2457_s3, %s1963_s8 }
  0x3a   : > { %v308_v6 = vld [vmem:[%s292_s0] sm:$0x1] }
  0x3b   : > { %1696 = vst [vmem:[%s1977_s17 + $0x2] sm:$0x1] %v308_v6 }
  0x3c   : > { %327 = vsyncadd [#allocation5], 16  ;;  %s328_s21 = scalar_lea.vmem %s2457_s3, %s1966_s10 }
  0x3d   : > { %v344_v7 = vld [vmem:[%s328_s21] sm:$0x1] }
  0x3e   : > { %1698 = vst [vmem:[%s2016_s27 + $0x2] sm:$0x1] %v344_v7 }
  0x3f   : > { %363 = vsyncadd [#allocation5 + $0x1], 16  ;;  %s364_s29 = scalar_lea.vmem %s2457_s3, %s1971_s14 }
  0x40   : > { %v380_v8 = vld [vmem:[%s364_s29] sm:$0x1] }
  0x41   : > { %1700 = vst [vmem:[%s2024_s16 + $0x2] sm:$0x1] %v380_v8 }
  0x42   : > { %399 = vsyncadd [#allocation5 + $0x2], 16  ;;  %s400_s25 = scalar_lea.vmem %s2457_s3, %s1973_s15 }
  0x43   : > { %v416_v9 = vld [vmem:[%s400_s25] sm:$0x1] }
  0x44   : > { %1702 = vst [vmem:[%s1977_s17 + $0x3] sm:$0x1] %v416_v9 }
  0x45   : > { %435 = vsyncadd [#allocation5], 16  ;;  %s436_s30 = scalar_lea.vmem %s2457_s3, %s1980_s18 }
  0x46   : > { %v452_v10 = vld [vmem:[%s436_s30] sm:$0x1] }
  0x47   : > { %1704 = vst [vmem:[%s2016_s27 + $0x3] sm:$0x1] %v452_v10 }
  0x48   : > { %471 = vsyncadd [#allocation5 + $0x1], 16  ;;  %s472_s0 = scalar_lea.vmem %s2457_s3, %s1982_s19 }
  0x49   : > { %v488_v11 = vld [vmem:[%s472_s0] sm:$0x1] }
  0x4a   : > { %1706 = vst [vmem:[%s2024_s16 + $0x3] sm:$0x1] %v488_v11 }
  0x4b   : > { %507 = vsyncadd [#allocation5 + $0x2], 16  ;;  %s508_s28 = scalar_lea.vmem %s2457_s3, %s1984_s20 }
  0x4c   : > { %v524_v12 = vld [vmem:[%s508_s28] sm:$0x1] }
  0x4d   : > { %1708 = vst [vmem:[%s1977_s17 + $0x4] sm:$0x1] %v524_v12 }
  0x4e   : > { %543 = vsyncadd [#allocation5], 16  ;;  %s544_s7 = scalar_lea.vmem %s2457_s3, %s1987_s22 }
  0x4f   : > { %v560_v13 = vld [vmem:[%s544_s7] sm:$0x1] }
  0x50   : > { %1710 = vst [vmem:[%s2016_s27 + $0x4] sm:$0x1] %v560_v13 }
  0x51   : > { %579 = vsyncadd [#allocation5 + $0x1], 16  ;;  %s580_s29 = scalar_lea.vmem %s2457_s3, %s1989_s23 }
  0x52   : > { %v596_v14 = vld [vmem:[%s580_s29] sm:$0x1] }
  0x53   : > { %1712 = vst [vmem:[%s2024_s16 + $0x4] sm:$0x1] %v596_v14 }
  0x54   : > { %615 = vsyncadd [#allocation5 + $0x2], 16  ;;  %s616_s1 = scalar_lea.vmem %s2457_s3, %s1991_s24 }
  0x55   : > { %v632_v15 = vld [vmem:[%s616_s1] sm:$0x1] }
  0x56   : > { %1714 = vst [vmem:[%s1977_s17 + $0x5] sm:$0x1] %v632_v15 }
  0x57   : > { %651 = vsyncadd [#allocation5], 16  ;;  %s652_s10 = scalar_lea.vmem %s2457_s3, %s1994_s26 }
  0x58   : > { %v668_v16 = vld [vmem:[%s652_s10] sm:$0x1] }
  0x59   : > { %1716 = vst [vmem:[%s2016_s27 + $0x5] sm:$0x1] %v668_v16 }
  0x5a   : > { %687 = vsyncadd [#allocation5 + $0x1], 16  ;;  %s688_s30 = scalar_lea.vmem %s2457_s3, %s1996_s2 }
  0x5b   : > { %v704_v17 = vld [vmem:[%s688_s30] sm:$0x1] }
  0x5c   : > { %1718 = vst [vmem:[%s2024_s16 + $0x5] sm:$0x1] %v704_v17 }
  0x5d   : > { %723 = vsyncadd [#allocation5 + $0x2], 16  ;;  %s2467_s24 = sld [smem:[#allocation60_spill]] }
  0x63   : > { %s724_s0 = scalar_lea.vmem %s2457_s3, %s2467_s24 }
  0x64   : > { %v740_v18 = vld [vmem:[%s724_s0] sm:$0x1] }
  0x65   : > { %1720 = vst [vmem:[%s1977_s17 + $0x6] sm:$0x1] %v740_v18 }
  0x66   : > { %759 = vsyncadd [#allocation5], 16  ;;  %s760_s6 = scalar_lea.vmem %s2457_s3, %s2001_s11 }
  0x67   : > { %v776_v19 = vld [vmem:[%s760_s6] sm:$0x1] }
  0x68   : > { %1722 = vst [vmem:[%s2016_s27 + $0x6] sm:$0x1] %v776_v19 }
  0x69   : > { %795 = vsyncadd [#allocation5 + $0x1], 16  ;;  %s796_s18 = scalar_lea.vmem %s2457_s3, %s2003_s9 }
  0x6a   : > { %v812_v20 = vld [vmem:[%s796_s18] sm:$0x1] }
  0x6b   : > { %1724 = vst [vmem:[%s2024_s16 + $0x6] sm:$0x1] %v812_v20 }
  0x6c   : > { %831 = vsyncadd [#allocation5 + $0x2], 16  ;;  %s2468_s21 = sld [smem:[#allocation61_spill]] }
  0x72   : > { %s832_s12 = scalar_lea.vmem %s2457_s3, %s2468_s21 }
  0x73   : > { %v848_v21 = vld [vmem:[%s832_s12] sm:$0x1] }
  0x74   : > { %1726 = vst [vmem:[%s1977_s17 + $0x7] sm:$0x1] %v848_v21 }
  0x75   : > { %867 = vsyncadd [#allocation5], 16  ;;  %s868_s20 = scalar_lea.vmem %s2457_s3, %s2007_s13 }
  0x76   : > { %v884_v22 = vld [vmem:[%s868_s20] sm:$0x1] }
  0x77   : > { %1728 = vst [vmem:[%s2016_s27 + $0x7] sm:$0x1] %v884_v22 }
  0x78   : > { %903 = vsyncadd [#allocation5 + $0x1], 16  ;;  %s2469_s9 = sld [smem:[#allocation62_spill]] }
  0x7e   : > { %s904_s22 = scalar_lea.vmem %s2457_s3, %s2469_s9 }
  0x7f   : > { %v920_v23 = vld [vmem:[%s904_s22] sm:$0x1] }
  0x80   : > { %1730 = vst [vmem:[%s2024_s16 + $0x7] sm:$0x1] %v920_v23 }
  0x81   : > { %939 = vsyncadd [#allocation5 + $0x2], 16 }
  0x82   : > { %1851 = dma.done.wait [#allocation5], 16 }
  0x83   : > { %1852 = vsyncadd [#allocation5], 4294967280 }
  0x84   : > { %1853 = dma.done.wait [#allocation5 + $0x1], 16 }
  0x85   : > { %1854 = vsyncadd [#allocation5 + $0x1], 4294967280 }
  0x86   : > { %1855 = dma.done.wait [#allocation5 + $0x2], 16 }
  0x87   : > { %1856 = vsyncadd [#allocation5 + $0x2], 4294967280 }
  0x88   : > { %1857 = dma.done.wait [#allocation5], 16 }
  0x89   : > { %1858 = vsyncadd [#allocation5], 4294967280 }
  0x8a   : > { %1859 = dma.done.wait [#allocation5 + $0x1], 16 }
  0x8b   : > { %1860 = vsyncadd [#allocation5 + $0x1], 4294967280 }
  0x8c   : > { %1861 = dma.done.wait [#allocation5 + $0x2], 16 }
  0x8d   : > { %1862 = vsyncadd [#allocation5 + $0x2], 4294967280 }
  0x8e   : > { %1863 = dma.done.wait [#allocation5], 16 }
  0x8f   : > { %1864 = vsyncadd [#allocation5], 4294967280 }
  0x90   : > { %1865 = dma.done.wait [#allocation5 + $0x1], 16 }
  0x91   : > { %1866 = vsyncadd [#allocation5 + $0x1], 4294967280 }
  0x92   : > { %1867 = dma.done.wait [#allocation5 + $0x2], 16 }
  0x93   : > { %1868 = vsyncadd [#allocation5 + $0x2], 4294967280 }
  0x94   : > { %1869 = dma.done.wait [#allocation5], 16 }
  0x95   : > { %1870 = vsyncadd [#allocation5], 4294967280 }
  0x96   : > { %1871 = dma.done.wait [#allocation5 + $0x1], 16 }
  0x97   : > { %1872 = vsyncadd [#allocation5 + $0x1], 4294967280 }
  0x98   : > { %1873 = dma.done.wait [#allocation5 + $0x2], 16 }
  0x99   : > { %1874 = vsyncadd [#allocation5 + $0x2], 4294967280 }
  0x9a   : > { %1875 = dma.done.wait [#allocation5], 16 }
  0x9b   : > { %1876 = vsyncadd [#allocation5], 4294967280 }
  0x9c   : > { %1877 = dma.done.wait [#allocation5 + $0x1], 16 }
  0x9d   : > { %1878 = vsyncadd [#allocation5 + $0x1], 4294967280 }
  0x9e   : > { %1879 = dma.done.wait [#allocation5 + $0x2], 16 }
  0x9f   : > { %1880 = vsyncadd [#allocation5 + $0x2], 4294967280 }
  0xa0   : > { %1881 = dma.done.wait [#allocation5], 16 }
  0xa1   : > { %1882 = vsyncadd [#allocation5], 4294967280 }
  0xa2   : > { %1883 = dma.done.wait [#allocation5 + $0x1], 16 }
  0xa3   : > { %1884 = vsyncadd [#allocation5 + $0x1], 4294967280 }
  0xa4   : > { %1885 = dma.done.wait [#allocation5 + $0x2], 16 }
  0xa5   : > { %1886 = vsyncadd [#allocation5 + $0x2], 4294967280 }
  0xa6   : > { %1887 = dma.done.wait [#allocation5], 16 }
  0xa7   : > { %1888 = vsyncadd [#allocation5], 4294967280 }
  0xa8   : > { %1889 = dma.done.wait [#allocation5 + $0x1], 16 }
  0xa9   : > { %1890 = vsyncadd [#allocation5 + $0x1], 4294967280 }
  0xaa   : > { %1891 = dma.done.wait [#allocation5 + $0x2], 16 }
  0xab   : > { %1892 = vsyncadd [#allocation5 + $0x2], 4294967280 }
  0xac   : > { %1893 = dma.done.wait [#allocation5], 16 }
  0xad   : > { %1894 = vsyncadd [#allocation5], 4294967280 }
  0xae   : > { %1895 = dma.done.wait [#allocation5 + $0x1], 16 }
  0xaf   : > { %1896 = vsyncadd [#allocation5 + $0x1], 4294967280 }
  0xb0   : > { %1897 = dma.done.wait [#allocation5 + $0x2], 16 }
  0xb1   : > { %1898 = vsyncadd [#allocation5 + $0x2], 4294967280  ;;  %s2470_s17 = sld [smem:[#allocation59_spill]] }
  0xb7   : > { %s33_s0 = sadd.s32 1, %s2470_s17  }
  0xb8   : > { %p30_p0 = scmp.ge.s32.totalorder %s33_s0, 16  }
  0xb9   :  { %v993_v24 = vld [vmem:[#allocation2 + $0x20] sm:$0xff] (%p30_p0)  ;;  %v991_v29 = vld [vmem:[#allocation2 + $0x10] sm:$0xff] (%p30_p0)  ;;  %v994_v41 = vld [vmem:[#allocation2 + $0x28] sm:$0xff] (%p30_p0)  ;;  %vm1410_vm5 = vcmask (%p30_p0), 130112   ;;  %vm1414_vm6 = vcmask (%p30_p0), 195712   ;;  %vm1418_vm8 = vcmask (%p30_p0), 261312  }
  0xba   :  { %32 = sbr.rel (!%p30_p0) target bundleno = 11 (0xb), region = 895  ;;  %v1009_v25 = vld [vmem:[#allocation3 + $0x20] sm:$0xff] (%p30_p0)  ;;  %v1007_v30 = vld [vmem:[#allocation3 + $0x10] sm:$0xff] (%p30_p0)  ;;  %v1010_v42 = vld [vmem:[#allocation3 + $0x28] sm:$0xff] (%p30_p0)  ;;  %vm1422_vm9 = vcmask (%p30_p0), 326912   ;;  %vm1426_vm10 = vcmask (%p30_p0), 392512  }
  0xbb   :  { %v1041_v26 = vld [vmem:[#allocation4 + $0x20] sm:$0xff] (%p30_p0)  ;;  %v1025_v27 = vsub.f32 (%p30_p0), %v993_v24, %v1009_v25  ;;  %v1039_v31 = vld [vmem:[#allocation4 + $0x10] sm:$0xff] (%p30_p0)  ;;  %v1023_v32 = vsub.f32 (%p30_p0), %v991_v29, %v1007_v30  ;;  %v1042_v43 = vld [vmem:[#allocation4 + $0x28] sm:$0xff] (%p30_p0)  ;;  %v1026_v46 = vsub.f32 (%p30_p0), %v994_v41, %v1010_v42  ;;  %vm1430_vm14 = vcmask (%p30_p0), 458112   ;;  %s2499_s13 = sld [smem:[#allocation63_spill]] (%p30_p0) }
  0xbc   :  { %v1057_v28 = vsub.f32 (%p30_p0), %v993_v24, %v1041_v26  ;;  %v1055_v33 = vsub.f32 (%p30_p0), %v991_v29, %v1039_v31  ;;  %v989_v34 = vld [vmem:[#allocation2] sm:$0xff] (%p30_p0)  ;;  %v1058_v47 = vsub.f32 (%p30_p0), %v994_v41, %v1042_v43  ;;  %v992_v48 = vld [vmem:[#allocation2 + $0x18] sm:$0xff] (%p30_p0)  ;;  %v990_v55 = vld [vmem:[#allocation2 + $0x8] sm:$0xff] (%p30_p0)  ;;  %vm1434_vm15 = vcmask (%p30_p0), 523712  }
  0xbd   :  { %v1005_v35 = vld [vmem:[#allocation3] sm:$0xff] (%p30_p0)  ;;  %v1089_v38 = vmul.f32 (%p30_p0), %v1025_v27, %v1025_v27  ;;  %v1087_v45 = vmul.f32 (%p30_p0), %v1023_v32, %v1023_v32  ;;  %v1008_v49 = vld [vmem:[#allocation3 + $0x18] sm:$0xff] (%p30_p0)  ;;  %v1006_v56 = vld [vmem:[#allocation3 + $0x8] sm:$0xff] (%p30_p0)  ;;  %v1090_v62 = vmul.f32 (%p30_p0), %v1026_v46, %v1026_v46 }
  0xbe   :  { %v1037_v36 = vld [vmem:[#allocation4] sm:$0xff] (%p30_p0)  ;;  %v1073_v37 = vmul.f32 (%p30_p0), %v1057_v28, %v1057_v28  ;;  %v1021_v39 = vsub.f32 (%p30_p0), %v989_v34, %v1005_v35  ;;  %v1071_v44 = vmul.f32 (%p30_p0), %v1055_v33, %v1055_v33  ;;  %v1040_v50 = vld [vmem:[#allocation4 + $0x18] sm:$0xff] (%p30_p0)  ;;  %v1024_v54 = vsub.f32 (%p30_p0), %v992_v48, %v1008_v49  ;;  %v1038_v57 = vld [vmem:[#allocation4 + $0x8] sm:$0xff] (%p30_p0) }
  0xbf   :  { %v1053_v40 = vsub.f32 %v989_v34, %v1037_v36  ;;  %v1074_v59 = vmul.f32 %v1058_v47, %v1058_v47  ;;  %v1056_v60 = vsub.f32 %v992_v48, %v1040_v50  ;;  %v1022_v63 = vsub.f32 %v990_v55, %v1006_v56  ;;  %v997_v3 = vld [vmem:[#allocation2 + $0x40] sm:$0xff]  ;;  %v996_v8 = vld [vmem:[#allocation2 + $0x38] sm:$0xff]  ;;  %v995_v11 = vld [vmem:[#allocation2 + $0x30] sm:$0xff] }
  0xc0   :  { %v1105_v51 = vsub.f32 %v1073_v37, %v1089_v38  ;;  %v1085_v53 = vmul.f32 %v1021_v39, %v1021_v39  ;;  %v1103_v58 = vsub.f32 %v1071_v44, %v1087_v45  ;;  %v1054_v0 = vsub.f32 %v990_v55, %v1038_v57  ;;  %v1013_v4 = vld [vmem:[#allocation3 + $0x40] sm:$0xff]  ;;  %v1012_v9 = vld [vmem:[#allocation3 + $0x38] sm:$0xff]  ;;  %v1011_v12 = vld [vmem:[#allocation3 + $0x30] sm:$0xff] }
  0xc1   :  { %v1069_v52 = vmul.f32 %v1053_v40, %v1053_v40  ;;  %v1072_v1 = vmul.f32 %v1056_v60, %v1056_v60  ;;  %v1088_v2 = vmul.f32 %v1024_v54, %v1024_v54  ;;  %v1045_v5 = vld [vmem:[#allocation4 + $0x40] sm:$0xff]  ;;  %v1086_v7 = vmul.f32 %v1022_v63, %v1022_v63  ;;  %v1044_v10 = vld [vmem:[#allocation4 + $0x38] sm:$0xff]  ;;  %v1043_v13 = vld [vmem:[#allocation4 + $0x30] sm:$0xff] }
  0xc2   :  { %1125 = vadd.xlane.f32.xlu2 %v1105_v51  ;;  %1121 = vadd.xlane.f32.xlu1 %v1103_v58  ;;  %v1070_v6 = vmul.f32 %v1054_v0, %v1054_v0  ;;  %v1106_v14 = vsub.f32 %v1074_v59, %v1090_v62  ;;  %v1029_v15 = vsub.f32 %v997_v3, %v1013_v4  ;;  %v1000_v27 = vld [vmem:[#allocation2 + $0x58] sm:$0xff]  ;;  %v999_v32 = vld [vmem:[#allocation2 + $0x50] sm:$0xff]  ;;  %v998_v35 = vld [vmem:[#allocation2 + $0x48] sm:$0xff] }
  0xc3   :  { %v1101_v61 = vsub.f32 %v1069_v52, %v1085_v53  ;;  %v1061_v16 = vsub.f32 %v997_v3, %v1045_v5  ;;  %v1104_v17 = vsub.f32 %v1072_v1, %v1088_v2  ;;  %v1028_v18 = vsub.f32 %v996_v8, %v1012_v9  ;;  %v1016_v28 = vld [vmem:[#allocation3 + $0x58] sm:$0xff]  ;;  %v1015_v33 = vld [vmem:[#allocation3 + $0x50] sm:$0xff]  ;;  %v1014_v36 = vld [vmem:[#allocation3 + $0x48] sm:$0xff] }
  0xc4   :  { %v1060_v19 = vsub.f32 %v996_v8, %v1044_v10  ;;  %v1102_v20 = vsub.f32 %v1070_v6, %v1086_v7  ;;  %v1027_v21 = vsub.f32 %v995_v11, %v1011_v12  ;;  %v1059_v22 = vsub.f32 %v995_v11, %v1043_v13  ;;  %v1048_v29 = vld [vmem:[#allocation4 + $0x58] sm:$0xff]  ;;  %v1047_v34 = vld [vmem:[#allocation4 + $0x50] sm:$0xff]  ;;  %v1046_v37 = vld [vmem:[#allocation4 + $0x48] sm:$0xff] }
  0xc5   :  { %1117 = vadd.xlane.f32.xlu0 %v1101_v61  ;;  %v1077_v23 = vmul.f32 %v1061_v16, %v1061_v16  ;;  %v1093_v24 = vmul.f32 %v1029_v15, %v1029_v15  ;;  %v1092_v26 = vmul.f32 %v1028_v18, %v1028_v18  ;;  %v1032_v39 = vsub.f32 %v1000_v27, %v1016_v28  ;;  %v1003_v51 = vld [vmem:[#allocation2 + $0x70] sm:$0xff]  ;;  %v1002_v56 = vld [vmem:[#allocation2 + $0x68] sm:$0xff]  ;;  %v1001_v59 = vld [vmem:[#allocation2 + $0x60] sm:$0xff] }
  0xc6   :  { %v1076_v25 = vmul.f32 %v1060_v19, %v1060_v19  ;;  %v1075_v30 = vmul.f32 %v1059_v22, %v1059_v22  ;;  %v1091_v31 = vmul.f32 %v1027_v21, %v1027_v21  ;;  %v1064_v40 = vsub.f32 %v1000_v27, %v1048_v29  ;;  %v1019_v52 = vld [vmem:[#allocation3 + $0x70] sm:$0xff]  ;;  %v1018_v57 = vld [vmem:[#allocation3 + $0x68] sm:$0xff]  ;;  %v1017_v60 = vld [vmem:[#allocation3 + $0x60] sm:$0xff] }
  0xc7   :  { %v1109_v38 = vsub.f32 %v1077_v23, %v1093_v24  ;;  %v1031_v42 = vsub.f32 %v999_v32, %v1015_v33  ;;  %v1063_v43 = vsub.f32 %v999_v32, %v1047_v34  ;;  %v1030_v45 = vsub.f32 %v998_v35, %v1014_v36  ;;  %v1051_v53 = vld [vmem:[#allocation4 + $0x70] sm:$0xff]  ;;  %v1050_v58 = vld [vmem:[#allocation4 + $0x68] sm:$0xff]  ;;  %v1049_v61 = vld [vmem:[#allocation4 + $0x60] sm:$0xff] }
  0xc8   :  { %v1108_v41 = vsub.f32 %v1076_v25, %v1092_v26  ;;  %v1107_v44 = vsub.f32 %v1075_v30, %v1091_v31  ;;  %v1062_v46 = vsub.f32 %v998_v35, %v1046_v37  ;;  %v1080_v47 = vmul.f32 %v1064_v40, %v1064_v40  ;;  %v1004_v13 = vld [vmem:[#allocation2 + $0x78] sm:$0xff] }
  0xc9   :  { %v1096_v48 = vmul.f32 %v1032_v39, %v1032_v39  ;;  %v1079_v49 = vmul.f32 %v1063_v43, %v1063_v43  ;;  %v1095_v50 = vmul.f32 %v1031_v42, %v1031_v42  ;;  %v1094_v55 = vmul.f32 %v1030_v45, %v1030_v45  ;;  %v1052_v15 = vld [vmem:[#allocation4 + $0x78] sm:$0xff] }
  0xca   :  { %1127 = vadd.xlane.f32.xlu2 %v1106_v14  ;;  %1123 = vadd.xlane.f32.xlu1 %v1104_v17  ;;  %v1078_v54 = vmul.f32 %v1062_v46, %v1062_v46  ;;  %v1035_v63 = vsub.f32 %v1003_v51, %v1019_v52  ;;  %v1067_v0 = vsub.f32 %v1003_v51, %v1051_v53  ;;  %v1020_v14 = vld [vmem:[#allocation3 + $0x78] sm:$0xff]  ;;  %v1405_v45 = vlaneseq }
  0xcb   :  { %v1112_v62 = vsub.f32 %v1080_v47, %v1096_v48  ;;  %v1111_v1 = vsub.f32 %v1079_v49, %v1095_v50  ;;  %v1034_v2 = vsub.f32 %v1002_v56, %v1018_v57  ;;  %v1066_v3 = vsub.f32 %v1002_v56, %v1050_v58 }
  0xcc   :  { %v1110_v4 = vsub.f32 %v1078_v54, %v1094_v55  ;;  %v1033_v5 = vsub.f32 %v1001_v59, %v1017_v60  ;;  %v1065_v6 = vsub.f32 %v1001_v59, %v1049_v61  ;;  %v1083_v7 = vmul.f32 %v1067_v0, %v1067_v0 }
  0xcd   :  { %1119 = vadd.xlane.f32.xlu0 %v1102_v20  ;;  %v1099_v8 = vmul.f32 %v1035_v63, %v1035_v63  ;;  %v1082_v9 = vmul.f32 %v1066_v3, %v1066_v3  ;;  %v1098_v10 = vmul.f32 %v1034_v2, %v1034_v2  ;;  %v1036_v19 = vsub.f32 %v1004_v13, %v1020_v14 }
  0xce   :  { %v1081_v11 = vmul.f32 %v1065_v6, %v1065_v6  ;;  %v1097_v12 = vmul.f32 %v1033_v5, %v1033_v5  ;;  %v1068_v20 = vsub.f32 %v1004_v13, %v1052_v15  ;;  %v2159_v52 = vand.u32 127, %v1405_v45 }
  0xcf   :  { %v1115_v16 = vsub.f32 %v1083_v7, %v1099_v8  ;;  %v1114_v17 = vsub.f32 %v1082_v9, %v1098_v10  ;;  %v1100_v22 = vmul.f32 %v1036_v19, %v1036_v19 }
  0xd0   :  { %v1113_v18 = vsub.f32 %v1081_v11, %v1097_v12  ;;  %v1084_v21 = vmul.f32 %v1068_v20, %v1068_v20  ;;  %v2169_v60 = vadd.s32 4294967264, %v2159_v52  ;;  %v2176_v0 = vadd.s32 4294967256, %v2159_v52 }
  0xd1   :  { %v2189_v12 = vadd.s32 4294967272, %v2159_v52  ;;  %v2192_v13 = vadd.s32 4294967288, %v2159_v52 }
  0xd2   :  { %1133 = vadd.xlane.f32.xlu2 %v1109_v38  ;;  %1131 = vadd.xlane.f32.xlu1 %v1108_v41  ;;  %v1116_v23 = vsub.f32 %v1084_v21, %v1100_v22 }
  0xd5   :  { %1129 = vadd.xlane.f32.xlu0 %v1107_v44 }
  0xda   :  { %1139 = vadd.xlane.f32.xlu2 %v1112_v62  ;;  %1137 = vadd.xlane.f32.xlu1 %v1111_v1  ;;  %v2172_v62 = vadd.s32 4294967280, %v2159_v52 }
  0xdd   :  { %1135 = vadd.xlane.f32.xlu0 %v1110_v4 }
  0xe2   :  { %1145 = vadd.xlane.f32.xlu2 %v1115_v16  ;;  %1143 = vadd.xlane.f32.xlu1 %v1114_v17 }
  0xe5   :  { %1141 = vadd.xlane.f32.xlu0 %v1113_v18 }
  0xed   :  { %1147 = vadd.xlane.f32.xlu0 %v1116_v23 }
 0x135   :  { %v2135_v24 = vpop.xlane.xlu2 %1125  ;;  %v2137_v25 = vpop.xlane.xlu1 %1121 }
 0x136   :  { %v1169_v27 = vand.u32 2147483647, %v2135_v24  ;;  %v1167_v28 = vand.u32 2147483647, %v2137_v25  ;;  %v1153_v63 = vmax.f32 %v2135_v24, 0.0  ;;  %v1151_v3 = vmax.f32 %v2137_v25, 0.0 }
 0x138   :  { %v2139_v26 = vpop.xlane.xlu0 %1117  ;;  %v1185_v30 = vsub.f32 0.0, %v1169_v27  ;;  %v1183_v31 = vsub.f32 0.0, %v1167_v28 }
 0x139   :  { %v1165_v29 = vand.u32 2147483647, %v2139_v26  ;;  %v1149_v4 = vmax.f32 %v2139_v26, 0.0 }
 0x13a   :  { %v1205_v36 = vmul.f32 1.442695, %v1185_v30  ;;  %v1201_v38 = vmul.f32 1.442695, %v1183_v31 }
 0x13b   :  { %v1181_v33 = vsub.f32 0.0, %v1165_v29 }
 0x13c   :  { %1745 = vpow2.f32 %v1205_v36 }
 0x13d   :  { %v2144_v32 = vpop.xlane.xlu2 %1127  ;;  %v2150_v39 = vpop.xlane.xlu1 %1123  ;;  %v1197_v40 = vmul.f32 1.442695, %v1181_v33  ;;  %1747 = vpow2.f32 %v1201_v38 }
 0x13e   :  { %v1170_v37 = vand.u32 2147483647, %v2144_v32  ;;  %v1168_v43 = vand.u32 2147483647, %v2150_v39  ;;  %v1154_v18 = vmax.f32 %v2144_v32, 0.0  ;;  %v1152_v19 = vmax.f32 %v2150_v39, 0.0 }
 0x13f   :  { %1749 = vpow2.f32 %v1197_v40 }
 0x140   :  { %v2146_v34 = vpop.xlane.xlu0 %1119  ;;  %v1186_v42 = vsub.f32 0.0, %v1170_v37  ;;  %v1184_v47 = vsub.f32 0.0, %v1168_v43 }
 0x141   :  { %v1166_v35 = vand.u32 2147483647, %v2146_v34  ;;  %v1150_v20 = vmax.f32 %v2146_v34, 0.0 }
 0x142   :  { %v1207_v46 = vmul.f32 1.442695, %v1186_v42  ;;  %v1746_v48 = vpop.eup %1745  ;;  %v1203_v53 = vmul.f32 1.442695, %v1184_v47  ;;  %v2218_v42 = vadd.s32 4294967232, %v2159_v52 }
 0x143   :  { %v1182_v41 = vsub.f32 0.0, %v1166_v35  ;;  %v2153_v49 = vpop.eup %1747  ;;  %v1265_v55 = vadd.f32 1.0, %v1746_v48  ;;  %v1268_v61 = vmul.f32 -0.5, %v1746_v48  ;;  %v1271_v7 = vand.u32 2147483647, %v1746_v48 }
 0x144   :  { %v1247_v57 = vadd.f32 1.0, %v2153_v49  ;;  %v1250_v8 = vmul.f32 -0.5, %v2153_v49  ;;  %v1253_v9 = vand.u32 2147483647, %v2153_v49 }
 0x145   :  { %v1199_v44 = vmul.f32 1.442695, %v1182_v41  ;;  %v2155_v50 = vpop.xlane.xlu1 %1131  ;;  %v2157_v51 = vpop.eup %1749  ;;  %v1269_v10 = vadd.f32 1.0, %v1268_v61  ;;  %vm2204_vm0 = vcmp.lt.f32.partialorder %v1271_v7, 0.0004427343 }
 0x146   :  { %v2161_v54 = vpop.xlane.xlu2 %1133  ;;  %v1172_v58 = vand.u32 2147483647, %v2155_v50  ;;  %v1229_v59 = vadd.f32 1.0, %v2157_v51  ;;  %v1232_v11 = vmul.f32 -0.5, %v2157_v51  ;;  %v1251_v28 = vadd.f32 1.0, %v1250_v8 }
 0x147   :  { %1751 = vpow2.f32 %v1199_v44  ;;  %v1173_v15 = vand.u32 2147483647, %v2161_v54  ;;  %vm2208_vm1 = vcmp.lt.f32.partialorder %v1253_v9, 0.0004427343  ;;  %v1270_v33 = vmul.f32 %v1746_v48, %v1269_v10 }
 0x148   :  { %1753 = vpow2.f32 %v1207_v46  ;;  %v1188_v5 = vsub.f32 0.0, %v1172_v58  ;;  %v2183_v6 = vpop.xlane.xlu0 %1129  ;;  %v1233_v35 = vadd.f32 1.0, %v1232_v11  ;;  %v1235_v36 = vand.u32 2147483647, %v2157_v51 }
 0x149   :  { %1755 = vpow2.f32 %v1203_v53  ;;  %v1171_v16 = vand.u32 2147483647, %v2183_v6  ;;  %v1189_v43 = vsub.f32 0.0, %v1173_v15 }
 0x14a   :  { %1757 = vlog2.f32 %v1265_v55  ;;  %v1211_v21 = vmul.f32 1.442695, %v1188_v5  ;;  %v1252_v55 = vmul.f32 %v2153_v49, %v1251_v28  ;;  %vm2224_vm2 = vcmp.lt.f32.partialorder %v1235_v36, 0.0004427343 }
 0x14b   :  { %1759 = vlog2.f32 %v1247_v57  ;;  %v1187_v30 = vsub.f32 0.0, %v1171_v16  ;;  %v1213_v7 = vmul.f32 1.442695, %v1189_v43  ;;  %v1234_v49 = vmul.f32 %v2157_v51, %v1233_v35 }
 0x14c   :  { %1761 = vlog2.f32 %v1229_v59  ;;  %v1156_v59 = vmax.f32 %v2155_v50, 0.0 }
 0x14d   :  { %v2163_v56 = vpop.eup %1751  ;;  %v2214_v38 = vpop.xlane.xlu1 %1137  ;;  %v1209_v46 = vmul.f32 1.442695, %v1187_v30 }
 0x14e   :  { %v1238_v1 = vadd.f32 1.0, %v2163_v56  ;;  %v2179_v2 = vpop.eup %1753  ;;  %v2202_v22 = vpop.xlane.xlu2 %1139  ;;  %v1241_v37 = vmul.f32 -0.5, %v2163_v56  ;;  %v1175_v57 = vand.u32 2147483647, %v2214_v38  ;;  %v1244_v5 = vand.u32 2147483647, %v2163_v56 }
 0x14f   :  { %v1274_v14 = vadd.f32 1.0, %v2179_v2  ;;  %v2197_v17 = vpop.eup %1755  ;;  %v1277_v44 = vmul.f32 -0.5, %v2179_v2  ;;  %v1280_v45 = vand.u32 2147483647, %v2179_v2  ;;  %v1176_v8 = vand.u32 2147483647, %v2202_v22 }
 0x150   :  { %1763 = vlog2.f32 %v1238_v1  ;;  %v1758_v23 = vpop.eup %1757  ;;  %v1256_v41 = vadd.f32 1.0, %v2197_v17  ;;  %v1242_v61 = vadd.f32 1.0, %v1241_v37  ;;  %v1157_v1 = vmax.f32 %v2161_v54, 0.0  ;;  %v2231_v9 = vpop.xlane.xlu0 %1135 }
 0x151   :  { %v1760_v31 = vpop.eup %1759  ;;  %1765 = vlog2.f32 %v1274_v14  ;;  %v1267_v48 = vmul.f32 0.6931472, %v1758_v23  ;;  %v1278_v10 = vadd.f32 1.0, %v1277_v44  ;;  %vm2238_vm3 = vcmp.lt.f32.partialorder %v1280_v45, 0.0004427343 }
 0x152   :  { %v1762_v40 = vpop.eup %1761  ;;  %1767 = vpow2.f32 %v1211_v21  ;;  %v1249_v53 = vmul.f32 0.6931472, %v1760_v31  ;;  %v1191_v23 = vsub.f32 0.0, %v1175_v57  ;;  %v1259_v30 = vmul.f32 -0.5, %v2197_v17 }
 0x153   :  { %v1231_v58 = vmul.f32 0.6931472, %v1762_v40  ;;  %1769 = vlog2.f32 %v1256_v41  ;;  %v1273_v15 = vsel %vm2204_vm0, %v1270_v33, %v1267_v48  ;;  %v1243_v31 = vmul.f32 %v2163_v56, %v1242_v61 }
 0x154   :  { %1771 = vpow2.f32 %v1209_v46  ;;  %v1255_v16 = vsel %vm2208_vm1, %v1252_v55, %v1249_v53  ;;  %v1174_v27 = vand.u32 2147483647, %v2231_v9  ;;  %vm2251_vm4 = vcmp.lt.f32.partialorder %v1244_v5, 0.0004427343 }
 0x155   :  { %v1237_v51 = vsel %vm2224_vm2, %v1234_v49, %v1231_v58  ;;  %1773 = vpow2.f32 %v1213_v7  ;;  %v1192_v35 = vsub.f32 0.0, %v1176_v8  ;;  %v1217_v36 = vmul.f32 1.442695, %v1191_v23  ;;  %v2280_v26 = vpop.xlane.xlu1 %1143 }
 0x156   :  { %v1764_v47 = vpop.eup %1763  ;;  %v2249_v33 = vpop.xlane.xlu2 %1145  ;;  %v2257_v37 = vadd.f32 %v1273_v15, %v1153_v63  ;;  %v1279_v40 = vmul.f32 %v2179_v2, %v1278_v10  ;;  %v1190_v41 = vsub.f32 0.0, %v1174_v27  ;;  %v2264_v44 = vadd.f32 %v1255_v16, %v1151_v3 }
 0x157   :  { %v1240_v11 = vmul.f32 0.6931472, %v1764_v47  ;;  %v1766_v14 = vpop.eup %1765  ;;  %v1179_v47 = vand.u32 2147483647, %v2249_v33  ;;  %v1373_v63 = vadd.f32 %v1237_v51, %v1149_v4  ;;  %v1260_v2 = vadd.f32 1.0, %v1259_v30 }
 0x158   :  { %v2242_v28 = vpop.eup %1767  ;;  %v1276_v45 = vmul.f32 0.6931472, %v1766_v14  ;;  %v1262_v48 = vand.u32 2147483647, %v2197_v17  ;;  %v1215_v53 = vmul.f32 1.442695, %v1190_v41  ;;  %1775 = vpow2.f32 %v1217_v36 }
 0x159   :  { %v1246_v56 = vsel %vm2251_vm4, %v1243_v31, %v1240_v11  ;;  %v1770_v43 = vpop.eup %1769  ;;  %v1292_v46 = vadd.f32 1.0, %v2242_v28  ;;  %v1219_v55 = vmul.f32 1.442695, %v1192_v35  ;;  %v2277_v58 = vadd.s32 4294967240, %v2159_v52 }
 0x15a   :  { %v2268_v24 = vpop.eup %1771  ;;  %v1374_v25 = vadd.f32 %v1246_v56, %v1150_v20  ;;  %v1258_v57 = vmul.f32 0.6931472, %v1770_v43  ;;  %1777 = vpow2.f32 %v1215_v53  ;;  %v1421_v61 = vperm.slane %v2257_v37, %v2169_v60 }
 0x15b   :  { %v1283_v3 = vadd.f32 1.0, %v2268_v24  ;;  %v2282_v4 = vpop.eup %1773  ;;  %v1282_v34 = vsel %vm2238_vm3, %v1279_v40, %v1276_v45  ;;  %1779 = vlog2.f32 %v1292_v46  ;;  %v1195_v20 = vsub.f32 0.0, %v1179_v47 }
 0x15c   :  { %v1413_v5 = vperm.slane %v2264_v44, %v2172_v62  ;;  %v1261_v7 = vmul.f32 %v2197_v17, %v1260_v2  ;;  %vm2291_vm7 = vcmp.lt.f32.partialorder %v1262_v48, 0.0004427343  ;;  %v1407_v49 = vperm.slane %v1373_v63, %v2159_v52 }
 0x15d   :  { %1781 = vlog2.f32 %v1283_v3  ;;  %v1409_v10 = vperm.slane %v1374_v25, %v2192_v13  ;;  %v1178_v11 = vand.u32 2147483647, %v2280_v26  ;;  %v2300_v14 = vadd.f32 %v1282_v34, %v1154_v18  ;;  %v2315_v18 = vpop.xlane.xlu0 %1141 }
 0x15e   :  { %1783 = vpow2.f32 %v1219_v55  ;;  %v1264_v62 = vsel %vm2291_vm7, %v1261_v7, %v1258_v57  ;;  %v1301_v17 = vadd.f32 1.0, %v2282_v4  ;;  %v2306_v15 = vadd.s32 4294967248, %v2159_v52  ;;  %v2308_v16 = vpop.eup %1775 }
 0x15f   :  { %v1155_v13 = vmax.f32 %v2183_v6, 0.0  ;;  %v1286_v21 = vmul.f32 -0.5, %v2268_v24  ;;  %v2313_v23 = vadd.s32 4294967208, %v2159_v52  ;;  %v1225_v32 = vmul.f32 1.442695, %v1195_v20 }
 0x160   :  { %v2317_v51 = vpop.eup %1777  ;;  %v1295_v30 = vmul.f32 -0.5, %v2242_v28  ;;  %v1160_v31 = vmax.f32 %v2202_v22, 0.0  ;;  %v2322_v27 = vadd.s32 4294967216, %v2159_v52  ;;  %v1194_v29 = vsub.f32 0.0, %v1178_v11 }
 0x161   :  { %v1780_v35 = vpop.eup %1779  ;;  %v1376_v36 = vadd.f32 %v1264_v62, %v1152_v19  ;;  %v1411_v40 = vsel %vm1410_vm5, %v1409_v10, %v1407_v49  ;;  %v1304_v56 = vmul.f32 -0.5, %v2282_v4  ;;  %v1310_v41 = vadd.f32 1.0, %v2317_v51 }
 0x162   :  { %v1425_v44 = vperm.slane %v2300_v14, %v2176_v0  ;;  %1785 = vlog2.f32 %v1301_v17  ;;  %v1307_v45 = vand.u32 2147483647, %v2282_v4  ;;  %v1159_v46 = vmax.f32 %v2214_v38, 0.0 }
 0x163   :  { %v1782_v43 = vpop.eup %1781  ;;  %v1298_v39 = vand.u32 2147483647, %v2242_v28  ;;  %v1287_v19 = vadd.f32 1.0, %v1286_v21  ;;  %v1319_v63 = vadd.f32 1.0, %v2308_v16  ;;  %1787 = vpow2.f32 %v1225_v32 }
 0x164   :  { %v2333_v47 = vpop.eup %1783  ;;  %v1415_v2 = vsel %vm1414_vm6, %v1413_v5, %v1411_v40  ;;  %v1296_v48 = vadd.f32 1.0, %v1295_v30  ;;  %v1289_v53 = vand.u32 2147483647, %v2268_v24  ;;  %v1223_v0 = vmul.f32 1.442695, %v1194_v29 }
 0x165   :  { %v1417_v25 = vperm.slane %v1376_v36, %v2189_v12  ;;  %v1305_v3 = vadd.f32 1.0, %v1304_v56  ;;  %v1285_v55 = vmul.f32 0.6931472, %v1782_v43  ;;  %1789 = vlog2.f32 %v1310_v41  ;;  %v2368_v32 = vpop.xlane.xlu0 %1147 }
 0x166   :  { %v1294_v57 = vmul.f32 0.6931472, %v1780_v35  ;;  %v1328_v34 = vadd.f32 1.0, %v2333_v47  ;;  %v2342_v20 = vadd.s32 4294967224, %v2159_v52  ;;  %v1177_v7 = vand.u32 2147483647, %v2315_v18 }
 0x167   :  { %v1419_v8 = vsel %vm1418_vm8, %v1417_v25, %v1415_v2  ;;  %v1288_v5 = vmul.f32 %v2268_v24, %v1287_v19  ;;  %1791 = vlog2.f32 %v1319_v63  ;;  %v1313_v49 = vmul.f32 -0.5, %v2317_v51 }
 0x168   :  { %v1786_v10 = vpop.eup %1785  ;;  %v1297_v12 = vmul.f32 %v2242_v28, %v1296_v48  ;;  %vm2349_vm11 = vcmp.lt.f32.partialorder %v1289_v53, 0.0004427343  ;;  %1793 = vpow2.f32 %v1223_v0  ;;  %v1193_v14 = vsub.f32 0.0, %v1177_v7 }
 0x169   :  { %v2353_v62 = vpop.eup %1787  ;;  %v2356_v17 = vmul.f32 %v2282_v4, %v1305_v3  ;;  %vm2358_vm12 = vcmp.lt.f32.partialorder %v1307_v45, 0.0004427343  ;;  %vm2362_vm13 = vcmp.lt.f32.partialorder %v1298_v39, 0.0004427343  ;;  %v1291_v28 = vsel %vm2349_vm11, %v1288_v5, %v1285_v55 }
 0x16a   :  { %v1300_v30 = vsel %vm2362_vm13, %v1297_v12, %v1294_v57  ;;  %v1423_v4 = vsel %vm1422_vm9, %v1421_v61, %v1419_v8  ;;  %1795 = vlog2.f32 %v1328_v34  ;;  %v1331_v29 = vmul.f32 -0.5, %v2333_v47 }
 0x16b   :  { %v1790_v35 = vpop.eup %1789  ;;  %v1322_v36 = vmul.f32 -0.5, %v2308_v16  ;;  %v1158_v40 = vmax.f32 %v2231_v9, 0.0  ;;  %v1314_v56 = vadd.f32 1.0, %v1313_v49  ;;  %v1221_v41 = vmul.f32 1.442695, %v1193_v14 }
 0x16c   :  { %v1303_v43 = vmul.f32 0.6931472, %v1786_v10  ;;  %v1379_v45 = vadd.f32 %v1291_v28, %v1155_v13  ;;  %v1355_v39 = vadd.f32 1.0, %v2353_v62  ;;  %v1180_v60 = vand.u32 2147483647, %v2368_v32 }
 0x16d   :  { %v1792_v37 = vpop.eup %1791  ;;  %v1380_v61 = vadd.f32 %v1300_v30, %v1156_v59  ;;  %v1427_v19 = vsel %vm1426_vm10, %v1425_v44, %v1423_v4  ;;  %v1316_v63 = vand.u32 2147483647, %v2317_v51  ;;  %1797 = vpow2.f32 %v1221_v41 }
 0x16e   :  { %v1794_v9 = vpop.eup %1793  ;;  %v1332_v2 = vadd.f32 1.0, %v1331_v29  ;;  %v1334_v48 = vand.u32 2147483647, %v2333_v47  ;;  %v1312_v6 = vmul.f32 0.6931472, %v1790_v35  ;;  %v1196_v13 = vsub.f32 0.0, %v1180_v60 }
 0x16f   :  { %v1323_v53 = vadd.f32 1.0, %v1322_v36  ;;  %v1325_v0 = vand.u32 2147483647, %v2308_v16  ;;  %v1315_v25 = vmul.f32 %v2317_v51, %v1314_v56  ;;  %v1346_v3 = vadd.f32 1.0, %v1794_v9 }
 0x170   :  { %v1796_v50 = vpop.eup %1795  ;;  %v1429_v59 = vperm.slane %v1379_v45, %v2306_v15  ;;  %1799 = vlog2.f32 %v1355_v39  ;;  %v1349_v44 = vmul.f32 -0.5, %v1794_v9  ;;  %v1227_v55 = vmul.f32 1.442695, %v1196_v13 }
 0x171   :  { %v1309_v57 = vsel %vm2358_vm12, %v2356_v17, %v1303_v43  ;;  %v1321_v34 = vmul.f32 0.6931472, %v1792_v37  ;;  %vm1438_vm0 = vcmask 589312   ;;  %vm2394_vm1 = vcmp.lt.f32.partialorder %v1316_v63, 0.0004427343 }
 0x172   :  { %1801 = vlog2.f32 %v1346_v3  ;;  %v1433_v51 = vperm.slane %v1380_v61, %v2277_v58  ;;  %vm2399_vm2 = vcmp.lt.f32.partialorder %v1334_v48, 0.0004427343  ;;  %v1318_v15 = vsel %vm2394_vm1, %v1315_v25, %v1312_v6 }
 0x173   :  { %1803 = vpow2.f32 %v1227_v55  ;;  %v1798_v5 = vpop.eup %1797  ;;  %v1330_v49 = vmul.f32 0.6931472, %v1796_v50  ;;  %v1333_v10 = vmul.f32 %v2333_v47, %v1332_v2  ;;  %v1324_v12 = vmul.f32 %v2308_v16, %v1323_v53 }
 0x174   :  { %v1358_v11 = vmul.f32 -0.5, %v2353_v62  ;;  %v1431_v14 = vsel %vm1430_vm14, %v1429_v59, %v1427_v19  ;;  %vm2409_vm3 = vcmp.lt.f32.partialorder %v1325_v0, 0.0004427343  ;;  %v1350_v17 = vadd.f32 1.0, %v1349_v44 }
 0x175   :  { %v1337_v21 = vadd.f32 1.0, %v1798_v5  ;;  %v1327_v24 = vsel %vm2409_vm3, %v1324_v12, %v1321_v34  ;;  %v1382_v28 = vadd.f32 %v1318_v15, %v1158_v40  ;;  %v1352_v30 = vand.u32 2147483647, %v1794_v9 }
 0x176   :  { %v1340_v4 = vmul.f32 -0.5, %v1798_v5  ;;  %v1800_v29 = vpop.eup %1799  ;;  %v1381_v16 = vadd.f32 %v1309_v57, %v1157_v1  ;;  %vm1442_vm4 = vcmask 654912   ;;  %vm1446_vm5 = vcmask 720512  }
 0x177   :  { %1805 = vlog2.f32 %v1337_v21  ;;  %v1336_v35 = vsel %vm2399_vm2, %v1333_v10, %v1330_v49  ;;  %v1359_v36 = vadd.f32 1.0, %v1358_v11  ;;  %v1361_v56 = vand.u32 2147483647, %v2353_v62 }
 0x178   :  { %v1802_v47 = vpop.eup %1801  ;;  %v1456_v41 = vadd.s32 4294967192, %v2159_v52  ;;  %v1435_v40 = vsel %vm1434_vm15, %v1433_v51, %v1431_v14  ;;  %v1383_v45 = vadd.f32 %v1327_v24, %v1159_v46  ;;  %v1351_v1 = vmul.f32 %v1794_v9, %v1350_v17 }
 0x179   :  { %v1804_v43 = vpop.eup %1803  ;;  %v1348_v54 = vmul.f32 0.6931472, %v1802_v47  ;;  %v1441_v39 = vperm.slane %v1382_v28, %v2342_v20  ;;  %vm2425_vm6 = vcmp.lt.f32.partialorder %v1352_v30, 0.0004427343  ;;  %v1341_v37 = vadd.f32 1.0, %v1340_v4 }
 0x17a   :  { %v1364_v61 = vadd.f32 1.0, %v1804_v43  ;;  %v1437_v19 = vperm.slane %v1381_v16, %v2218_v42  ;;  %v1343_v2 = vand.u32 2147483647, %v1798_v5  ;;  %v1367_v48 = vmul.f32 -0.5, %v1804_v43 }
 0x17b   :  { %v1354_v63 = vsel %vm2425_vm6, %v1351_v1, %v1348_v54  ;;  %v1357_v6 = vmul.f32 0.6931472, %v1800_v29  ;;  %vm2432_vm7 = vcmp.lt.f32.partialorder %v1361_v56, 0.0004427343  ;;  %v1162_v46 = vmax.f32 %v2280_v26, 0.0 }
 0x17c   :  { %1807 = vlog2.f32 %v1364_v61  ;;  %v1384_v9 = vadd.f32 %v1336_v35, %v1160_v31  ;;  %v1445_v13 = vperm.slane %v1383_v45, %v2322_v27  ;;  %v1439_v42 = vsel %vm1438_vm0, %v1437_v19, %v1435_v40 }
 0x17d   :  { %v1806_v20 = vpop.eup %1805  ;;  %v1360_v53 = vmul.f32 %v2353_v62, %v1359_v36  ;;  %v1443_v0 = vsel %vm1442_vm4, %v1441_v39, %v1439_v42  ;;  %v1386_v25 = vadd.f32 %v1354_v63, %v1162_v46  ;;  %v1342_v50 = vmul.f32 %v1798_v5, %v1341_v37 }
 0x17e   :  { %v1339_v3 = vmul.f32 0.6931472, %v1806_v20  ;;  %v1452_v59 = vadd.s32 4294967200, %v2159_v52  ;;  %v1161_v26 = vmax.f32 %v2315_v18, 0.0  ;;  %vm1344_vm8 = vcmp.lt.f32.partialorder %v1343_v2, 0.0004427343 }
 0x17f   :  { %v1368_v44 = vadd.f32 1.0, %v1367_v48  ;;  %v1460_v22 = vadd.s32 4294967184, %v2159_v52  ;;  %v1363_v31 = vsel %vm2432_vm7, %v1360_v53, %v1357_v6  ;;  %v1370_v55 = vand.u32 2147483647, %v1804_v43 }
 0x180   :  { %v1345_v27 = vsel %vm1344_vm8, %v1342_v50, %v1339_v3  ;;  %v1447_v62 = vsel %vm1446_vm5, %v1445_v13, %v1443_v0  ;;  %v1163_v57 = vmax.f32 %v2249_v33, 0.0  ;;  %vm1450_vm9 = vcmask 786112  }
 0x181   :  { %v1385_v34 = vadd.f32 %v1345_v27, %v1161_v26  ;;  %v1449_v51 = vperm.slane %v1384_v9, %v2313_v23  ;;  %v1457_v8 = vperm.slane %v1386_v25, %v1456_v41  ;;  %vm1454_vm10 = vcmask 851712  }
 0x182   :  { %v1808_v7 = vpop.eup %1807  ;;  %vm1458_vm11 = vcmask 917312   ;;  %v1387_v18 = vadd.f32 %v1363_v31, %v1163_v57  ;;  %v1369_v49 = vmul.f32 %v1804_v43, %v1368_v44  ;;  %v1464_v12 = vadd.s32 4294967176, %v2159_v52 }
 0x183   :  { %v1453_v15 = vperm.slane %v1385_v34, %v1452_v59  ;;  %v1366_v5 = vmul.f32 0.6931472, %v1808_v7  ;;  %v1451_v10 = vsel %vm1450_vm9, %v1449_v51, %v1447_v62  ;;  %v1164_v11 = vmax.f32 %v2368_v32, 0.0 }
 0x184   :  { %vm1371_vm12 = vcmp.lt.f32.partialorder %v1370_v55, 0.0004427343  ;;  %vm1462_vm13 = vcmask 982912   ;;  %v1461_v21 = vperm.slane %v1387_v18, %v1460_v22  ;;  %vm1466_vm14 = vcmask 1048512  }
 0x185   :  { %v1455_v14 = vsel %vm1454_vm10, %v1453_v15, %v1451_v10  ;;  %v1372_v33 = vsel %vm1371_vm12, %v1369_v49, %v1366_v5 }
 0x186   :  { %v1459_v58 = vsel %vm1458_vm11, %v1457_v8, %v1455_v14  ;;  %v1388_v17 = vadd.f32 %v1372_v33, %v1164_v11 }
 0x187   :  { %v1463_v24 = vsel %vm1462_vm13, %v1461_v21, %v1459_v58 }
 0x188   :  { %v1465_v23 = vperm.slane %v1388_v17, %v1464_v12 }
 0x18a   :  { %v1467_v28 = vsel %vm1466_vm14, %v1465_v23, %v1463_v24 }
 0x18b   :  { %1469 = vst [vmem:[%s2499_s13] sm:$0x1] %v1467_v28 }
 0x18c   :  { %1474 = vsyncmov [#allocation5] }
 0x18f   :  { %s1475_s16 = vpop.sfrf %1474 }
 0x190   :  { %p1731_p1 = scmp.ne.s32.totalorder %s1475_s16, 0 }
 0x192   :  { %1479 = shalt.err (%p1731_p1)  }
 0x193   :  { %1481 = vsyncmov [#allocation5 + $0x1] }
 0x196   :  { %s1482_s25 = vpop.sfrf %1481 }
 0x197   :  { %p1732_p2 = scmp.ne.s32.totalorder %s1482_s25, 0 }
 0x199   :  { %1486 = shalt.err (%p1732_p2)  }
 0x19a   :  { %1488 = vsyncmov [#allocation5 + $0x2] }
 0x19d   :  { %s1489_s10 = vpop.sfrf %1488 }
 0x19e   :  { %p1733_p3 = scmp.ne.s32.totalorder %s1489_s10, 0 }
 0x1a0   :  { %1493 = shalt.err (%p1733_p3)  }

// kernel: gcn_emb_get_loss.2
= control target key start
LH: loop header
LB: loop body
LE: loop exit
PB: predicated region body
PF: predicated region fallthrough
CT: control target
= control target key end

     0   :  { %s3089_s0 = inlined_call_operand.hbm [shape: bf16[1024,1024], index: 0, kind: input, shape index: {}]   ;;  %s3090_s1 = inlined_call_operand.hbm [shape: bf16[1024,128], index: 1, kind: input, shape index: {}]   ;;  %s3091_s2 = inlined_call_operand.hbm [shape: bf16[128,128], index: 2, kind: input, shape index: {}]   ;;  %s3092_s3 = inlined_call_operand.vmem [shape: f32[1024,128], index: 3, kind: output, shape index: {}]  }
   0x1   :  { %3100 = sst [smem:[#allocation17_spill]] %s3089_s0 }
   0x2   :  { %3101 = sst [smem:[#allocation18_spill]] %s3091_s2 }
   0x3   :  { %8 = vsyncpa [#allocation4], 0 }
   0x4   :  { %10 = vsyncpa [#allocation4 + $0x1], 0 }
   0x5   :  { %11 = vsyncpa [#allocation6], 0 }
   0x6   :  { %13 = vsyncpa [#allocation6 + $0x1], 0  ;;  %s2686_s12 = smov 0   ;;  %s2688_s13 = smov 0  }
   0x7   :  { %s2690_s14 = smov 0   ;;  %s2692_s15 = smov 0  }
   0x8   :  { %s2694_s16 = smov 0   ;;  %s2696_s17 = smov 0  }
   0x9   :  { %s2698_s18 = smov 0   ;;  %s2700_s19 = smov 0  }
   0xa   :  { %s2702_s20 = smov 0   ;;  %s2704_s21 = smov 0  }
   0xb   :  { %s2706_s22 = smov 0  }
   0xc LB: > { %3102 = sst [smem:[#allocation11_spill]] %s2637_s17  ;;  %s3093_s23 = sadd.s32 4294967295, %s2657_s22   ;;  %s2657_s22 = sphi %s2706_s22, %s19_s22   ;;  %s2653_s21 = sphi %s2704_s21, %s3124_s21   ;;  %s2649_s20 = sphi %s2702_s20, %s3131_s20   ;;  %s2645_s19 = sphi %s2700_s19, %s3122_s19   ;;  %s2641_s18 = sphi %s2698_s18, %s3130_s18   ;;  %s2637_s17 = sphi %s2696_s17, %s3121_s17   ;;  %s2633_s16 = sphi %s2694_s16, %s3129_s16   ;;  %s2629_s15 = sphi %s2692_s15, %s3128_s15   ;;  %s2625_s14 = sphi %s2690_s14, %s3127_s14   ;;  %s2621_s13 = sphi %s2688_s13, %s3126_s13   ;;  %s2617_s12 = sphi %s2686_s12, %s3125_s12  }
   0xd   : > { %3103 = sst [smem:[#allocation12_spill]] %s2641_s18  ;;  %p53_p0 = scmp.ne.s32.totalorder %s2633_s16, %s2629_s15 }
   0xe   : > { %3104 = sst [smem:[#allocation13_spill]] %s2653_s21  ;;  %p2741_p1 = scmp.eq.s32.totalorder %s3093_s23, 0 }
   0xf   : > { %p79_p2 = scmp.ne.s32.totalorder %s2621_s13, %s2617_s12  ;;  %p1785_p3 = scmp.ge.s32.totalorder %s2657_s22, 1 }
  0x10   : > { %p137_p4 = scmp.lt.s32.totalorder %s2657_s22, 9  ;;  %p2750_p5 = por %p2741_p1, %p53_p0 }
  0x11   : > { %p2756_p6 = por %p79_p2, %p2741_p1  ;;  %s3109_s2 = sld [smem:[#allocation18_spill]] }
  0x12   : > { %p2760_p7 = pnand %p1785_p3, %p137_p4  ;;  %s2659_s4 = smov [#allocation7]  }
  0x13   : > { %s150_s5 = sshll.u32 %s2659_s4, 4  ;;  %s3094_s6 = smov 64   ;;  %s151_s5 = int_to_ptr.vmem [resolvable:$true] %s150_s5 }
  0x14   : > { %p2360_p8 = pneg %p2760_p7  ;;  %s3095_s7 = smov 4  }
  0x15   : > { %s28_s8 = sadd.s32 1, %s2649_s20  ;;  %s31_s9 = sadd.s32 1, %s2653_s21 }
  0x16   : > { %p2361_p9 = pnand %p2360_p8, %p2741_p1  ;;  %p29_p10 = scmp.ge.s32.totalorder %s28_s8, 2 }
  0x17   : > { %s148_s30 = sshll.u32 %s3109_s2, 4  ;;  %s40_s10 = sadd.s32 1, %s2637_s17  ;;  %s149_s30 = int_to_ptr.hbm [resolvable:$true] %s148_s30 }
  0x18   : > { %2363 = dma.hbm_to_vmem [thread:$0]  (!%p2361_p9), %s149_s30, 1024, %s151_s5, [#allocation6], %s3094_s6, %s3094_s6, %s3095_s7  }
  0x19   : > { %p47_p11 = scmp.ne.s32.totalorder %s2637_s17, %s2633_s16  ;;  %s3133_s8 = smov (%p29_p10, %s28_s8), 0 }
  0x1a   : > { %3110 = sst [smem:[#allocation14_spill]] %s3133_s8  ;;  %s3135_s9 = smov (!%p29_p10, %s31_s9), %s2653_s21 }
  0x1b   : > { %s2784_s11 = ssub.s32 %s2649_s20, %s3133_s8  ;;  %p48_p12 = scmp.eq.s32.totalorder %s2657_s22, 0 }
  0x1c   : > { %p33_p13 = scmp.ge.s32.totalorder %s3135_s9, 4  ;;  %p64_p0 = scmp.eq.s32.totalorder %s2784_s11, 0 }
  0x1d   : > { %p2790_p2 = por %p48_p12, %p47_p11  ;;  %p2372_p3 = scmp.lt.s32.totalorder %s2657_s22, 8 }
  0x1e   : > { %s3137_s9 = smov (%p33_p13, %s3135_s9), 0  ;;  %s164_s15 = sand.u32 1, %s2637_s17  }
  0x1f   : > { %3112 = sst [smem:[#allocation15_spill]] %s3137_s9  ;;  %s1790_s28 = sshll.u32 %s2649_s20, 2 }
  0x20   : > { %s35_s29 = ssub.s32 %s2653_s21, %s3137_s9  ;;  %s1788_s4 = sshll.u32 %s164_s15, 9 }
  0x21   : > { %s37_s30 = sor.u32 %s2784_s11, %s35_s29  ;;  %s2222_s5 = sshll.u32 %s2653_s21, 8 }
  0x22   : > { %p38_p4 = scmp.eq.s32.totalorder %s37_s30, 0  ;;  %s168_s23 = scalar_lea.vmem [#allocation3], %s1788_s4 }
  0x23   : > { %s179_s6 = sshll.u32 %s168_s23, 4  ;;  %s174_s2 = sadd.s32 %s2222_s5, %s1790_s28  ;;  %s180_s6 = int_to_ptr.vmem [resolvable:$true] %s179_s6 }
  0x24   : > { %s2804_s7 = scalar_select %p38_p4, %s2637_s17, %s40_s10  }
  0x25   : > { %s1792_s8 = sshll.u32 %s174_s2, 2  ;;  %p2365_p8 = pnand %p2372_p3, %p2790_p2 }
  0x26   : > { %3113 = sst [smem:[#allocation16_spill]] %s2804_s7  ;;  %s165_s9 = scalar_lea.sflag [#allocation4], %s164_s15 }
  0x27   : > { %s3114_s0 = sld [smem:[#allocation17_spill]]  ;;  %s2662_s10 = smov 512  }
  0x28   : > { %s2663_s21 = smov 256   ;;  %s2664_s7 = smov 16  }
  0x29   : > { %s189_s28 = sand.u32 1, %s2657_s22   ;;  %s66_s5 = sadd.s32 1, %s2625_s14 }
  0x2a   : > { %p73_p9 = scmp.ne.s32.totalorder %s2625_s14, %s2621_s13  ;;  %s191_s12 = sand.u32 1, %s2625_s14  }
  0x2b   : > { %s2820_s2 = scalar_select %p64_p0, %s2625_s14, %s66_s5  }
  0x2c   : > { %p75_p10 = por %p73_p9, %p48_p12  ;;  %s2223_s17 = sshll.u32 %s2649_s20, 8 }
  0x2d   : > { %s176_s4 = scalar_lea.hbm %s3114_s0, %s1792_s8  ;;  %s1793_s29 = sshll.u32 %s191_s12, 8 }
  0x2e   : > { %s177_s23 = sshll.u32 %s176_s4, 4  ;;  %s198_s15 = scalar_lea.hbm %s3090_s1, %s2223_s17  ;;  %s178_s23 = int_to_ptr.hbm [resolvable:$true] %s177_s23 }
  0x2f   : > { %2367 = dma.hbm_to_vmem [thread:$0]  (!%p2365_p8), %s178_s23, 8192, %s180_s6, %s165_s9, %s2662_s10, %s2663_s21, %s2664_s7  }
  0x30   : > { %s199_s4 = sshll.u32 %s198_s15, 4  ;;  %s193_s0 = scalar_lea.vmem [#allocation5], %s1793_s29  ;;  %s200_s4 = int_to_ptr.hbm [resolvable:$true] %s199_s4 }
  0x31   : > { %s201_s18 = sshll.u32 %s193_s0, 4  ;;  %p2368_p11 = pnand %p2372_p3, %p75_p10  ;;  %s202_s18 = int_to_ptr.vmem [resolvable:$true] %s201_s18 }
  0x32   : > { %s190_s21 = scalar_lea.sflag [#allocation6], %s189_s28  ;;  %s3115_s6 = smov 4  }
  0x33   : > { %s3116_s7 = smov 64   ;;  %213 = sbr.rel (%p2760_p7) target bundleno = 755 (0x2f3), region = 32 }
  0x34   : > { %2370 = dma.hbm_to_vmem [thread:$0]  (!%p2368_p11), %s200_s4, 4096, %s202_s18, %s190_s21, %s3116_s7, %s3116_s7, %s3115_s6  }
  0x35   : > { %s215_s9 = sand.u32 (!%p2760_p7), 1, %s2633_s16  }
  0x36   : > { %s1797_s11 = sshll.u32 (!%p2760_p7), %s215_s9, 9  ;;  %s216_s17 = scalar_lea.sflag (!%p2760_p7), [#allocation4], %s215_s9 }
  0x37   : > { %s2837_s23 = scalar_lea.vmem (!%p2760_p7), [#allocation3], %s1797_s11 }
  0x38   : > { %2604 = dma.done.wait (%p2750_p5), %s216_s17, 8192  }
  0x39   : > { %2606 = vsyncadd (%p2750_p5), %s216_s17, 4294959104  ;;  %s3117_s0 = sadd.s32 4294967295, %s2657_s22   ;;  %s227_s10 = sand.u32 1, %s2621_s13  }
  0x3a   : > { %s225_s18 = sand.u32 1, %s3117_s0   ;;  %s1798_s27 = sshll.u32 %s227_s10, 8 }
  0x3b   : > { %s226_s28 = scalar_lea.sflag [#allocation6], %s225_s18  ;;  %s2846_s5 = scalar_lea.vmem [#allocation5], %s1798_s27 }
  0x3c   : > { %2608 = dma.done.wait (%p2756_p6), %s226_s28, 4096  }
  0x3d   : > { %2610 = vsyncadd (%p2756_p6), %s226_s28, 4294963200 }
  0x3e   : > { %2612 = dma.done.wait (%p2741_p1), [#allocation6], 1024  }
  0x3f   : > { %2614 = vsyncadd (%p2741_p1), [#allocation6], 4294966272  ;;  %s1800_s25 = sshll.u32 %s2645_s19, 5  ;;  %s3118_s15 = sld [smem:[#allocation12_spill]] }
  0x40   : > { %p267_p5 = scmp.lt.s32.totalorder %s1800_s25, 127 }
  0x42   : > { %s3139_s25 = smov (!%p267_p5, %s1800_s25), 127 }
  0x43   : > { %s1801_s12 = sshll.u32 %s3139_s25, 3 }
  0x44   : > { %s2860_s30 = scalar_lea.vmem %s3092_s3, %s1801_s12 }
  0x45   : > { %p1802_p7 = scmp.ne.s32.totalorder %s3118_s15, 0 }
  0x47   : > { %275 = sbr.rel (%p1802_p7) target bundleno = 109 (0x6d), region = 48 }
  0x4c   : > { %v2665_v0 = vmov 0.0  }
  0x4d   : > { %276 = vst [vmem:[#allocation2 + $0xb0] sm:$0xff] %v2665_v0 }
  0x4e   : > { %277 = vst [vmem:[#allocation2] sm:$0xff] %v2665_v0 }
  0x4f   : > { %278 = vst [vmem:[#allocation2 + $0xd8] sm:$0xff] %v2665_v0 }
  0x50   : > { %279 = vst [vmem:[#allocation2 + $0x18] sm:$0xff] %v2665_v0 }
  0x51   : > { %280 = vst [vmem:[#allocation2 + $0x50] sm:$0xff] %v2665_v0 }
  0x52   : > { %281 = vst [vmem:[#allocation2 + $0x68] sm:$0xff] %v2665_v0 }
  0x53   : > { %282 = vst [vmem:[#allocation2 + $0x30] sm:$0xff] %v2665_v0 }
  0x54   : > { %283 = vst [vmem:[#allocation2 + $0x48] sm:$0xff] %v2665_v0 }
  0x55   : > { %284 = vst [vmem:[#allocation2 + $0x80] sm:$0xff] %v2665_v0 }
  0x56   : > { %285 = vst [vmem:[#allocation2 + $0x88] sm:$0xff] %v2665_v0 }
  0x57   : > { %286 = vst [vmem:[#allocation2 + $0xe8] sm:$0xff] %v2665_v0 }
  0x58   : > { %287 = vst [vmem:[#allocation2 + $0xb8] sm:$0xff] %v2665_v0 }
  0x59   : > { %288 = vst [vmem:[#allocation2 + $0x60] sm:$0xff] %v2665_v0 }
  0x5a   : > { %289 = vst [vmem:[#allocation2 + $0xf0] sm:$0xff] %v2665_v0 }
  0x5b   : > { %290 = vst [vmem:[#allocation2 + $0x8] sm:$0xff] %v2665_v0 }
  0x5c   : > { %291 = vst [vmem:[#allocation2 + $0x78] sm:$0xff] %v2665_v0 }
  0x5d   : > { %292 = vst [vmem:[#allocation2 + $0x38] sm:$0xff] %v2665_v0 }
  0x5e   : > { %293 = vst [vmem:[#allocation2 + $0x58] sm:$0xff] %v2665_v0 }
  0x5f   : > { %294 = vst [vmem:[#allocation2 + $0x40] sm:$0xff] %v2665_v0 }
  0x60   : > { %295 = vst [vmem:[#allocation2 + $0xc8] sm:$0xff] %v2665_v0 }
  0x61   : > { %296 = vst [vmem:[#allocation2 + $0xe0] sm:$0xff] %v2665_v0 }
  0x62   : > { %297 = vst [vmem:[#allocation2 + $0x90] sm:$0xff] %v2665_v0 }
  0x63   : > { %298 = vst [vmem:[#allocation2 + $0x70] sm:$0xff] %v2665_v0 }
  0x64   : > { %299 = vst [vmem:[#allocation2 + $0xc0] sm:$0xff] %v2665_v0 }
  0x65   : > { %300 = vst [vmem:[#allocation2 + $0xa8] sm:$0xff] %v2665_v0 }
  0x66   : > { %301 = vst [vmem:[#allocation2 + $0xd0] sm:$0xff] %v2665_v0 }
  0x67   : > { %302 = vst [vmem:[#allocation2 + $0x10] sm:$0xff] %v2665_v0 }
  0x68   : > { %303 = vst [vmem:[#allocation2 + $0x28] sm:$0xff] %v2665_v0 }
  0x69   : > { %304 = vst [vmem:[#allocation2 + $0xa0] sm:$0xff] %v2665_v0 }
  0x6a   : > { %305 = vst [vmem:[#allocation2 + $0xf8] sm:$0xff] %v2665_v0 }
  0x6b   : > { %306 = vst [vmem:[#allocation2 + $0x20] sm:$0xff] %v2665_v0 }
  0x6c   : > { %307 = vst [vmem:[#allocation2 + $0x98] sm:$0xff] %v2665_v0 }
  0x6d PF: > { %v2295_v1 = vld [vmem:[%s2846_s5 + $0x38] sm:$0xff]  ;;  %v2294_v5 = vld [vmem:[%s2846_s5 + $0x30] sm:$0xff]  ;;  %v2293_v9 = vld [vmem:[%s2846_s5 + $0x28] sm:$0xff]  ;;  %s3119_s19 = sld [smem:[#allocation12_spill]] }
  0x6e   : > { %v2303_v2 = vld [vmem:[%s2846_s5 + $0x78] sm:$0xff]  ;;  %980 = vmatpush.bf16.msra.mxu0 %v2295_v1  ;;  %v2302_v6 = vld [vmem:[%s2846_s5 + $0x70] sm:$0xff]  ;;  %v2301_v10 = vld [vmem:[%s2846_s5 + $0x68] sm:$0xff] }
  0x6f   : > { %v2311_v3 = vld [vmem:[%s2846_s5 + $0xb8] sm:$0xff]  ;;  %1069 = vmatpush.bf16.msra.mxu1 %v2303_v2  ;;  %v2310_v7 = vld [vmem:[%s2846_s5 + $0xb0] sm:$0xff]  ;;  %v2309_v11 = vld [vmem:[%s2846_s5 + $0xa8] sm:$0xff] }
  0x70   : > { %v2319_v4 = vld [vmem:[%s2846_s5 + $0xf8] sm:$0xff]  ;;  %1158 = vmatpush.bf16.msra.mxu2 %v2311_v3  ;;  %v2318_v8 = vld [vmem:[%s2846_s5 + $0xf0] sm:$0xff]  ;;  %v2317_v12 = vld [vmem:[%s2846_s5 + $0xe8] sm:$0xff] }
  0x71   : > { %1247 = vmatpush.bf16.msra.mxu3 %v2319_v4  ;;  %v2292_v13 = vld [vmem:[%s2846_s5 + $0x20] sm:$0xff]  ;;  %v2291_v17 = vld [vmem:[%s2846_s5 + $0x18] sm:$0xff]  ;;  %v2290_v21 = vld [vmem:[%s2846_s5 + $0x10] sm:$0xff] }
  0x72   : > { %981 = vmatpush.bf16.msra.mxu0 %v2294_v5  ;;  %v2300_v14 = vld [vmem:[%s2846_s5 + $0x60] sm:$0xff]  ;;  %v2299_v18 = vld [vmem:[%s2846_s5 + $0x58] sm:$0xff]  ;;  %v2298_v22 = vld [vmem:[%s2846_s5 + $0x50] sm:$0xff] }
  0x73   : > { %1070 = vmatpush.bf16.msra.mxu1 %v2302_v6  ;;  %v2308_v15 = vld [vmem:[%s2846_s5 + $0xa0] sm:$0xff]  ;;  %v2307_v19 = vld [vmem:[%s2846_s5 + $0x98] sm:$0xff]  ;;  %v2306_v23 = vld [vmem:[%s2846_s5 + $0x90] sm:$0xff]  ;;  %p2187_p1 = scmp.ne.s32.totalorder %s3119_s19, 1 }
  0x74   : > { %1159 = vmatpush.bf16.msra.mxu2 %v2310_v7  ;;  %v2316_v16 = vld [vmem:[%s2846_s5 + $0xe0] sm:$0xff]  ;;  %v2315_v20 = vld [vmem:[%s2846_s5 + $0xd8] sm:$0xff]  ;;  %v2314_v24 = vld [vmem:[%s2846_s5 + $0xd0] sm:$0xff] }
  0x75   : > { %1248 = vmatpush.bf16.msra.mxu3 %v2318_v8  ;;  %v2289_v25 = vld [vmem:[%s2846_s5 + $0x8] sm:$0xff]  ;;  %v2288_v29 = vld [vmem:[%s2846_s5] sm:$0xff]  ;;  %v2226_v34 = vld [vmem:[%s2837_s23 + $0xc] sm:$0xf0] }
  0x76   : > { %982 = vmatpush.bf16.msra.mxu0 %v2293_v9  ;;  %v2297_v26 = vld [vmem:[%s2846_s5 + $0x48] sm:$0xff]  ;;  %v2296_v30 = vld [vmem:[%s2846_s5 + $0x40] sm:$0xff]  ;;  %v1807_v36 = vld [vmem:[%s2837_s23 + $0x10] sm:$0xf0] }
  0x77   : > { %1071 = vmatpush.bf16.msra.mxu1 %v2301_v10  ;;  %v2305_v27 = vld [vmem:[%s2846_s5 + $0x88] sm:$0xff]  ;;  %v2304_v31 = vld [vmem:[%s2846_s5 + $0x80] sm:$0xff]  ;;  %v2227_v38 = vld [vmem:[%s2837_s23 + $0x14] sm:$0xf0] }
  0x78   : > { %1160 = vmatpush.bf16.msra.mxu2 %v2309_v11  ;;  %v2313_v28 = vld [vmem:[%s2846_s5 + $0xc8] sm:$0xff]  ;;  %v2312_v32 = vld [vmem:[%s2846_s5 + $0xc0] sm:$0xff]  ;;  %v1815_v40 = vld [vmem:[%s2837_s23 + $0x18] sm:$0xf0] }
  0x79   : > { %1249 = vmatpush.bf16.msra.mxu3 %v2317_v12  ;;  %v1805_v33 = vld [vmem:[%s2837_s23] sm:$0xf]  ;;  %v2224_v35 = vld [vmem:[%s2837_s23 + $0x4] sm:$0xf]  ;;  %v1813_v37 = vld [vmem:[%s2837_s23 + $0x8] sm:$0xf] }
  0x7a   : > { %983 = vmatpush.bf16.msra.mxu0 %v2292_v13  ;;  %v2225_v39 = vld [vmem:[%s2837_s23 + $0xc] sm:$0xf]  ;;  %v1806_v41 = vor.u32 %v2226_v34, %v1805_v33  ;;  %v1810_v42 = vor.u32 %v2224_v35, %v1807_v36  ;;  %v1814_v43 = vor.u32 %v2227_v38, %v1813_v37  ;;  %v1821_v45 = vld [vmem:[%s2837_s23 + $0x20] sm:$0xf]  ;;  %v2230_v46 = vld [vmem:[%s2837_s23 + $0x2c] sm:$0xf0] }
  0x7b   : > { %1072 = vmatpush.bf16.msra.mxu1 %v2300_v14  ;;  %v1818_v44 = vor.u32 %v2225_v39, %v1815_v40  ;;  %v2228_v47 = vld [vmem:[%s2837_s23 + $0x24] sm:$0xf]  ;;  %v1823_v48 = vld [vmem:[%s2837_s23 + $0x30] sm:$0xf0]  ;;  %v1829_v49 = vld [vmem:[%s2837_s23 + $0x28] sm:$0xf]  ;;  %v1822_v53 = vor.u32 %v2230_v46, %v1821_v45 }
  0x7c   : > { %1161 = vmatpush.bf16.msra.mxu2 %v2308_v15  ;;  %v2231_v50 = vld [vmem:[%s2837_s23 + $0x34] sm:$0xf0]  ;;  %v2229_v51 = vld [vmem:[%s2837_s23 + $0x2c] sm:$0xf]  ;;  %v1831_v52 = vld [vmem:[%s2837_s23 + $0x38] sm:$0xf0]  ;;  %v1826_v54 = vor.u32 %v2228_v47, %v1823_v48 }
  0x7d   : > { %1250 = vmatpush.bf16.msra.mxu3 %v2316_v16  ;;  %v1830_v55 = vor.u32 %v2231_v50, %v1829_v49  ;;  %v1834_v56 = vor.u32 %v2229_v51, %v1831_v52  ;;  %v1837_v57 = vld [vmem:[%s2837_s23 + $0x40] sm:$0xf]  ;;  %v2234_v58 = vld [vmem:[%s2837_s23 + $0x4c] sm:$0xf0]  ;;  %v2232_v59 = vld [vmem:[%s2837_s23 + $0x44] sm:$0xf] }
  0x7e   : > { %984 = vmatpush.bf16.msra.mxu0 %v2291_v17  ;;  %v1839_v60 = vld [vmem:[%s2837_s23 + $0x50] sm:$0xf0]  ;;  %v1845_v61 = vld [vmem:[%s2837_s23 + $0x48] sm:$0xf]  ;;  %v2235_v62 = vld [vmem:[%s2837_s23 + $0x54] sm:$0xf0]  ;;  %v1838_v1 = vor.u32 %v2234_v58, %v1837_v57 }
  0x7f   : > { %1073 = vmatpush.bf16.msra.mxu1 %v2299_v18  ;;  %v2233_v63 = vld [vmem:[%s2837_s23 + $0x4c] sm:$0xf]  ;;  %v1847_v0 = vld [vmem:[%s2837_s23 + $0x58] sm:$0xf0]  ;;  %v1842_v2 = vor.u32 %v2232_v59, %v1839_v60  ;;  %v1846_v3 = vor.u32 %v2235_v62, %v1845_v61  ;;  %v1853_v5 = vld [vmem:[%s2837_s23 + $0x60] sm:$0xf] }
  0x80   : > { %1162 = vmatpush.bf16.msra.mxu2 %v2307_v19  ;;  %v1850_v4 = vor.u32 %v2233_v63, %v1847_v0  ;;  %v2238_v6 = vld [vmem:[%s2837_s23 + $0x6c] sm:$0xf0]  ;;  %v2236_v7 = vld [vmem:[%s2837_s23 + $0x64] sm:$0xf]  ;;  %v1855_v8 = vld [vmem:[%s2837_s23 + $0x70] sm:$0xf0] }
  0x81   : > { %1251 = vmatpush.bf16.msra.mxu3 %v2315_v20  ;;  %v1861_v9 = vld [vmem:[%s2837_s23 + $0x68] sm:$0xf]  ;;  %v2239_v10 = vld [vmem:[%s2837_s23 + $0x74] sm:$0xf0]  ;;  %v2237_v11 = vld [vmem:[%s2837_s23 + $0x6c] sm:$0xf]  ;;  %v1854_v13 = vor.u32 %v2238_v6, %v1853_v5  ;;  %v1858_v14 = vor.u32 %v2236_v7, %v1855_v8 }
  0x82   : > { %985 = vmatpush.bf16.msra.mxu0 %v2290_v21  ;;  %v1863_v12 = vld [vmem:[%s2837_s23 + $0x78] sm:$0xf0]  ;;  %v1862_v15 = vor.u32 %v2239_v10, %v1861_v9  ;;  %v1869_v17 = vld [vmem:[%s2837_s23 + $0x80] sm:$0xf]  ;;  %v2242_v18 = vld [vmem:[%s2837_s23 + $0x8c] sm:$0xf0] }
  0x83   : > { %1074 = vmatpush.bf16.msra.mxu1 %v2298_v22  ;;  %v1866_v16 = vor.u32 %v2237_v11, %v1863_v12  ;;  %v2240_v19 = vld [vmem:[%s2837_s23 + $0x84] sm:$0xf]  ;;  %v1871_v20 = vld [vmem:[%s2837_s23 + $0x90] sm:$0xf0]  ;;  %v1877_v21 = vld [vmem:[%s2837_s23 + $0x88] sm:$0xf] }
  0x84   : > { %1163 = vmatpush.bf16.msra.mxu2 %v2306_v23  ;;  %v2243_v22 = vld [vmem:[%s2837_s23 + $0x94] sm:$0xf0]  ;;  %v2241_v23 = vld [vmem:[%s2837_s23 + $0x8c] sm:$0xf]  ;;  %v1893_v33 = vld [vmem:[%s2837_s23 + $0xa8] sm:$0xf] }
  0x85   : > { %1252 = vmatpush.bf16.msra.mxu3 %v2314_v24  ;;  %v1879_v24 = vld [vmem:[%s2837_s23 + $0x98] sm:$0xf0]  ;;  %v2247_v34 = vld [vmem:[%s2837_s23 + $0xb4] sm:$0xf0]  ;;  %v2245_v35 = vld [vmem:[%s2837_s23 + $0xac] sm:$0xf] }
  0x86   : > { %986 = vmatpush.bf16.msra.mxu0 %v2289_v25  ;;  %v1870_v25 = vor.u32 %v2242_v18, %v1869_v17  ;;  %v1895_v36 = vld [vmem:[%s2837_s23 + $0xb8] sm:$0xf0]  ;;  %v1894_v39 = vor.u32 %v2247_v34, %v1893_v33  ;;  %v1909_v45 = vld [vmem:[%s2837_s23 + $0xc8] sm:$0xf]  ;;  %v2251_v46 = vld [vmem:[%s2837_s23 + $0xd4] sm:$0xf0] }
  0x87   : > { %1075 = vmatpush.bf16.msra.mxu1 %v2297_v26  ;;  %v1874_v26 = vor.u32 %v2240_v19, %v1871_v20  ;;  %v1898_v40 = vor.u32 %v2245_v35, %v1895_v36  ;;  %v2249_v47 = vld [vmem:[%s2837_s23 + $0xcc] sm:$0xf]  ;;  %v1911_v48 = vld [vmem:[%s2837_s23 + $0xd8] sm:$0xf0]  ;;  %v1910_v51 = vor.u32 %v2251_v46, %v1909_v45  ;;  %v1925_v57 = vld [vmem:[%s2837_s23 + $0xe8] sm:$0xf] }
  0x88   : > { %1164 = vmatpush.bf16.msra.mxu2 %v2305_v27  ;;  %v1878_v27 = vor.u32 %v2243_v22, %v1877_v21  ;;  %v1914_v52 = vor.u32 %v2249_v47, %v1911_v48  ;;  %v2255_v58 = vld [vmem:[%s2837_s23 + $0xf4] sm:$0xf0]  ;;  %v2253_v59 = vld [vmem:[%s2837_s23 + $0xec] sm:$0xf]  ;;  %v1927_v60 = vld [vmem:[%s2837_s23 + $0xf8] sm:$0xf0] }
  0x89   : > { %1253 = vmatpush.bf16.msra.mxu3 %v2313_v28  ;;  %v1882_v28 = vor.u32 %v2241_v23, %v1879_v24  ;;  %v1926_v63 = vor.u32 %v2255_v58, %v1925_v57  ;;  %v1930_v0 = vor.u32 %v2253_v59, %v1927_v60  ;;  %v1941_v5 = vld [vmem:[%s2837_s23 + $0x108] sm:$0xf]  ;;  %v2259_v6 = vld [vmem:[%s2837_s23 + $0x114] sm:$0xf0]  ;;  %v2257_v7 = vld [vmem:[%s2837_s23 + $0x10c] sm:$0xf] }
  0x8a   : > { %987 = vmatpush.bf16.msra.mxu0 %v2288_v29  ;;  %v1885_v29 = vld [vmem:[%s2837_s23 + $0xa0] sm:$0xf]  ;;  %v1943_v8 = vld [vmem:[%s2837_s23 + $0x118] sm:$0xf0]  ;;  %v308_v21 = vld [vmem:[#allocation2 + $0xb0] sm:$0xff] }
  0x8b   : > { %1076 = vmatpush.bf16.msra.mxu1 %v2296_v30  ;;  %v2246_v30 = vld [vmem:[%s2837_s23 + $0xac] sm:$0xf0]  ;;  %v1949_v23 = vld [vmem:[%s2837_s23 + $0x120] sm:$0xf]  ;;  %v1967_v57 = vld [vmem:[%s2837_s23 + $0x150] sm:$0xf0] }
  0x8c   : > { %1165 = vmatpush.bf16.msra.mxu2 %v2304_v31  ;;  %v2244_v31 = vld [vmem:[%s2837_s23 + $0xa4] sm:$0xf]  ;;  %v1886_v37 = vor.u32 %v2246_v30, %v1885_v29  ;;  %v2262_v24 = vld [vmem:[%s2837_s23 + $0x12c] sm:$0xf0]  ;;  %v2263_v29 = vld [vmem:[%s2837_s23 + $0x134] sm:$0xf0] }
  0x8d   : > { %1254 = vmatpush.bf16.msra.mxu3 %v2312_v32  ;;  %988 = vmatmul.bf16.vlgmr.msra.gmra.mxu0 %v1806_v41  ;;  %v1887_v32 = vld [vmem:[%s2837_s23 + $0xb0] sm:$0xf0]  ;;  %v1901_v41 = vld [vmem:[%s2837_s23 + $0xc0] sm:$0xf]  ;;  %v2261_v30 = vld [vmem:[%s2837_s23 + $0x12c] sm:$0xf]  ;;  %v1950_v35 = vor.u32 %v2262_v24, %v1949_v23 }
  0x8e   : > { %1077 = vmatmul.bf16.vlgmr.msra.gmra.mxu1 %v1810_v42  ;;  %v1890_v38 = vor.u32 %v2244_v31, %v1887_v32  ;;  %v2250_v42 = vld [vmem:[%s2837_s23 + $0xcc] sm:$0xf0]  ;;  %v1959_v31 = vld [vmem:[%s2837_s23 + $0x138] sm:$0xf0]  ;;  %v1973_v58 = vld [vmem:[%s2837_s23 + $0x148] sm:$0xf] }
  0x8f   : > { %1166 = vmatmul.bf16.vlgmr.msra.gmra.mxu2 %v1814_v43  ;;  %v2248_v43 = vld [vmem:[%s2837_s23 + $0xc4] sm:$0xf]  ;;  %v1902_v49 = vor.u32 %v2250_v42, %v1901_v41  ;;  %v1962_v41 = vor.u32 %v2261_v30, %v1959_v31  ;;  %v2267_v59 = vld [vmem:[%s2837_s23 + $0x154] sm:$0xf0]  ;;  %v2265_v60 = vld [vmem:[%s2837_s23 + $0x14c] sm:$0xf] }
  0x90   : > { %1255 = vmatmul.bf16.vlgmr.msra.gmra.mxu3 %v1818_v44  ;;  %v1903_v44 = vld [vmem:[%s2837_s23 + $0xd0] sm:$0xf0]  ;;  %v309_v42 = vld [vmem:[#allocation2] sm:$0xff]  ;;  %v1989_v24 = vld [vmem:[%s2837_s23 + $0x168] sm:$0xf] }
  0x91   : > { %v1906_v50 = vor.u32 %v2248_v43, %v1903_v44  ;;  %v1983_v23 = vld [vmem:[%s2837_s23 + $0x170] sm:$0xf0] }
  0x9d   : > { %993 = vmatmul.bf16.gmra.mxu0 %v1822_v53  ;;  %v1917_v53 = vld [vmem:[%s2837_s23 + $0xe0] sm:$0xf] }
  0x9e   : > { %1082 = vmatmul.bf16.gmra.mxu1 %v1826_v54  ;;  %v2254_v54 = vld [vmem:[%s2837_s23 + $0xec] sm:$0xf0] }
  0x9f   : > { %1171 = vmatmul.bf16.gmra.mxu2 %v1830_v55  ;;  %v2252_v55 = vld [vmem:[%s2837_s23 + $0xe4] sm:$0xf]  ;;  %v1918_v61 = vor.u32 %v2254_v54, %v1917_v53  ;;  %v1965_v53 = vld [vmem:[%s2837_s23 + $0x140] sm:$0xf]  ;;  %v2266_v54 = vld [vmem:[%s2837_s23 + $0x14c] sm:$0xf0] }
  0xa0   : > { %1260 = vmatmul.bf16.gmra.mxu3 %v1834_v56  ;;  %v1919_v56 = vld [vmem:[%s2837_s23 + $0xf0] sm:$0xf0] }
  0xa1   : > { %v1922_v62 = vor.u32 %v2252_v55, %v1919_v56  ;;  %v2264_v56 = vld [vmem:[%s2837_s23 + $0x144] sm:$0xf] }
  0xad   : > { %998 = vmatmul.bf16.gmra.mxu0 %v1838_v1  ;;  %v1933_v1 = vld [vmem:[%s2837_s23 + $0x100] sm:$0xf] }
  0xae   : > { %1087 = vmatmul.bf16.gmra.mxu1 %v1842_v2  ;;  %v2258_v2 = vld [vmem:[%s2837_s23 + $0x10c] sm:$0xf0] }
  0xaf   : > { %1176 = vmatmul.bf16.gmra.mxu2 %v1846_v3  ;;  %v2256_v3 = vld [vmem:[%s2837_s23 + $0x104] sm:$0xf]  ;;  %v1934_v9 = vor.u32 %v2258_v2, %v1933_v1  ;;  %v1966_v1 = vor.u32 %v2266_v54, %v1965_v53  ;;  %v1970_v2 = vor.u32 %v2264_v56, %v1967_v57  ;;  %v1999_v53 = vld [vmem:[%s2837_s23 + $0x190] sm:$0xf0]  ;;  %v2005_v54 = vld [vmem:[%s2837_s23 + $0x188] sm:$0xf] }
  0xb0   : > { %1265 = vmatmul.bf16.gmra.mxu3 %v1850_v4  ;;  %v1935_v4 = vld [vmem:[%s2837_s23 + $0x110] sm:$0xf0]  ;;  %v2273_v56 = vld [vmem:[%s2837_s23 + $0x18c] sm:$0xf]  ;;  %v2007_v57 = vld [vmem:[%s2837_s23 + $0x198] sm:$0xf0] }
  0xb1   : > { %v1938_v10 = vor.u32 %v2256_v3, %v1935_v4 }
  0xbd   : > { %1003 = vmatmul.bf16.gmra.mxu0 %v1854_v13  ;;  %v1942_v13 = vor.u32 %v2259_v6, %v1941_v5  ;;  %v1974_v6 = vor.u32 %v2267_v59, %v1973_v58 }
  0xbe   : > { %1092 = vmatmul.bf16.gmra.mxu1 %v1858_v14  ;;  %v1946_v14 = vor.u32 %v2257_v7, %v1943_v8  ;;  %v311_v8 = vld [vmem:[#allocation2 + $0x18] sm:$0xff] }
  0xbf   : > { %1181 = vmatmul.bf16.gmra.mxu2 %v1862_v15 }
  0xc0   : > { %1270 = vmatmul.bf16.gmra.mxu3 %v1866_v16 }
  0xcd   : > { %1008 = vmatmul.bf16.gmra.mxu0 %v1870_v25 }
  0xce   : > { %1097 = vmatmul.bf16.gmra.mxu1 %v1874_v26  ;;  %v2260_v26 = vld [vmem:[%s2837_s23 + $0x124] sm:$0xf] }
  0xcf   : > { %1186 = vmatmul.bf16.gmra.mxu2 %v1878_v27  ;;  %v1951_v27 = vld [vmem:[%s2837_s23 + $0x130] sm:$0xf0] }
  0xd0   : > { %1275 = vmatmul.bf16.gmra.mxu3 %v1882_v28  ;;  %v1957_v28 = vld [vmem:[%s2837_s23 + $0x128] sm:$0xf]  ;;  %v1954_v36 = vor.u32 %v2260_v26, %v1951_v27  ;;  %v2269_v26 = vld [vmem:[%s2837_s23 + $0x16c] sm:$0xf]  ;;  %v1991_v27 = vld [vmem:[%s2837_s23 + $0x178] sm:$0xf0] }
  0xdd   : > { %1013 = vmatmul.bf16.gmra.mxu0 %v1886_v37 }
  0xde   : > { %1102 = vmatmul.bf16.gmra.mxu1 %v1890_v38 }
  0xdf   : > { %1191 = vmatmul.bf16.gmra.mxu2 %v1894_v39 }
  0xe0   : > { %1280 = vmatmul.bf16.gmra.mxu3 %v1898_v40  ;;  %v1958_v40 = vor.u32 %v2263_v29, %v1957_v28 }
  0xed   : > { %1018 = vmatmul.bf16.gmra.mxu0 %v1902_v49 }
  0xee   : > { %1107 = vmatmul.bf16.gmra.mxu1 %v1906_v50 }
  0xef   : > { %1196 = vmatmul.bf16.gmra.mxu2 %v1910_v51  ;;  %v310_v51 = vld [vmem:[#allocation2 + $0xd8] sm:$0xff] }
  0xf0   : > { %1285 = vmatmul.bf16.gmra.mxu3 %v1914_v52 }
  0xfd   : > { %1023 = vmatmul.bf16.gmra.mxu0 %v1918_v61  ;;  %v1975_v61 = vld [vmem:[%s2837_s23 + $0x158] sm:$0xf0] }
  0xfe   : > { %1112 = vmatmul.bf16.gmra.mxu1 %v1922_v62  ;;  %v1978_v7 = vor.u32 %v2265_v60, %v1975_v61 }
  0xff   : > { %1201 = vmatmul.bf16.gmra.mxu2 %v1926_v63 }
 0x100   : > { %1290 = vmatmul.bf16.gmra.mxu3 %v1930_v0 }
 0x10a   : > { %v989_v11 = vpop.f32.mrf.mxu0 }
 0x10b   : > { %v1078_v12 = vpop.f32.mrf.mxu1 }
 0x10c   : > { %v1079_v15 = vadd.f32 %v1078_v12, %v989_v11 }
 0x10d   : > { %1028 = vmatmul.bf16.gmra.mxu0 %v1934_v9 }
 0x10e   : > { %1117 = vmatmul.bf16.gmra.mxu1 %v1938_v10 }
 0x10f   : > { %1206 = vmatmul.bf16.gmra.mxu2 %v1942_v13 }
 0x110   : > { %1295 = vmatmul.bf16.gmra.mxu3 %v1946_v14 }
 0x112   : > { %v1167_v16 = vpop.f32.mrf.mxu2  ;;  %v991_v19 = vpop.f32.mrf.mxu0 }
 0x113   : > { %v1256_v17 = vpop.f32.mrf.mxu3  ;;  %v1168_v18 = vadd.f32 %v1167_v16, %v1079_v15  ;;  %v1080_v20 = vpop.f32.mrf.mxu1 }
 0x114   : > { %v1081_v32 = vadd.f32 %v1080_v20, %v991_v19  ;;  %v1981_v19 = vld [vmem:[%s2837_s23 + $0x160] sm:$0xf]  ;;  %v2270_v20 = vld [vmem:[%s2837_s23 + $0x16c] sm:$0xf0] }
 0x115   : > { %v1257_v22 = vadd.f32 %v1256_v17, %v1168_v18  ;;  %v312_v17 = vld [vmem:[#allocation2 + $0x50] sm:$0xff]  ;;  %v1982_v31 = vor.u32 %v2270_v20, %v1981_v19  ;;  %v2021_v20 = vld [vmem:[%s2837_s23 + $0x1a8] sm:$0xf] }
 0x116   : > { %v2015_v19 = vld [vmem:[%s2837_s23 + $0x1b0] sm:$0xf0] }
 0x117   : > { %v1336_v25 = vadd.f32 %v1257_v22, %v308_v21  ;;  %v2268_v22 = vld [vmem:[%s2837_s23 + $0x164] sm:$0xf] }
 0x119   : > { %1368 = vst [vmem:[#allocation2 + $0xb0] sm:$0xff] %v1336_v25  ;;  %v2271_v25 = vld [vmem:[%s2837_s23 + $0x174] sm:$0xf0] }
 0x11a   : > { %v1169_v33 = vpop.f32.mrf.mxu2  ;;  %v994_v38 = vpop.f32.mrf.mxu0 }
 0x11b   : > { %v1258_v34 = vpop.f32.mrf.mxu3  ;;  %v1170_v37 = vadd.f32 %v1169_v33, %v1081_v32  ;;  %v1083_v39 = vpop.f32.mrf.mxu1  ;;  %v1986_v32 = vor.u32 %v2268_v22, %v1983_v23  ;;  %v2277_v22 = vld [vmem:[%s2837_s23 + $0x1ac] sm:$0xf]  ;;  %v2023_v23 = vld [vmem:[%s2837_s23 + $0x1b8] sm:$0xf0] }
 0x11c   : > { %v1084_v45 = vadd.f32 %v1083_v39, %v994_v38  ;;  %v313_v38 = vld [vmem:[#allocation2 + $0x68] sm:$0xff] }
 0x11d   : > { %v1259_v43 = vadd.f32 %v1258_v34, %v1170_v37  ;;  %1033 = vmatmul.bf16.gmra.mxu0 %v1950_v35  ;;  %v1994_v37 = vor.u32 %v2269_v26, %v1991_v27 }
 0x11e   : > { %1122 = vmatmul.bf16.gmra.mxu1 %v1954_v36  ;;  %v1990_v36 = vor.u32 %v2271_v25, %v1989_v24 }
 0x11f   : > { %v1337_v44 = vadd.f32 %v1259_v43, %v309_v42  ;;  %1211 = vmatmul.bf16.gmra.mxu2 %v1958_v40 }
 0x120   : > { %1300 = vmatmul.bf16.gmra.mxu3 %v1962_v41 }
 0x121   : > { %1369 = vst [vmem:[#allocation2] sm:$0xff] %v1337_v44 }
 0x122   : > { %v1172_v46 = vpop.f32.mrf.mxu2  ;;  %v996_v49 = vpop.f32.mrf.mxu0 }
 0x123   : > { %v1261_v47 = vpop.f32.mrf.mxu3  ;;  %v1173_v48 = vadd.f32 %v1172_v46, %v1084_v45  ;;  %v1085_v50 = vpop.f32.mrf.mxu1 }
 0x124   : > { %v1086_v62 = vadd.f32 %v1085_v50, %v996_v49  ;;  %v1997_v49 = vld [vmem:[%s2837_s23 + $0x180] sm:$0xf]  ;;  %v2274_v50 = vld [vmem:[%s2837_s23 + $0x18c] sm:$0xf0] }
 0x125   : > { %v1262_v52 = vadd.f32 %v1261_v47, %v1173_v48  ;;  %v314_v47 = vld [vmem:[#allocation2 + $0x30] sm:$0xff]  ;;  %v1998_v61 = vor.u32 %v2274_v50, %v1997_v49  ;;  %v2037_v50 = vld [vmem:[%s2837_s23 + $0x1c8] sm:$0xf] }
 0x126   : > { %v2031_v49 = vld [vmem:[%s2837_s23 + $0x1d0] sm:$0xf0] }
 0x127   : > { %v1338_v55 = vadd.f32 %v1262_v52, %v310_v51  ;;  %v2272_v52 = vld [vmem:[%s2837_s23 + $0x184] sm:$0xf] }
 0x129   : > { %1370 = vst [vmem:[#allocation2 + $0xd8] sm:$0xff] %v1338_v55  ;;  %v2275_v55 = vld [vmem:[%s2837_s23 + $0x194] sm:$0xf0] }
 0x12a   : > { %v1174_v63 = vpop.f32.mrf.mxu2  ;;  %v999_v4 = vpop.f32.mrf.mxu0 }
 0x12b   : > { %v1263_v0 = vpop.f32.mrf.mxu3  ;;  %v1175_v3 = vadd.f32 %v1174_v63, %v1086_v62  ;;  %v1088_v5 = vpop.f32.mrf.mxu1  ;;  %v2002_v62 = vor.u32 %v2272_v52, %v1999_v53  ;;  %v2281_v52 = vld [vmem:[%s2837_s23 + $0x1cc] sm:$0xf]  ;;  %v2039_v53 = vld [vmem:[%s2837_s23 + $0x1d8] sm:$0xf0] }
 0x12c   : > { %v1089_v11 = vadd.f32 %v1088_v5, %v999_v4  ;;  %v315_v4 = vld [vmem:[#allocation2 + $0x48] sm:$0xff] }
 0x12d   : > { %v1264_v9 = vadd.f32 %v1263_v0, %v1175_v3  ;;  %1038 = vmatmul.bf16.gmra.mxu0 %v1966_v1  ;;  %v2010_v3 = vor.u32 %v2273_v56, %v2007_v57 }
 0x12e   : > { %1127 = vmatmul.bf16.gmra.mxu1 %v1970_v2  ;;  %v2006_v2 = vor.u32 %v2275_v55, %v2005_v54 }
 0x12f   : > { %v1339_v10 = vadd.f32 %v1264_v9, %v311_v8  ;;  %1216 = vmatmul.bf16.gmra.mxu2 %v1974_v6 }
 0x130   : > { %1305 = vmatmul.bf16.gmra.mxu3 %v1978_v7 }
 0x131   : > { %1371 = vst [vmem:[#allocation2 + $0x18] sm:$0xff] %v1339_v10 }
 0x132   : > { %v1177_v12 = vpop.f32.mrf.mxu2  ;;  %v1001_v15 = vpop.f32.mrf.mxu0 }
 0x133   : > { %v1266_v13 = vpop.f32.mrf.mxu3  ;;  %v1178_v14 = vadd.f32 %v1177_v12, %v1089_v11  ;;  %v1090_v16 = vpop.f32.mrf.mxu1 }
 0x134   : > { %v1091_v28 = vadd.f32 %v1090_v16, %v1001_v15  ;;  %v2013_v15 = vld [vmem:[%s2837_s23 + $0x1a0] sm:$0xf]  ;;  %v2278_v16 = vld [vmem:[%s2837_s23 + $0x1ac] sm:$0xf0] }
 0x135   : > { %v1267_v18 = vadd.f32 %v1266_v13, %v1178_v14  ;;  %v316_v13 = vld [vmem:[#allocation2 + $0x80] sm:$0xff]  ;;  %v2014_v27 = vor.u32 %v2278_v16, %v2013_v15  ;;  %v2047_v15 = vld [vmem:[%s2837_s23 + $0x1f0] sm:$0xf0]  ;;  %v2053_v16 = vld [vmem:[%s2837_s23 + $0x1e8] sm:$0xf] }
 0x137   : > { %v1340_v21 = vadd.f32 %v1267_v18, %v312_v17  ;;  %v2276_v18 = vld [vmem:[%s2837_s23 + $0x1a4] sm:$0xf] }
 0x139   : > { %1372 = vst [vmem:[#allocation2 + $0x50] sm:$0xff] %v1340_v21  ;;  %v2279_v21 = vld [vmem:[%s2837_s23 + $0x1b4] sm:$0xf0] }
 0x13a   : > { %v1179_v29 = vpop.f32.mrf.mxu2  ;;  %v1004_v34 = vpop.f32.mrf.mxu0 }
 0x13b   : > { %v1268_v30 = vpop.f32.mrf.mxu3  ;;  %v1180_v33 = vadd.f32 %v1179_v29, %v1091_v28  ;;  %v1093_v35 = vpop.f32.mrf.mxu1  ;;  %v2018_v28 = vor.u32 %v2276_v18, %v2015_v19  ;;  %v2285_v18 = vld [vmem:[%s2837_s23 + $0x1ec] sm:$0xf]  ;;  %v2055_v19 = vld [vmem:[%s2837_s23 + $0x1f8] sm:$0xf0] }
 0x13c   : > { %v1094_v41 = vadd.f32 %v1093_v35, %v1004_v34  ;;  %v317_v34 = vld [vmem:[#allocation2 + $0x88] sm:$0xff] }
 0x13d   : > { %v1269_v39 = vadd.f32 %v1268_v30, %v1180_v33  ;;  %1043 = vmatmul.bf16.gmra.mxu0 %v1982_v31  ;;  %v2026_v33 = vor.u32 %v2277_v22, %v2023_v23 }
 0x13e   : > { %1132 = vmatmul.bf16.gmra.mxu1 %v1986_v32  ;;  %v2022_v32 = vor.u32 %v2279_v21, %v2021_v20 }
 0x13f   : > { %v1341_v40 = vadd.f32 %v1269_v39, %v313_v38  ;;  %1221 = vmatmul.bf16.gmra.mxu2 %v1990_v36 }
 0x140   : > { %1310 = vmatmul.bf16.gmra.mxu3 %v1994_v37 }
 0x141   : > { %1373 = vst [vmem:[#allocation2 + $0x68] sm:$0xff] %v1341_v40 }
 0x142   : > { %v1182_v42 = vpop.f32.mrf.mxu2  ;;  %v1006_v45 = vpop.f32.mrf.mxu0 }
 0x143   : > { %v1271_v43 = vpop.f32.mrf.mxu3  ;;  %v1183_v44 = vadd.f32 %v1182_v42, %v1094_v41  ;;  %v1095_v46 = vpop.f32.mrf.mxu1 }
 0x144   : > { %v1096_v58 = vadd.f32 %v1095_v46, %v1006_v45  ;;  %v2029_v45 = vld [vmem:[%s2837_s23 + $0x1c0] sm:$0xf]  ;;  %v2282_v46 = vld [vmem:[%s2837_s23 + $0x1cc] sm:$0xf0] }
 0x145   : > { %v1272_v48 = vadd.f32 %v1271_v43, %v1183_v44  ;;  %v318_v43 = vld [vmem:[#allocation2 + $0xe8] sm:$0xff]  ;;  %v2030_v57 = vor.u32 %v2282_v46, %v2029_v45 }
 0x147   : > { %v1342_v51 = vadd.f32 %v1272_v48, %v314_v47  ;;  %v2280_v48 = vld [vmem:[%s2837_s23 + $0x1c4] sm:$0xf] }
 0x149   : > { %1374 = vst [vmem:[#allocation2 + $0x30] sm:$0xff] %v1342_v51  ;;  %v2283_v51 = vld [vmem:[%s2837_s23 + $0x1d4] sm:$0xf0] }
 0x14a   : > { %v1184_v59 = vpop.f32.mrf.mxu2  ;;  %v1009_v0 = vpop.f32.mrf.mxu0 }
 0x14b   : > { %v1273_v60 = vpop.f32.mrf.mxu3  ;;  %v1185_v63 = vadd.f32 %v1184_v59, %v1096_v58  ;;  %v1098_v1 = vpop.f32.mrf.mxu1  ;;  %v2034_v58 = vor.u32 %v2280_v48, %v2031_v49  ;;  %v323_v48 = vld [vmem:[#allocation2 + $0x78] sm:$0xff] }
 0x14c   : > { %v1099_v7 = vadd.f32 %v1098_v1, %v1009_v0  ;;  %v319_v0 = vld [vmem:[#allocation2 + $0xb8] sm:$0xff] }
 0x14d   : > { %v1274_v5 = vadd.f32 %v1273_v60, %v1185_v63  ;;  %1048 = vmatmul.bf16.gmra.mxu0 %v1998_v61  ;;  %v2042_v63 = vor.u32 %v2281_v52, %v2039_v53 }
 0x14e   : > { %1137 = vmatmul.bf16.gmra.mxu1 %v2002_v62  ;;  %v2038_v62 = vor.u32 %v2283_v51, %v2037_v50 }
 0x14f   : > { %v1343_v6 = vadd.f32 %v1274_v5, %v315_v4  ;;  %1226 = vmatmul.bf16.gmra.mxu2 %v2006_v2 }
 0x150   : > { %1315 = vmatmul.bf16.gmra.mxu3 %v2010_v3 }
 0x151   : > { %1375 = vst [vmem:[#allocation2 + $0x48] sm:$0xff] %v1343_v6 }
 0x152   : > { %v1187_v8 = vpop.f32.mrf.mxu2  ;;  %v1011_v11 = vpop.f32.mrf.mxu0 }
 0x153   : > { %v1276_v9 = vpop.f32.mrf.mxu3  ;;  %v1188_v10 = vadd.f32 %v1187_v8, %v1099_v7  ;;  %v1100_v12 = vpop.f32.mrf.mxu1 }
 0x154   : > { %v1101_v24 = vadd.f32 %v1100_v12, %v1011_v11  ;;  %v2045_v11 = vld [vmem:[%s2837_s23 + $0x1e0] sm:$0xf]  ;;  %v2286_v12 = vld [vmem:[%s2837_s23 + $0x1ec] sm:$0xf0] }
 0x155   : > { %v1277_v14 = vadd.f32 %v1276_v9, %v1188_v10  ;;  %v320_v9 = vld [vmem:[#allocation2 + $0x60] sm:$0xff]  ;;  %v2046_v23 = vor.u32 %v2286_v12, %v2045_v11 }
 0x156   : > { %v326_v11 = vld [vmem:[#allocation2 + $0x40] sm:$0xff] }
 0x157   : > { %v1344_v17 = vadd.f32 %v1277_v14, %v316_v13  ;;  %v2284_v14 = vld [vmem:[%s2837_s23 + $0x1e4] sm:$0xf] }
 0x159   : > { %1376 = vst [vmem:[#allocation2 + $0x80] sm:$0xff] %v1344_v17  ;;  %v2287_v17 = vld [vmem:[%s2837_s23 + $0x1f4] sm:$0xf0] }
 0x15a   : > { %v1189_v25 = vpop.f32.mrf.mxu2  ;;  %v1014_v30 = vpop.f32.mrf.mxu0 }
 0x15b   : > { %v1278_v26 = vpop.f32.mrf.mxu3  ;;  %v1190_v29 = vadd.f32 %v1189_v25, %v1101_v24  ;;  %v1103_v31 = vpop.f32.mrf.mxu1  ;;  %v2050_v24 = vor.u32 %v2284_v14, %v2047_v15 }
 0x15c   : > { %v1104_v37 = vadd.f32 %v1103_v31, %v1014_v30  ;;  %v321_v30 = vld [vmem:[#allocation2 + $0xf0] sm:$0xff] }
 0x15d   : > { %v1279_v35 = vadd.f32 %v1278_v26, %v1190_v29  ;;  %1053 = vmatmul.bf16.gmra.mxu0 %v2014_v27  ;;  %v2058_v29 = vor.u32 %v2285_v18, %v2055_v19 }
 0x15e   : > { %1142 = vmatmul.bf16.gmra.mxu1 %v2018_v28  ;;  %v2054_v28 = vor.u32 %v2287_v17, %v2053_v16 }
 0x15f   : > { %v1345_v36 = vadd.f32 %v1279_v35, %v317_v34  ;;  %1231 = vmatmul.bf16.gmra.mxu2 %v2022_v32 }
 0x160   : > { %1320 = vmatmul.bf16.gmra.mxu3 %v2026_v33 }
 0x161   : > { %1377 = vst [vmem:[#allocation2 + $0x88] sm:$0xff] %v1345_v36 }
 0x162   : > { %v1192_v38 = vpop.f32.mrf.mxu2  ;;  %v1016_v41 = vpop.f32.mrf.mxu0 }
 0x163   : > { %v1281_v39 = vpop.f32.mrf.mxu3  ;;  %v1193_v40 = vadd.f32 %v1192_v38, %v1104_v37  ;;  %v1105_v42 = vpop.f32.mrf.mxu1 }
 0x164   : > { %v1106_v54 = vadd.f32 %v1105_v42, %v1016_v41 }
 0x165   : > { %v1282_v44 = vadd.f32 %v1281_v39, %v1193_v40  ;;  %v322_v39 = vld [vmem:[#allocation2 + $0x8] sm:$0xff] }
 0x167   : > { %v1346_v47 = vadd.f32 %v1282_v44, %v318_v43 }
 0x169   : > { %1378 = vst [vmem:[#allocation2 + $0xe8] sm:$0xff] %v1346_v47 }
 0x16a   : > { %v1194_v55 = vpop.f32.mrf.mxu2  ;;  %v1019_v60 = vpop.f32.mrf.mxu0 }
 0x16b   : > { %v1283_v56 = vpop.f32.mrf.mxu3  ;;  %v1195_v59 = vadd.f32 %v1194_v55, %v1106_v54  ;;  %v1108_v61 = vpop.f32.mrf.mxu1 }
 0x16c   : > { %v1109_v3 = vadd.f32 %v1108_v61, %v1019_v60 }
 0x16d   : > { %v1284_v1 = vadd.f32 %v1283_v56, %v1195_v59  ;;  %1058 = vmatmul.bf16.gmra.mxu0 %v2030_v57  ;;  %v324_v57 = vld [vmem:[#allocation2 + $0x38] sm:$0xff] }
 0x16e   : > { %1147 = vmatmul.bf16.gmra.mxu1 %v2034_v58 }
 0x16f   : > { %v1347_v2 = vadd.f32 %v1284_v1, %v319_v0  ;;  %1236 = vmatmul.bf16.gmra.mxu2 %v2038_v62 }
 0x170   : > { %1325 = vmatmul.bf16.gmra.mxu3 %v2042_v63 }
 0x171   : > { %1379 = vst [vmem:[#allocation2 + $0xb8] sm:$0xff] %v1347_v2  ;;  %v325_v2 = vld [vmem:[#allocation2 + $0x58] sm:$0xff] }
 0x172   : > { %v1197_v4 = vpop.f32.mrf.mxu2  ;;  %v1021_v7 = vpop.f32.mrf.mxu0 }
 0x173   : > { %v1286_v5 = vpop.f32.mrf.mxu3  ;;  %v1198_v6 = vadd.f32 %v1197_v4, %v1109_v3  ;;  %v1110_v8 = vpop.f32.mrf.mxu1 }
 0x174   : > { %v1111_v20 = vadd.f32 %v1110_v8, %v1021_v7 }
 0x175   : > { %v1287_v10 = vadd.f32 %v1286_v5, %v1198_v6 }
 0x177   : > { %v1348_v13 = vadd.f32 %v1287_v10, %v320_v9 }
 0x179   : > { %1380 = vst [vmem:[#allocation2 + $0x60] sm:$0xff] %v1348_v13 }
 0x17a   : > { %v1199_v21 = vpop.f32.mrf.mxu2  ;;  %v1024_v26 = vpop.f32.mrf.mxu0 }
 0x17b   : > { %v1288_v22 = vpop.f32.mrf.mxu3  ;;  %v1200_v25 = vadd.f32 %v1199_v21, %v1111_v20  ;;  %v1113_v27 = vpop.f32.mrf.mxu1  ;;  %v327_v20 = vld [vmem:[#allocation2 + $0xc8] sm:$0xff] }
 0x17c   : > { %v1114_v33 = vadd.f32 %v1113_v27, %v1024_v26 }
 0x17d   : > { %v1289_v31 = vadd.f32 %v1288_v22, %v1200_v25  ;;  %1063 = vmatmul.bf16.gmra.mxu0 %v2046_v23 }
 0x17e   : > { %1152 = vmatmul.bf16.gmra.mxu1 %v2050_v24 }
 0x17f   : > { %v1349_v32 = vadd.f32 %v1289_v31, %v321_v30  ;;  %1241 = vmatmul.bf16.gmra.mxu2 %v2054_v28 }
 0x180   : > { %1330 = vmatmul.bf16.gmra.mxu3 %v2058_v29  ;;  %v328_v29 = vld [vmem:[#allocation2 + $0xe0] sm:$0xff] }
 0x181   : > { %1381 = vst [vmem:[#allocation2 + $0xf0] sm:$0xff] %v1349_v32 }
 0x182   : > { %v1202_v34 = vpop.f32.mrf.mxu2  ;;  %v1026_v37 = vpop.f32.mrf.mxu0 }
 0x183   : > { %v1291_v35 = vpop.f32.mrf.mxu3  ;;  %v1203_v36 = vadd.f32 %v1202_v34, %v1114_v33  ;;  %v1115_v38 = vpop.f32.mrf.mxu1 }
 0x184   : > { %v1116_v42 = vadd.f32 %v1115_v38, %v1026_v37  ;;  %v329_v38 = vld [vmem:[#allocation2 + $0x90] sm:$0xff] }
 0x185   : > { %v1292_v40 = vadd.f32 %v1291_v35, %v1203_v36 }
 0x187   : > { %v1350_v41 = vadd.f32 %v1292_v40, %v322_v39 }
 0x189   : > { %1382 = vst [vmem:[#allocation2 + $0x8] sm:$0xff] %v1350_v41 }
 0x18a   : > { %v1204_v43 = vpop.f32.mrf.mxu2  ;;  %v1029_v46 = vpop.f32.mrf.mxu0 }
 0x18b   : > { %v1293_v44 = vpop.f32.mrf.mxu3  ;;  %v1205_v45 = vadd.f32 %v1204_v43, %v1116_v42  ;;  %v1118_v47 = vpop.f32.mrf.mxu1 }
 0x18c   : > { %v1119_v51 = vadd.f32 %v1118_v47, %v1029_v46  ;;  %v330_v47 = vld [vmem:[#allocation2 + $0x70] sm:$0xff] }
 0x18d   : > { %v1294_v49 = vadd.f32 %v1293_v44, %v1205_v45 }
 0x18f   : > { %v1351_v50 = vadd.f32 %v1294_v49, %v323_v48 }
 0x191   : > { %1383 = vst [vmem:[#allocation2 + $0x78] sm:$0xff] %v1351_v50 }
 0x192   : > { %v1207_v52 = vpop.f32.mrf.mxu2  ;;  %v1031_v55 = vpop.f32.mrf.mxu0 }
 0x193   : > { %v1296_v53 = vpop.f32.mrf.mxu3  ;;  %v1208_v54 = vadd.f32 %v1207_v52, %v1119_v51  ;;  %v1120_v56 = vpop.f32.mrf.mxu1 }
 0x194   : > { %v1121_v60 = vadd.f32 %v1120_v56, %v1031_v55  ;;  %v331_v56 = vld [vmem:[#allocation2 + $0xc0] sm:$0xff] }
 0x195   : > { %v1297_v58 = vadd.f32 %v1296_v53, %v1208_v54 }
 0x197   : > { %v1352_v59 = vadd.f32 %v1297_v58, %v324_v57 }
 0x199   : > { %1384 = vst [vmem:[#allocation2 + $0x38] sm:$0xff] %v1352_v59 }
 0x19a   : > { %v1209_v61 = vpop.f32.mrf.mxu2  ;;  %v1034_v0 = vpop.f32.mrf.mxu0 }
 0x19b   : > { %v1298_v62 = vpop.f32.mrf.mxu3  ;;  %v1210_v63 = vadd.f32 %v1209_v61, %v1121_v60  ;;  %v1123_v1 = vpop.f32.mrf.mxu1 }
 0x19c   : > { %v1124_v5 = vadd.f32 %v1123_v1, %v1034_v0  ;;  %v332_v1 = vld [vmem:[#allocation2 + $0xa8] sm:$0xff] }
 0x19d   : > { %v1299_v3 = vadd.f32 %v1298_v62, %v1210_v63 }
 0x19f   : > { %v1353_v4 = vadd.f32 %v1299_v3, %v325_v2 }
 0x1a1   : > { %1385 = vst [vmem:[#allocation2 + $0x58] sm:$0xff] %v1353_v4 }
 0x1a2   : > { %v1212_v6 = vpop.f32.mrf.mxu2  ;;  %v1036_v9 = vpop.f32.mrf.mxu0 }
 0x1a3   : > { %v1301_v7 = vpop.f32.mrf.mxu3  ;;  %v1213_v8 = vadd.f32 %v1212_v6, %v1124_v5  ;;  %v1125_v10 = vpop.f32.mrf.mxu1 }
 0x1a4   : > { %v1126_v14 = vadd.f32 %v1125_v10, %v1036_v9  ;;  %v333_v10 = vld [vmem:[#allocation2 + $0xd0] sm:$0xff] }
 0x1a5   : > { %v1302_v12 = vadd.f32 %v1301_v7, %v1213_v8 }
 0x1a7   : > { %v1354_v13 = vadd.f32 %v1302_v12, %v326_v11 }
 0x1a9   : > { %1386 = vst [vmem:[#allocation2 + $0x40] sm:$0xff] %v1354_v13 }
 0x1aa   : > { %v1214_v15 = vpop.f32.mrf.mxu2  ;;  %v1039_v18 = vpop.f32.mrf.mxu0 }
 0x1ab   : > { %v1303_v16 = vpop.f32.mrf.mxu3  ;;  %v1215_v17 = vadd.f32 %v1214_v15, %v1126_v14  ;;  %v1128_v19 = vpop.f32.mrf.mxu1 }
 0x1ac   : > { %v1129_v23 = vadd.f32 %v1128_v19, %v1039_v18  ;;  %v334_v19 = vld [vmem:[#allocation2 + $0x10] sm:$0xff] }
 0x1ad   : > { %v1304_v21 = vadd.f32 %v1303_v16, %v1215_v17 }
 0x1af   : > { %v1355_v22 = vadd.f32 %v1304_v21, %v327_v20 }
 0x1b1   : > { %1387 = vst [vmem:[#allocation2 + $0xc8] sm:$0xff] %v1355_v22 }
 0x1b2   : > { %v1217_v24 = vpop.f32.mrf.mxu2  ;;  %v1041_v27 = vpop.f32.mrf.mxu0 }
 0x1b3   : > { %v1306_v25 = vpop.f32.mrf.mxu3  ;;  %v1218_v26 = vadd.f32 %v1217_v24, %v1129_v23  ;;  %v1130_v28 = vpop.f32.mrf.mxu1 }
 0x1b4   : > { %v1131_v32 = vadd.f32 %v1130_v28, %v1041_v27  ;;  %v335_v28 = vld [vmem:[#allocation2 + $0x28] sm:$0xff] }
 0x1b5   : > { %v1307_v30 = vadd.f32 %v1306_v25, %v1218_v26 }
 0x1b7   : > { %v1356_v31 = vadd.f32 %v1307_v30, %v328_v29 }
 0x1b9   : > { %1388 = vst [vmem:[#allocation2 + $0xe0] sm:$0xff] %v1356_v31 }
 0x1ba   : > { %v1219_v33 = vpop.f32.mrf.mxu2  ;;  %v1044_v36 = vpop.f32.mrf.mxu0 }
 0x1bb   : > { %v1308_v34 = vpop.f32.mrf.mxu3  ;;  %v1220_v35 = vadd.f32 %v1219_v33, %v1131_v32  ;;  %v1133_v37 = vpop.f32.mrf.mxu1 }
 0x1bc   : > { %v1134_v41 = vadd.f32 %v1133_v37, %v1044_v36  ;;  %v336_v37 = vld [vmem:[#allocation2 + $0xa0] sm:$0xff] }
 0x1bd   : > { %v1309_v39 = vadd.f32 %v1308_v34, %v1220_v35 }
 0x1bf   : > { %v1357_v40 = vadd.f32 %v1309_v39, %v329_v38 }
 0x1c1   : > { %1389 = vst [vmem:[#allocation2 + $0x90] sm:$0xff] %v1357_v40 }
 0x1c2   : > { %v1222_v42 = vpop.f32.mrf.mxu2  ;;  %v1046_v45 = vpop.f32.mrf.mxu0 }
 0x1c3   : > { %v1311_v43 = vpop.f32.mrf.mxu3  ;;  %v1223_v44 = vadd.f32 %v1222_v42, %v1134_v41  ;;  %v1135_v46 = vpop.f32.mrf.mxu1 }
 0x1c4   : > { %v1136_v50 = vadd.f32 %v1135_v46, %v1046_v45 }
 0x1c5   : > { %v1312_v48 = vadd.f32 %v1311_v43, %v1223_v44  ;;  %v337_v44 = vld [vmem:[#allocation2 + $0xf8] sm:$0xff] }
 0x1c7   : > { %v1358_v49 = vadd.f32 %v1312_v48, %v330_v47 }
 0x1c9   : > { %1390 = vst [vmem:[#allocation2 + $0x70] sm:$0xff] %v1358_v49 }
 0x1ca   : > { %v1224_v51 = vpop.f32.mrf.mxu2  ;;  %v1049_v54 = vpop.f32.mrf.mxu0 }
 0x1cb   : > { %v1313_v52 = vpop.f32.mrf.mxu3  ;;  %v1225_v53 = vadd.f32 %v1224_v51, %v1136_v50  ;;  %v1138_v55 = vpop.f32.mrf.mxu1 }
 0x1cc   : > { %v1139_v59 = vadd.f32 %v1138_v55, %v1049_v54 }
 0x1cd   : > { %v1314_v57 = vadd.f32 %v1313_v52, %v1225_v53  ;;  %v338_v53 = vld [vmem:[#allocation2 + $0x20] sm:$0xff] }
 0x1cf   : > { %v1359_v58 = vadd.f32 %v1314_v57, %v331_v56 }
 0x1d1   : > { %1391 = vst [vmem:[#allocation2 + $0xc0] sm:$0xff] %v1359_v58 }
 0x1d2   : > { %v1227_v60 = vpop.f32.mrf.mxu2  ;;  %v1051_v63 = vpop.f32.mrf.mxu0 }
 0x1d3   : > { %v1316_v61 = vpop.f32.mrf.mxu3  ;;  %v1228_v62 = vadd.f32 %v1227_v60, %v1139_v59  ;;  %v1140_v0 = vpop.f32.mrf.mxu1 }
 0x1d4   : > { %v1141_v4 = vadd.f32 %v1140_v0, %v1051_v63 }
 0x1d5   : > { %v1317_v2 = vadd.f32 %v1316_v61, %v1228_v62  ;;  %v339_v61 = vld [vmem:[#allocation2 + $0x98] sm:$0xff] }
 0x1d7   : > { %v1360_v3 = vadd.f32 %v1317_v2, %v332_v1 }
 0x1d9   : > { %1392 = vst [vmem:[#allocation2 + $0xa8] sm:$0xff] %v1360_v3 }
 0x1da   : > { %v1229_v5 = vpop.f32.mrf.mxu2  ;;  %v1054_v8 = vpop.f32.mrf.mxu0 }
 0x1db   : > { %v1318_v6 = vpop.f32.mrf.mxu3  ;;  %v1230_v7 = vadd.f32 %v1229_v5, %v1141_v4  ;;  %v1143_v9 = vpop.f32.mrf.mxu1 }
 0x1dc   : > { %v1144_v13 = vadd.f32 %v1143_v9, %v1054_v8 }
 0x1dd   : > { %v1319_v11 = vadd.f32 %v1318_v6, %v1230_v7 }
 0x1df   : > { %v1361_v12 = vadd.f32 %v1319_v11, %v333_v10 }
 0x1e1   : > { %1393 = vst [vmem:[#allocation2 + $0xd0] sm:$0xff] %v1361_v12 }
 0x1e2   : > { %v1232_v14 = vpop.f32.mrf.mxu2  ;;  %v1056_v17 = vpop.f32.mrf.mxu0 }
 0x1e3   : > { %v1321_v15 = vpop.f32.mrf.mxu3  ;;  %v1233_v16 = vadd.f32 %v1232_v14, %v1144_v13  ;;  %v1145_v18 = vpop.f32.mrf.mxu1 }
 0x1e4   : > { %v1146_v22 = vadd.f32 %v1145_v18, %v1056_v17 }
 0x1e5   : > { %v1322_v20 = vadd.f32 %v1321_v15, %v1233_v16 }
 0x1e7   : > { %v1362_v21 = vadd.f32 %v1322_v20, %v334_v19 }
 0x1e9   : > { %1394 = vst [vmem:[#allocation2 + $0x10] sm:$0xff] %v1362_v21 }
 0x1ea   : > { %v1234_v23 = vpop.f32.mrf.mxu2  ;;  %v1059_v26 = vpop.f32.mrf.mxu0 }
 0x1eb   : > { %v1323_v24 = vpop.f32.mrf.mxu3  ;;  %v1235_v25 = vadd.f32 %v1234_v23, %v1146_v22  ;;  %v1148_v27 = vpop.f32.mrf.mxu1 }
 0x1ec   : > { %v1149_v31 = vadd.f32 %v1148_v27, %v1059_v26 }
 0x1ed   : > { %v1324_v29 = vadd.f32 %v1323_v24, %v1235_v25 }
 0x1ef   : > { %v1363_v30 = vadd.f32 %v1324_v29, %v335_v28 }
 0x1f1   : > { %1395 = vst [vmem:[#allocation2 + $0x28] sm:$0xff] %v1363_v30 }
 0x1f2   : > { %v1237_v32 = vpop.f32.mrf.mxu2  ;;  %v1061_v35 = vpop.f32.mrf.mxu0 }
 0x1f3   : > { %v1326_v33 = vpop.f32.mrf.mxu3  ;;  %v1238_v34 = vadd.f32 %v1237_v32, %v1149_v31  ;;  %v1150_v36 = vpop.f32.mrf.mxu1 }
 0x1f4   : > { %v1151_v40 = vadd.f32 %v1150_v36, %v1061_v35 }
 0x1f5   : > { %v1327_v38 = vadd.f32 %v1326_v33, %v1238_v34 }
 0x1f7   : > { %v1364_v39 = vadd.f32 %v1327_v38, %v336_v37 }
 0x1f9   : > { %1396 = vst [vmem:[#allocation2 + $0xa0] sm:$0xff] %v1364_v39 }
 0x1fa   : > { %v1239_v41 = vpop.f32.mrf.mxu2  ;;  %v1064_v45 = vpop.f32.mrf.mxu0 }
 0x1fb   : > { %v1328_v42 = vpop.f32.mrf.mxu3  ;;  %v1240_v43 = vadd.f32 %v1239_v41, %v1151_v40  ;;  %v1153_v46 = vpop.f32.mrf.mxu1 }
 0x1fc   : > { %v1154_v49 = vadd.f32 %v1153_v46, %v1064_v45 }
 0x1fd   : > { %v1329_v47 = vadd.f32 %v1328_v42, %v1240_v43 }
 0x1ff   : > { %v1365_v48 = vadd.f32 %v1329_v47, %v337_v44 }
 0x201   : > { %1397 = vst [vmem:[#allocation2 + $0xf8] sm:$0xff] %v1365_v48 }
 0x202   : > { %v1242_v50 = vpop.f32.mrf.mxu2  ;;  %v1066_v55 = vpop.f32.mrf.mxu0 }
 0x203   : > { %v1331_v51 = vpop.f32.mrf.mxu3  ;;  %v1243_v52 = vadd.f32 %v1242_v50, %v1154_v49  ;;  %v1155_v56 = vpop.f32.mrf.mxu1 }
 0x204   : > { %v1156_v58 = vadd.f32 %v1155_v56, %v1066_v55 }
 0x205   : > { %v1332_v54 = vadd.f32 %v1331_v51, %v1243_v52 }
 0x207   : > { %v1366_v57 = vadd.f32 %v1332_v54, %v338_v53 }
 0x209   : > { %1398 = vst [vmem:[#allocation2 + $0x20] sm:$0xff] %v1366_v57 }
 0x20a   : > { %v1244_v59 = vpop.f32.mrf.mxu2 }
 0x20b   : > { %v1245_v60 = vadd.f32 %v1244_v59, %v1156_v58  ;;  %v1333_v62 = vpop.f32.mrf.mxu3 }
 0x20d   : > { %v1334_v63 = vadd.f32 %v1333_v62, %v1245_v60  ;;  %1403 = sbr.rel (%p2187_p1) target bundleno = 755 (0x2f3), region = 52 }
 0x20f   : > { %v1367_v0 = vadd.f32 %v1334_v63, %v339_v61 }
 0x211   : > { %1399 = vst [vmem:[#allocation2 + $0x98] sm:$0xff] %v1367_v0 }
 0x212   : > { %v2327_v1 = vld [vmem:[#allocation7 + $0x38] sm:$0xff]  ;;  %v2326_v2 = vld [vmem:[#allocation7 + $0x30] sm:$0xff]  ;;  %v2325_v3 = vld [vmem:[#allocation7 + $0x28] sm:$0xff] }
 0x213   : > { %1516 = vmatpush.bf16.msra.mxu0 %v2327_v1  ;;  %2328 = vmatpush.bf16.msra.mxu1 %v2327_v1  ;;  %v2324_v4 = vld [vmem:[#allocation7 + $0x20] sm:$0xff]  ;;  %v2323_v5 = vld [vmem:[#allocation7 + $0x18] sm:$0xff]  ;;  %v2322_v6 = vld [vmem:[#allocation7 + $0x10] sm:$0xff] }
 0x214   : > { %2329 = vmatpush.bf16.msra.mxu2 %v2327_v1  ;;  %2330 = vmatpush.bf16.msra.mxu3 %v2327_v1  ;;  %v2321_v7 = vld [vmem:[#allocation7 + $0x8] sm:$0xff]  ;;  %v2320_v8 = vld [vmem:[#allocation7] sm:$0xff]  ;;  %v1404_v9 = vld [vmem:[#allocation2 + $0xb0] sm:$0xff] }
 0x215   : > { %v1405_v10 = vld [vmem:[#allocation2] sm:$0xff]  ;;  %v1413_v12 = vld [vmem:[#allocation2 + $0x88] sm:$0xff]  ;;  %v1420_v13 = vld [vmem:[#allocation2 + $0x38] sm:$0xff] }
 0x216   : > { %v1412_v11 = vld [vmem:[#allocation2 + $0x80] sm:$0xff]  ;;  %v1421_v14 = vld [vmem:[#allocation2 + $0x58] sm:$0xff]  ;;  %v1428_v15 = vld [vmem:[#allocation2 + $0xa8] sm:$0xff]  ;;  %v1436_v17 = vpack.c.bf16 %v1405_v10, %v1404_v9 }
 0x217   : > { %1517 = vmatpush.bf16.msra.mxu0 %v2326_v2  ;;  %2331 = vmatpush.bf16.msra.mxu1 %v2326_v2  ;;  %v1429_v16 = vld [vmem:[#allocation2 + $0xd0] sm:$0xff]  ;;  %v1440_v18 = vpack.c.bf16 %v1413_v12, %v1412_v11  ;;  %v1444_v19 = vpack.c.bf16 %v1421_v14, %v1420_v13  ;;  %v1406_v21 = vld [vmem:[#allocation2 + $0xd8] sm:$0xff]  ;;  %v1414_v23 = vld [vmem:[#allocation2 + $0xe8] sm:$0xff] }
 0x218   : > { %2332 = vmatpush.bf16.msra.mxu2 %v2326_v2  ;;  %2333 = vmatpush.bf16.msra.mxu3 %v2326_v2  ;;  %v1448_v20 = vpack.c.bf16 %v1429_v16, %v1428_v15  ;;  %v1407_v22 = vld [vmem:[#allocation2 + $0x18] sm:$0xff]  ;;  %v1422_v25 = vld [vmem:[#allocation2 + $0x40] sm:$0xff]  ;;  %v1423_v26 = vld [vmem:[#allocation2 + $0xc8] sm:$0xff] }
 0x219   : > { %v1415_v24 = vld [vmem:[#allocation2 + $0xb8] sm:$0xff]  ;;  %v1430_v27 = vld [vmem:[#allocation2 + $0x10] sm:$0xff]  ;;  %v1431_v28 = vld [vmem:[#allocation2 + $0x28] sm:$0xff]  ;;  %v1437_v29 = vpack.c.bf16 %v1407_v22, %v1406_v21  ;;  %v1445_v31 = vpack.c.bf16 %v1423_v26, %v1422_v25 }
 0x21a   : > { %v1441_v30 = vpack.c.bf16 %v1415_v24, %v1414_v23  ;;  %v1449_v32 = vpack.c.bf16 %v1431_v28, %v1430_v27  ;;  %v1408_v33 = vld [vmem:[#allocation2 + $0x50] sm:$0xff]  ;;  %v1409_v34 = vld [vmem:[#allocation2 + $0x68] sm:$0xff]  ;;  %v1416_v35 = vld [vmem:[#allocation2 + $0x60] sm:$0xff] }
 0x21b   : > { %1518 = vmatpush.bf16.msra.mxu0 %v2325_v3  ;;  %2334 = vmatpush.bf16.msra.mxu1 %v2325_v3  ;;  %v1417_v36 = vld [vmem:[#allocation2 + $0xf0] sm:$0xff]  ;;  %v1424_v37 = vld [vmem:[#allocation2 + $0xe0] sm:$0xff]  ;;  %v1433_v40 = vld [vmem:[#allocation2 + $0xf8] sm:$0xff]  ;;  %v1438_v41 = vpack.c.bf16 %v1409_v34, %v1408_v33 }
 0x21c   : > { %2335 = vmatpush.bf16.msra.mxu2 %v2325_v3  ;;  %2336 = vmatpush.bf16.msra.mxu3 %v2325_v3  ;;  %v1425_v38 = vld [vmem:[#allocation2 + $0x90] sm:$0xff]  ;;  %v1432_v39 = vld [vmem:[#allocation2 + $0xa0] sm:$0xff]  ;;  %v1442_v42 = vpack.c.bf16 %v1417_v36, %v1416_v35  ;;  %v1411_v46 = vld [vmem:[#allocation2 + $0x48] sm:$0xff] }
 0x21d   : > { %v1446_v43 = vpack.c.bf16 %v1425_v38, %v1424_v37  ;;  %v1450_v44 = vpack.c.bf16 %v1433_v40, %v1432_v39  ;;  %v1410_v45 = vld [vmem:[#allocation2 + $0x30] sm:$0xff]  ;;  %v1418_v47 = vld [vmem:[#allocation2 + $0x8] sm:$0xff]  ;;  %v1419_v48 = vld [vmem:[#allocation2 + $0x78] sm:$0xff] }
 0x21e   : > { %v1426_v49 = vld [vmem:[#allocation2 + $0x70] sm:$0xff]  ;;  %v1427_v50 = vld [vmem:[#allocation2 + $0xc0] sm:$0xff]  ;;  %v1435_v52 = vld [vmem:[#allocation2 + $0x98] sm:$0xff]  ;;  %v1439_v53 = vpack.c.bf16 %v1411_v46, %v1410_v45  ;;  %v1443_v54 = vpack.c.bf16 %v1419_v48, %v1418_v47 }
 0x21f   : > { %1519 = vmatpush.bf16.msra.mxu0 %v2324_v4  ;;  %2337 = vmatpush.bf16.msra.mxu1 %v2324_v4  ;;  %v1434_v51 = vld [vmem:[#allocation2 + $0x20] sm:$0xff]  ;;  %v1447_v55 = vpack.c.bf16 %v1427_v50, %v1426_v49 }
 0x220   : > { %2338 = vmatpush.bf16.msra.mxu2 %v2324_v4  ;;  %2339 = vmatpush.bf16.msra.mxu3 %v2324_v4  ;;  %v1451_v56 = vpack.c.bf16 %v1435_v52, %v1434_v51 }
 0x223   : > { %1520 = vmatpush.bf16.msra.mxu0 %v2323_v5  ;;  %2340 = vmatpush.bf16.msra.mxu1 %v2323_v5 }
 0x224   : > { %2341 = vmatpush.bf16.msra.mxu2 %v2323_v5  ;;  %2342 = vmatpush.bf16.msra.mxu3 %v2323_v5 }
 0x227   : > { %1521 = vmatpush.bf16.msra.mxu0 %v2322_v6  ;;  %2343 = vmatpush.bf16.msra.mxu1 %v2322_v6 }
 0x228   : > { %2344 = vmatpush.bf16.msra.mxu2 %v2322_v6  ;;  %2345 = vmatpush.bf16.msra.mxu3 %v2322_v6 }
 0x22b   : > { %1522 = vmatpush.bf16.msra.mxu0 %v2321_v7  ;;  %2346 = vmatpush.bf16.msra.mxu1 %v2321_v7 }
 0x22c   : > { %2347 = vmatpush.bf16.msra.mxu2 %v2321_v7  ;;  %2348 = vmatpush.bf16.msra.mxu3 %v2321_v7 }
 0x22f   : > { %1523 = vmatpush.bf16.msra.mxu0 %v2320_v8  ;;  %2349 = vmatpush.bf16.msra.mxu1 %v2320_v8 }
 0x230   : > { %2350 = vmatpush.bf16.msra.mxu2 %v2320_v8  ;;  %2351 = vmatpush.bf16.msra.mxu3 %v2320_v8 }
 0x232   : > { %1524 = vmatmul.bf16.vlgmr.msra.gmra.mxu0 %v1436_v17  ;;  %1544 = vmatmul.bf16.vlgmr.msra.gmra.mxu1 %v1440_v18 }
 0x233   : > { %1564 = vmatmul.bf16.vlgmr.msra.gmra.mxu2 %v1444_v19  ;;  %1584 = vmatmul.bf16.vlgmr.msra.gmra.mxu3 %v1448_v20 }
 0x242   : > { %1529 = vmatmul.bf16.gmra.mxu0 %v1437_v29  ;;  %1549 = vmatmul.bf16.gmra.mxu1 %v1441_v30 }
 0x243   : > { %1569 = vmatmul.bf16.gmra.mxu2 %v1445_v31  ;;  %1589 = vmatmul.bf16.gmra.mxu3 %v1449_v32 }
 0x252   : > { %1534 = vmatmul.bf16.gmra.mxu0 %v1438_v41  ;;  %1554 = vmatmul.bf16.gmra.mxu1 %v1442_v42 }
 0x253   : > { %1574 = vmatmul.bf16.gmra.mxu2 %v1446_v43  ;;  %1594 = vmatmul.bf16.gmra.mxu3 %v1450_v44 }
 0x262   : > { %1539 = vmatmul.bf16.gmra.mxu0 %v1439_v53  ;;  %1559 = vmatmul.bf16.gmra.mxu1 %v1443_v54 }
 0x263   : > { %1579 = vmatmul.bf16.gmra.mxu2 %v1447_v55  ;;  %1599 = vmatmul.bf16.gmra.mxu3 %v1451_v56 }
 0x2af   : > { %v1525_v57 = vpop.f32.mrf.mxu0  ;;  %v1545_v58 = vpop.f32.mrf.mxu1 }
 0x2b0   : > { %v1605_v59 = vmax.f32 %v1525_v57, 0.0  ;;  %v1613_v60 = vmax.f32 %v1545_v58, 0.0 }
 0x2b2   : > { %1637 = vst [vmem:[%s2860_s30] sm:$0xff] %v1605_v59 }
 0x2b3   : > { %1645 = vst [vmem:[%s2860_s30 + $0x40] sm:$0xff] %v1613_v60 }
 0x2b6   : > { %v1565_v61 = vpop.f32.mrf.mxu2  ;;  %v1585_v62 = vpop.f32.mrf.mxu3 }
 0x2b7   : > { %v1621_v63 = vmax.f32 %v1565_v61, 0.0  ;;  %v1629_v0 = vmax.f32 %v1585_v62, 0.0  ;;  %v1527_v1 = vpop.f32.mrf.mxu0  ;;  %v1547_v2 = vpop.f32.mrf.mxu1 }
 0x2b8   : > { %v1606_v3 = vmax.f32 %v1527_v1, 0.0  ;;  %v1614_v4 = vmax.f32 %v1547_v2, 0.0 }
 0x2b9   : > { %1653 = vst [vmem:[%s2860_s30 + $0x80] sm:$0xff] %v1621_v63 }
 0x2ba   : > { %1661 = vst [vmem:[%s2860_s30 + $0xc0] sm:$0xff] %v1629_v0 }
 0x2bb   : > { %1638 = vst [vmem:[%s2860_s30 + $0x8] sm:$0xff] %v1606_v3 }
 0x2bc   : > { %1646 = vst [vmem:[%s2860_s30 + $0x48] sm:$0xff] %v1614_v4 }
 0x2be   : > { %v1567_v5 = vpop.f32.mrf.mxu2  ;;  %v1587_v6 = vpop.f32.mrf.mxu3 }
 0x2bf   : > { %v1622_v7 = vmax.f32 %v1567_v5, 0.0  ;;  %v1630_v8 = vmax.f32 %v1587_v6, 0.0  ;;  %v1530_v9 = vpop.f32.mrf.mxu0  ;;  %v1550_v10 = vpop.f32.mrf.mxu1 }
 0x2c0   : > { %v1607_v11 = vmax.f32 %v1530_v9, 0.0  ;;  %v1615_v12 = vmax.f32 %v1550_v10, 0.0 }
 0x2c1   : > { %1654 = vst [vmem:[%s2860_s30 + $0x88] sm:$0xff] %v1622_v7 }
 0x2c2   : > { %1662 = vst [vmem:[%s2860_s30 + $0xc8] sm:$0xff] %v1630_v8 }
 0x2c3   : > { %1639 = vst [vmem:[%s2860_s30 + $0x10] sm:$0xff] %v1607_v11 }
 0x2c4   : > { %1647 = vst [vmem:[%s2860_s30 + $0x50] sm:$0xff] %v1615_v12 }
 0x2c6   : > { %v1570_v13 = vpop.f32.mrf.mxu2  ;;  %v1590_v14 = vpop.f32.mrf.mxu3 }
 0x2c7   : > { %v1623_v15 = vmax.f32 %v1570_v13, 0.0  ;;  %v1631_v16 = vmax.f32 %v1590_v14, 0.0  ;;  %v1532_v17 = vpop.f32.mrf.mxu0  ;;  %v1552_v18 = vpop.f32.mrf.mxu1 }
 0x2c8   : > { %v1608_v19 = vmax.f32 %v1532_v17, 0.0  ;;  %v1616_v20 = vmax.f32 %v1552_v18, 0.0 }
 0x2c9   : > { %1655 = vst [vmem:[%s2860_s30 + $0x90] sm:$0xff] %v1623_v15 }
 0x2ca   : > { %1663 = vst [vmem:[%s2860_s30 + $0xd0] sm:$0xff] %v1631_v16 }
 0x2cb   : > { %1640 = vst [vmem:[%s2860_s30 + $0x18] sm:$0xff] %v1608_v19 }
 0x2cc   : > { %1648 = vst [vmem:[%s2860_s30 + $0x58] sm:$0xff] %v1616_v20 }
 0x2ce   : > { %v1572_v21 = vpop.f32.mrf.mxu2  ;;  %v1592_v22 = vpop.f32.mrf.mxu3 }
 0x2cf   : > { %v1624_v23 = vmax.f32 %v1572_v21, 0.0  ;;  %v1632_v24 = vmax.f32 %v1592_v22, 0.0  ;;  %v1535_v25 = vpop.f32.mrf.mxu0  ;;  %v1555_v26 = vpop.f32.mrf.mxu1 }
 0x2d0   : > { %v1609_v27 = vmax.f32 %v1535_v25, 0.0  ;;  %v1617_v28 = vmax.f32 %v1555_v26, 0.0 }
 0x2d1   : > { %1656 = vst [vmem:[%s2860_s30 + $0x98] sm:$0xff] %v1624_v23 }
 0x2d2   : > { %1664 = vst [vmem:[%s2860_s30 + $0xd8] sm:$0xff] %v1632_v24 }
 0x2d3   : > { %1641 = vst [vmem:[%s2860_s30 + $0x20] sm:$0xff] %v1609_v27 }
 0x2d4   : > { %1649 = vst [vmem:[%s2860_s30 + $0x60] sm:$0xff] %v1617_v28 }
 0x2d6   : > { %v1575_v29 = vpop.f32.mrf.mxu2  ;;  %v1595_v30 = vpop.f32.mrf.mxu3 }
 0x2d7   : > { %v1625_v31 = vmax.f32 %v1575_v29, 0.0  ;;  %v1633_v32 = vmax.f32 %v1595_v30, 0.0  ;;  %v1537_v33 = vpop.f32.mrf.mxu0  ;;  %v1557_v34 = vpop.f32.mrf.mxu1 }
 0x2d8   : > { %v1610_v35 = vmax.f32 %v1537_v33, 0.0  ;;  %v1618_v36 = vmax.f32 %v1557_v34, 0.0 }
 0x2d9   : > { %1657 = vst [vmem:[%s2860_s30 + $0xa0] sm:$0xff] %v1625_v31 }
 0x2da   : > { %1665 = vst [vmem:[%s2860_s30 + $0xe0] sm:$0xff] %v1633_v32 }
 0x2db   : > { %1642 = vst [vmem:[%s2860_s30 + $0x28] sm:$0xff] %v1610_v35 }
 0x2dc   : > { %1650 = vst [vmem:[%s2860_s30 + $0x68] sm:$0xff] %v1618_v36 }
 0x2de   : > { %v1577_v37 = vpop.f32.mrf.mxu2  ;;  %v1597_v38 = vpop.f32.mrf.mxu3 }
 0x2df   : > { %v1626_v39 = vmax.f32 %v1577_v37, 0.0  ;;  %v1634_v40 = vmax.f32 %v1597_v38, 0.0  ;;  %v1540_v41 = vpop.f32.mrf.mxu0  ;;  %v1560_v42 = vpop.f32.mrf.mxu1 }
 0x2e0   : > { %v1611_v43 = vmax.f32 %v1540_v41, 0.0  ;;  %v1619_v44 = vmax.f32 %v1560_v42, 0.0 }
 0x2e1   : > { %1658 = vst [vmem:[%s2860_s30 + $0xa8] sm:$0xff] %v1626_v39 }
 0x2e2   : > { %1666 = vst [vmem:[%s2860_s30 + $0xe8] sm:$0xff] %v1634_v40 }
 0x2e3   : > { %1643 = vst [vmem:[%s2860_s30 + $0x30] sm:$0xff] %v1611_v43 }
 0x2e4   : > { %1651 = vst [vmem:[%s2860_s30 + $0x70] sm:$0xff] %v1619_v44 }
 0x2e6   : > { %v1580_v45 = vpop.f32.mrf.mxu2  ;;  %v1600_v46 = vpop.f32.mrf.mxu3 }
 0x2e7   : > { %v1627_v47 = vmax.f32 %v1580_v45, 0.0  ;;  %v1635_v48 = vmax.f32 %v1600_v46, 0.0  ;;  %v1542_v49 = vpop.f32.mrf.mxu0  ;;  %v1562_v50 = vpop.f32.mrf.mxu1 }
 0x2e8   : > { %v1612_v51 = vmax.f32 %v1542_v49, 0.0  ;;  %v1620_v52 = vmax.f32 %v1562_v50, 0.0 }
 0x2e9   : > { %1659 = vst [vmem:[%s2860_s30 + $0xb0] sm:$0xff] %v1627_v47 }
 0x2ea   : > { %1667 = vst [vmem:[%s2860_s30 + $0xf0] sm:$0xff] %v1635_v48 }
 0x2eb   : > { %1644 = vst [vmem:[%s2860_s30 + $0x38] sm:$0xff] %v1612_v51 }
 0x2ec   : > { %1652 = vst [vmem:[%s2860_s30 + $0x78] sm:$0xff] %v1620_v52 }
 0x2ee   : > { %v1582_v53 = vpop.f32.mrf.mxu2  ;;  %v1602_v54 = vpop.f32.mrf.mxu3 }
 0x2ef   : > { %v1628_v55 = vmax.f32 %v1582_v53, 0.0  ;;  %v1636_v56 = vmax.f32 %v1602_v54, 0.0 }
 0x2f1   : > { %1660 = vst [vmem:[%s2860_s30 + $0xb8] sm:$0xff] %v1628_v55 }
 0x2f2   : > { %1668 = vst [vmem:[%s2860_s30 + $0xf8] sm:$0xff] %v1636_v56 }
 0x2f3 PF: > { %s19_s22 = sadd.s32 1, %s2657_s22   ;;  %s3120_s24 = sld [smem:[#allocation11_spill]] }
 0x2f4   : > { %p16_p6 = scmp.ge.s32.totalorder %s19_s22, 10   ;;  %s3121_s17 = sld [smem:[#allocation16_spill]] }
 0x2f5   : > { %s3122_s19 = sld [smem:[#allocation13_spill]]  ;;  %s3125_s12 = smov %s2621_s13 }
 0x2f6   : > { %s3123_s26 = sld [smem:[#allocation14_spill]]  ;;  %s3126_s13 = smov %s2625_s14 }
 0x2f7   : > { %s3124_s21 = sld [smem:[#allocation15_spill]]  ;;  %s3127_s14 = smov %s2820_s2 }
 0x2f8   : > { %s3128_s15 = smov %s2633_s16  ;;  %s3130_s18 = smov %s2649_s20 }
 0x2f9   : > { %s3129_s16 = smov %s3120_s24  ;;  %18 = sbr.rel (!%p16_p6) target bundleno = 12 (0xc), region = 97 }
 0x2fc   : > { %s3131_s20 = smov %s3123_s26 }
 0x2fe   :  { %1691 = vsyncpa [#allocation4], 1 }
 0x2ff   :  { %1693 = vsyncpa [#allocation4 + $0x1], 1 }
 0x300   :  { %1694 = vsyncpa [#allocation6], 1 }
 0x301   :  { %1696 = vsyncpa [#allocation6 + $0x1], 1 }

</bundles_post_ra>
